<compile_context>
chip_gen: v7x
topology: tpu7x:2x2x1
jax: 0.10.0
libtpu: 0.0.40
codegen_flags: <defaults>
</compile_context>

<pallas_src>
import jax
import jax.numpy as jnp
from jax.experimental import pallas as pl
from jax.experimental.pallas import tpu as pltpu
import numpy as np

# ---- model sizes (small, consistent with the module) ----
INPUT_SIZE = 16      # vocab
EMBED = 8
HIDDEN = 32
OUTPUT = 16
BIDIR = True
ENC_DIM = HIDDEN * 2 if BIDIR else HIDDEN
B = 2                # real batch
SEQ = 8              # encoder length L
T_DEC = 4            # decode steps run inside one pallas_call

BP = 8               # batch padded to fill all 8 f32 sublanes
SLAB = 128           # lane-dense output width
ROW_LOGP, ROW_H, ROW_C, ROW_W = 0, 1, 2, 3   # sublane-groups of the output slab


# ------------------------------------------------------------------ #
# Pallas kernel: whole T-step decode loop in ONE invocation           #
# ------------------------------------------------------------------ #
def decode_loop_kernel(tok_ref, len_ref, enc_ref, h0_ref, c0_ref,
                       wtok_ref, wic_ref, whh_ref, blstm_ref,
                       mwe_ref, mwh_ref, mb_ref, vw_ref, vb_ref,
                       wcls_ref, bcls_ref,
                       out_ref):
    """T sequential `decode_step`s (attention + LSTM cell + classifier).

    Every input is a fully-resident VMEM block (DMA'd once).  The decoder LSTM
    state is loop-carried in registers; the per-step results are stored into a
    single lane-dense output slab written back to HBM once at kernel end.
    """
    f32 = jnp.float32

    enc3 = enc_ref[...]                                  # (BP, L, D)
    Bp, L, D = enc3.shape
    Hh = HIDDEN
    T = out_ref.shape[0]

    # ---- loop-invariant work, hoisted out of the per-step body ----
    # attention projection of the encoder outputs: (enc_flat @ MwE) + Mb
    encf = enc3.reshape(Bp * L, D)                       # leading-dim merge (layout-identical)
    m_enc = (jnp.dot(encf, mwe_ref[...], preferred_element_type=f32)
             .reshape(Bp, L, Hh)
             + mb_ref[...][None, :, :])                  # (BP, L, H)

    # in-kernel padding mask from lengths; finite -1e30 avoids NaN for empty rows
    col = jax.lax.broadcasted_iota(jnp.int32, (Bp, L), 1)
    invalid = col >= len_ref[...]                        # (BP, L) bool

    vw = vw_ref[...]                                     # (1, H)
    vb = vb_ref[...]                                     # (1, 1)
    mwh = mwh_ref[...]
    wtok = wtok_ref[...]
    wic = wic_ref[...]
    whh = whh_ref[...]
    blstm = blstm_ref[...]
    wcls = wcls_ref[...]
    bcls = bcls_ref[...]

    # deterministic unused lanes of the output slab (zero-filled ONCE)
    out_ref[...] = jnp.zeros(out_ref.shape, f32)

    h = h0_ref[...]                                      # (BP, H)
    c = c0_ref[...]                                      # (BP, H)

    # static, fully-unrolled decode loop (T is small and known at trace time)
    for t in range(T):
        # ---- Luong concat attention: V(tanh([enc ; h] @ M^T + Mb)) ----
        m_hid = jnp.dot(h, mwh, preferred_element_type=f32)          # (BP, H)
        m = jnp.tanh(m_enc + m_hid[:, None, :])                      # (BP, L, H)
        scores = jnp.sum(m * vw[None, :, :], axis=2) + vb            # (BP, L)
        scores = jnp.where(invalid, -1e30, scores)

        smax = jnp.max(scores, axis=1, keepdims=True)
        e = jnp.exp(scores - smax)
        w = e / jnp.sum(e, axis=1, keepdims=True)                    # exact divide
        ctx = jnp.sum(w[:, :, None] * enc3, axis=1)                  # (BP, D)

        # ---- embedding gather folded into the gate matmul: one-hot(tok) @ (E @ W_ie) ----
        tok = tok_ref[t]                                             # (BP, 1) int32
        onehot = (tok == jax.lax.broadcasted_iota(
            jnp.int32, (Bp, INPUT_SIZE), 1)).astype(f32)             # (BP, V)

        # ---- decoder LSTM cell (single step, gate order i, f, g, o) ----
        gates = (jnp.dot(onehot, wtok, preferred_element_type=f32)
                 + jnp.dot(ctx, wic, preferred_element_type=f32)
                 + jnp.dot(h, whh, preferred_element_type=f32)
                 + blstm)                                            # (BP, 4H)
        ig = jax.nn.sigmoid(gates[:, 0 * Hh:1 * Hh])
        fg = jax.nn.sigmoid(gates[:, 1 * Hh:2 * Hh])
        gg = jnp.tanh(gates[:, 2 * Hh:3 * Hh])
        og = jax.nn.sigmoid(gates[:, 3 * Hh:4 * Hh])
        c = fg * c + ig * gg
        h = og * jnp.tanh(c)

        # ---- classifier + log_softmax ----
        logits = jnp.dot(h, wcls, preferred_element_type=f32) + bcls
        lmax = jnp.max(logits, axis=1, keepdims=True)
        lse = jnp.log(jnp.sum(jnp.exp(logits - lmax), axis=1, keepdims=True)) + lmax
        logp = logits - lse

        # ---- store this step's results into the lane-dense slab (static indices) ----
        out_ref[t, ROW_LOGP, :, :OUTPUT] = logp
        out_ref[t, ROW_H, :, :HIDDEN] = h
        out_ref[t, ROW_C, :, :HIDDEN] = c
        out_ref[t, ROW_W, :, :L] = w


def decode_pallas(params, tokens, h, c, enc_out, lengths):
    """Run T sequential decode_step's in ONE pallas_call invocation.

    tokens (T,B) int32; h,c (1,B,H); enc_out (B,L,D); lengths (B,) int32.
    Returns (logp (T,B,V), (h_T, c_T) each (1,B,H), attn_weights (T,B,L)).
    """
    T, Bb = tokens.shape
    _, L, D = enc_out.shape
    pad = BP - Bb

    # wrapper-side layout plumbing: pad batch to 8 sublanes
    tok_p = jnp.pad(tokens, ((0, 0), (0, pad)))[..., None].astype(jnp.int32)          # (T, BP, 1)
    len_p = jnp.pad(lengths.astype(jnp.int32), (0, pad), constant_values=L)[:, None]  # (BP, 1)
    enc_p = jnp.pad(enc_out, ((0, pad), (0, 0), (0, 0)))                              # (BP, L, D)
    h_p = jnp.pad(h[0], ((0, pad), (0, 0)))                                           # (BP, H)
    c_p = jnp.pad(c[0], ((0, pad), (0, 0)))                                           # (BP, H)

    kp = params['kernel']
    weights = [kp['wtok'], kp['wic'], kp['whh'], kp['blstm'],
               kp['mwe'], kp['mwh'], kp['mb'], kp['vw'], kp['vb'],
               kp['wcls'], kp['bcls']]

    const2 = lambda i: (0, 0)
    const3 = lambda i: (0, 0, 0)
    in_specs = [
        pl.BlockSpec((T, BP, 1), const3),        # all decoder token ids (resident)
        pl.BlockSpec((BP, 1), const2),           # lengths (resident)
        pl.BlockSpec((BP, L, D), const3),        # encoder outputs (resident, single copy)
        pl.BlockSpec((BP, HIDDEN), const2),      # h0
        pl.BlockSpec((BP, HIDDEN), const2),      # c0
    ] + [pl.BlockSpec(wt.shape, const2) for wt in weights]   # all weights are 2-D

    slab = pl.pallas_call(
        decode_loop_kernel,
        grid=(1,),                               # single invocation; loop lives in-kernel
        in_specs=in_specs,
        out_specs=pl.BlockSpec((T, 4, BP, SLAB), lambda i: (0, 0, 0, 0)),
        out_shape=jax.ShapeDtypeStruct((T, 4, BP, SLAB), jnp.float32),
        compiler_params=pltpu.CompilerParams(
            dimension_semantics=("arbitrary",)),
    )(tok_p, len_p, enc_p, h_p, c_p, *weights)

    logp = slab[:, ROW_LOGP, :Bb, :OUTPUT]          # (T, B, V)
    attnw = slab[:, ROW_W, :Bb, :L]                 # (T, B, L)
    h_T = slab[T - 1, ROW_H, :Bb, :HIDDEN][None]    # (1, B, H)
    c_T = slab[T - 1, ROW_C, :Bb, :HIDDEN][None]    # (1, B, H)
    return logp, (h_T, c_T), attnw


# ------------------------------------------------------------------ #
# Plain-JAX glue: embedding + bidirectional encoder LSTM (encode)     #
# ------------------------------------------------------------------ #
def lstm_cell(x, h, c, w_ih, w_hh, b_ih, b_hh):
    gates = x @ w_ih.T + b_ih + h @ w_hh.T + b_hh
    i, f, g, o = jnp.split(gates, 4, axis=-1)
    i, f, g, o = jax.nn.sigmoid(i), jax.nn.sigmoid(f), jnp.tanh(g), jax.nn.sigmoid(o)
    c = f * c + i * g
    h = o * jnp.tanh(c)
    return h, c


def encode(params, input_ids):
    emb = params['embedding'][input_ids]             # (B, L, E)
    Bb = emb.shape[0]

    def run(name, reverse):
        w_ih, w_hh, b_ih, b_hh = params[name]
        xs = emb[:, ::-1, :] if reverse else emb
        h0 = jnp.zeros((Bb, HIDDEN), jnp.float32)
        c0 = jnp.zeros((Bb, HIDDEN), jnp.float32)

        def step(carry, x_t):
            h, c = carry
            h, c = lstm_cell(x_t, h, c, w_ih, w_hh, b_ih, b_hh)
            return (h, c), h

        _, hs = jax.lax.scan(step, (h0, c0), jnp.swapaxes(xs, 0, 1))
        hs = jnp.swapaxes(hs, 0, 1)                  # (B, L, H)
        return hs[:, ::-1, :] if reverse else hs

    return jnp.concatenate([run('enc_fwd', False), run('enc_bwd', True)], axis=-1)


# ------------------------------------------------------------------ #
# Pure-JAX reference for decode_step (mirrors the PyTorch code)       #
# ------------------------------------------------------------------ #
def decode_step_ref(params, token, h, c, enc_out, enc_mask):
    emb = params['embedding'][token[:, 0]][:, None, :]       # (B,1,E)
    hid = jnp.swapaxes(h, 0, 1)                              # (B,1,H)
    Bb, L, D = enc_out.shape
    Hrep = jnp.broadcast_to(hid, (Bb, L, HIDDEN))
    concat = jnp.concatenate([enc_out, Hrep], axis=2)
    Mw, Mb = params['attn_M']
    Vw, Vb = params['attn_V']
    m = jnp.tanh(concat @ Mw.T + Mb)
    scores = (m @ Vw.T)[..., 0] + Vb                         # (B,L)
    scores = jnp.where(enc_mask, -jnp.inf, scores)
    w = jax.nn.softmax(scores, axis=1)
    context = jnp.einsum('bl,bld->bd', w, enc_out)[:, None, :]
    x = jnp.concatenate([emb, context], axis=2)[:, 0, :]
    w_ih, w_hh, b_ih, b_hh = params['dec']
    h_new, c_new = lstm_cell(x, h[0], c[0], w_ih, w_hh, b_ih, b_hh)
    Wc, bc = params['cls']
    logits = h_new @ Wc.T + bc
    logp = jax.nn.log_softmax(logits, axis=-1)
    return logp[:, None, :], (h_new[None], c_new[None]), w[:, None, :]


# ------------------------------------------------------------------ #
# Deterministic parameter init (shapes from the module's __init__)    #
# ------------------------------------------------------------------ #
def init_params(key):
    ks = jax.random.split(key, 20)
    u = lambda k, shape, s=0.1: jax.random.uniform(k, shape, jnp.float32, -s, s)

    params = {}
    params['embedding'] = u(ks[0], (INPUT_SIZE, EMBED), 1.0)
    params['h0'] = u(ks[1], (HIDDEN,), 1.0)
    params['c0'] = u(ks[2], (HIDDEN,), 1.0)
    # encoder (bidirectional, 1 layer): weight_ih (4H,E), weight_hh (4H,H), biases (4H,)
    params['enc_fwd'] = (u(ks[3], (4 * HIDDEN, EMBED)), u(ks[4], (4 * HIDDEN, HIDDEN)),
                         u(ks[5], (4 * HIDDEN,)), u(ks[6], (4 * HIDDEN,)))
    params['enc_bwd'] = (u(ks[7], (4 * HIDDEN, EMBED)), u(ks[8], (4 * HIDDEN, HIDDEN)),
                         u(ks[9], (4 * HIDDEN,)), u(ks[10], (4 * HIDDEN,)))
    # decoder LSTM: input = EMBED + ENC_DIM
    params['dec'] = (u(ks[11], (4 * HIDDEN, EMBED + ENC_DIM)),
                     u(ks[12], (4 * HIDDEN, HIDDEN)),
                     u(ks[13], (4 * HIDDEN,)), u(ks[14], (4 * HIDDEN,)))
    # attention: M Linear(ENC_DIM+H -> H), V Linear(H -> 1)
    params['attn_M'] = (u(ks[15], (HIDDEN, ENC_DIM + HIDDEN)), u(ks[16], (HIDDEN,)))
    params['attn_V'] = (u(ks[17], (1, HIDDEN)), u(ks[18], (1,)))
    # classifier: Linear(H -> OUTPUT)
    kc = jax.random.split(ks[19], 2)
    params['cls'] = (u(kc[0], (OUTPUT, HIDDEN)), u(kc[1], (OUTPUT,)))

    # ---- pre-transposed / pre-fused views consumed by the Pallas kernel ----
    Mw, Mb = params['attn_M']
    Vw, Vb = params['attn_V']
    w_ih, w_hh, b_ih, b_hh = params['dec']
    Wc, bc = params['cls']
    params['kernel'] = dict(
        # embedding gather folded into the token->gates matmul: (V, 4H)
        wtok=jnp.asarray(params['embedding'] @ w_ih[:, :EMBED].T),
        wic=jnp.asarray(w_ih[:, EMBED:].T),          # (D, 4H)
        whh=jnp.asarray(w_hh.T),                     # (H, 4H)
        blstm=(b_ih + b_hh).reshape(1, 4 * HIDDEN),
        mwe=jnp.asarray(Mw[:, :ENC_DIM].T),          # (D, H)
        mwh=jnp.asarray(Mw[:, ENC_DIM:].T),          # (H, H)
        mb=Mb.reshape(1, HIDDEN),
        vw=Vw,                                       # (1, H)
        vb=Vb.reshape(1, 1),
        wcls=jnp.asarray(Wc.T),                      # (H, V)
        bcls=bc.reshape(1, OUTPUT),
    )
    return params


def init_hiddens(params, batch_size):
    h = jnp.broadcast_to(params['h0'], (1, batch_size, HIDDEN))
    c = jnp.broadcast_to(params['c0'], (1, batch_size, HIDDEN))
    return h, c


if __name__ == "__main__":
    key = jax.random.PRNGKey(0)
    kparam, kin, ktok = jax.random.split(key, 3)
    params = init_params(kparam)

    # inputs
    input_ids = jax.random.randint(kin, (B, SEQ), 0, INPUT_SIZE)     # encoder input
    tokens = jax.random.randint(ktok, (T_DEC, B), 0, INPUT_SIZE)     # decoder tokens (one per step)
    lengths = jnp.array([SEQ, SEQ - 3], dtype=jnp.int32)
    enc_mask = jnp.arange(SEQ)[None, :] >= lengths[:, None]          # (B, L) bool (reference only)

    # encode (plain-JAX glue) then T fused Pallas decode steps in one pallas_call
    enc_out = encode(params, input_ids)                              # (B, L, 2H)
    h, c = init_hiddens(params, B)

    logp, (h_T, c_T), attnw = decode_pallas(params, tokens, h, c, enc_out, lengths)
    jax.block_until_ready((logp, h_T, c_T, attnw))

    # reference: T sequential decode_step's (pure-JAX mirror of the PyTorch code)
    rh, rc = h, c
    ref_logp, ref_w = [], []
    for t in range(T_DEC):
        lp, (rh, rc), wt = decode_step_ref(params, tokens[t][:, None], rh, rc,
                                           enc_out, enc_mask)
        ref_logp.append(lp[:, 0, :])
        ref_w.append(wt[:, 0, :])
    ref_logp = jnp.stack(ref_logp)
    ref_w = jnp.stack(ref_w)

    # exact softmax divide now (approx reciprocal dropped) -> tighter tolerance
    tol = dict(atol=1e-4, rtol=1e-4)
    np.testing.assert_allclose(np.asarray(logp), np.asarray(ref_logp), **tol)
    np.testing.assert_allclose(np.asarray(attnw), np.asarray(ref_w), **tol)
    np.testing.assert_allclose(np.asarray(h_T), np.asarray(rh), **tol)
    np.testing.assert_allclose(np.asarray(c_T), np.asarray(rc), **tol)

    print("KERNEL_OK")
</pallas_src>

<mosaic_0001>
module attributes {stable_mosaic.version = 11 : i64} {
  func.func @decode_loop_kernel(%arg0: i32, %arg1: memref<4x8x1xi32, #tpu.memory_space<vmem>>, %arg2: memref<8x1xi32, #tpu.memory_space<vmem>>, %arg3: memref<8x8x64xf32, #tpu.memory_space<vmem>>, %arg4: memref<8x32xf32, #tpu.memory_space<vmem>>, %arg5: memref<8x32xf32, #tpu.memory_space<vmem>>, %arg6: memref<16x128xf32, #tpu.memory_space<vmem>>, %arg7: memref<64x128xf32, #tpu.memory_space<vmem>>, %arg8: memref<32x128xf32, #tpu.memory_space<vmem>>, %arg9: memref<1x128xf32, #tpu.memory_space<vmem>>, %arg10: memref<64x32xf32, #tpu.memory_space<vmem>>, %arg11: memref<32x32xf32, #tpu.memory_space<vmem>>, %arg12: memref<1x32xf32, #tpu.memory_space<vmem>>, %arg13: memref<1x32xf32, #tpu.memory_space<vmem>>, %arg14: memref<1x1xf32, #tpu.memory_space<vmem>>, %arg15: memref<32x16xf32, #tpu.memory_space<vmem>>, %arg16: memref<1x16xf32, #tpu.memory_space<vmem>>, %arg17: memref<4x4x8x128xf32, #tpu.memory_space<vmem>>) attributes {dimension_semantics = [#tpu.dimension_semantics<arbitrary>], iteration_bounds = array<i64: 1>, scalar_prefetch = 0 : i64, scratch_operands = 0 : i64, tpu.core_type = #tpu.core_type<tc>, window_params = [{pipeline_mode = #tpu.pipeline_mode<synchronous>, transform_indices = @transform_0, window_bounds = array<i64: 4, 8, 1>}, {pipeline_mode = #tpu.pipeline_mode<synchronous>, transform_indices = @transform_1, window_bounds = array<i64: 8, 1>}, {pipeline_mode = #tpu.pipeline_mode<synchronous>, transform_indices = @transform_2, window_bounds = array<i64: 8, 8, 64>}, {pipeline_mode = #tpu.pipeline_mode<synchronous>, transform_indices = @transform_3, window_bounds = array<i64: 8, 32>}, {pipeline_mode = #tpu.pipeline_mode<synchronous>, transform_indices = @transform_4, window_bounds = array<i64: 8, 32>}, {pipeline_mode = #tpu.pipeline_mode<synchronous>, transform_indices = @transform_5, window_bounds = array<i64: 16, 128>}, {pipeline_mode = #tpu.pipeline_mode<synchronous>, transform_indices = @transform_6, window_bounds = array<i64: 64, 128>}, {pipeline_mode = #tpu.pipeline_mode<synchronous>, transform_indices = @transform_7, window_bounds = array<i64: 32, 128>}, {pipeline_mode = #tpu.pipeline_mode<synchronous>, transform_indices = @transform_8, window_bounds = array<i64: 1, 128>}, {pipeline_mode = #tpu.pipeline_mode<synchronous>, transform_indices = @transform_9, window_bounds = array<i64: 64, 32>}, {pipeline_mode = #tpu.pipeline_mode<synchronous>, transform_indices = @transform_10, window_bounds = array<i64: 32, 32>}, {pipeline_mode = #tpu.pipeline_mode<synchronous>, transform_indices = @transform_11, window_bounds = array<i64: 1, 32>}, {pipeline_mode = #tpu.pipeline_mode<synchronous>, transform_indices = @transform_12, window_bounds = array<i64: 1, 32>}, {pipeline_mode = #tpu.pipeline_mode<synchronous>, transform_indices = @transform_13, window_bounds = array<i64: 1, 1>}, {pipeline_mode = #tpu.pipeline_mode<synchronous>, transform_indices = @transform_14, window_bounds = array<i64: 32, 16>}, {pipeline_mode = #tpu.pipeline_mode<synchronous>, transform_indices = @transform_15, window_bounds = array<i64: 1, 16>}, {pipeline_mode = #tpu.pipeline_mode<synchronous>, transform_indices = @transform_16, window_bounds = array<i64: 4, 4, 8, 128>}]} {
    %c0 = arith.constant 0 : index
    %c0_0 = arith.constant 0 : index
    %c0_1 = arith.constant 0 : index
    %0 = vector.load %arg3[%c0, %c0_0, %c0_1] : memref<8x8x64xf32, #tpu.memory_space<vmem>>, vector<8x8x64xf32>
    %1 = vector.shape_cast %0 : vector<8x8x64xf32> to vector<64x64xf32>
    %c0_2 = arith.constant 0 : index
    %c0_3 = arith.constant 0 : index
    %2 = vector.load %arg10[%c0_2, %c0_3] : memref<64x32xf32, #tpu.memory_space<vmem>>, vector<64x32xf32>
    %cst = arith.constant dense<0.000000e+00> : vector<64x32xf32>
    %3 = tpu.matmul %1, %2, %cst {dimension_numbers = #tpu.dot_dimension_numbers<[1], [0], [0], [1], [0, 0, 1, 1], [], []>} : vector<64x64xf32>, vector<64x32xf32>, vector<64x32xf32> -> vector<64x32xf32>
    %4 = vector.shape_cast %3 : vector<64x32xf32> to vector<8x8x32xf32>
    %c0_4 = arith.constant 0 : index
    %c0_5 = arith.constant 0 : index
    %5 = vector.load %arg12[%c0_4, %c0_5] : memref<1x32xf32, #tpu.memory_space<vmem>>, vector<1x32xf32>
    %6 = vector.shape_cast %5 : vector<1x32xf32> to vector<1x1x32xf32>
    %7 = vector.broadcast %6 : vector<1x1x32xf32> to vector<8x8x32xf32>
    %8 = arith.addf %4, %7 : vector<8x8x32xf32>
    %9 = tpu.iota {dimensions = array<i32: 1>} : vector<8x8xi32>
    %c0_6 = arith.constant 0 : index
    %c0_7 = arith.constant 0 : index
    %10 = vector.load %arg2[%c0_6, %c0_7] : memref<8x1xi32, #tpu.memory_space<vmem>>, vector<8x1xi32>
    %11 = vector.broadcast %10 : vector<8x1xi32> to vector<8x8xi32>
    %12 = arith.cmpi sge, %9, %11 : vector<8x8xi32>
    %c0_8 = arith.constant 0 : index
    %c0_9 = arith.constant 0 : index
    %13 = vector.load %arg13[%c0_8, %c0_9] : memref<1x32xf32, #tpu.memory_space<vmem>>, vector<1x32xf32>
    %c0_10 = arith.constant 0 : index
    %c0_11 = arith.constant 0 : index
    %14 = vector.load %arg14[%c0_10, %c0_11] : memref<1x1xf32, #tpu.memory_space<vmem>>, vector<1x1xf32>
    %c0_12 = arith.constant 0 : index
    %c0_13 = arith.constant 0 : index
    %15 = vector.load %arg11[%c0_12, %c0_13] : memref<32x32xf32, #tpu.memory_space<vmem>>, vector<32x32xf32>
    %c0_14 = arith.constant 0 : index
    %c0_15 = arith.constant 0 : index
    %16 = vector.load %arg6[%c0_14, %c0_15] : memref<16x128xf32, #tpu.memory_space<vmem>>, vector<16x128xf32>
    %c0_16 = arith.constant 0 : index
    %c0_17 = arith.constant 0 : index
    %17 = vector.load %arg7[%c0_16, %c0_17] : memref<64x128xf32, #tpu.memory_space<vmem>>, vector<64x128xf32>
    %c0_18 = arith.constant 0 : index
    %c0_19 = arith.constant 0 : index
    %18 = vector.load %arg8[%c0_18, %c0_19] : memref<32x128xf32, #tpu.memory_space<vmem>>, vector<32x128xf32>
    %c0_20 = arith.constant 0 : index
    %c0_21 = arith.constant 0 : index
    %19 = vector.load %arg9[%c0_20, %c0_21] : memref<1x128xf32, #tpu.memory_space<vmem>>, vector<1x128xf32>
    %c0_22 = arith.constant 0 : index
    %c0_23 = arith.constant 0 : index
    %20 = vector.load %arg15[%c0_22, %c0_23] : memref<32x16xf32, #tpu.memory_space<vmem>>, vector<32x16xf32>
    %c0_24 = arith.constant 0 : index
    %c0_25 = arith.constant 0 : index
    %21 = vector.load %arg16[%c0_24, %c0_25] : memref<1x16xf32, #tpu.memory_space<vmem>>, vector<1x16xf32>
    %cst_26 = arith.constant 0.000000e+00 : f32
    %22 = vector.broadcast %cst_26 : f32 to vector<4x4x8x128xf32>
    %c0_27 = arith.constant 0 : index
    %c0_28 = arith.constant 0 : index
    %c0_29 = arith.constant 0 : index
    %c0_30 = arith.constant 0 : index
    %23 = vector.load %arg17[%c0_27, %c0_28, %c0_29, %c0_30] : memref<4x4x8x128xf32, #tpu.memory_space<vmem>>, vector<4x4x8x128xf32>
    tpu.vector_store %arg17[%c0_27, %c0_28, %c0_29, %c0_30], %22 {strides = array<i32>} : memref<4x4x8x128xf32, #tpu.memory_space<vmem>>, vector<4x4x8x128xf32>,
    %c0_31 = arith.constant 0 : index
    %c0_32 = arith.constant 0 : index
    %24 = vector.load %arg4[%c0_31, %c0_32] : memref<8x32xf32, #tpu.memory_space<vmem>>, vector<8x32xf32>
    %c0_33 = arith.constant 0 : index
    %c0_34 = arith.constant 0 : index
    %25 = vector.load %arg5[%c0_33, %c0_34] : memref<8x32xf32, #tpu.memory_space<vmem>>, vector<8x32xf32>
    %cst_35 = arith.constant dense<0.000000e+00> : vector<8x32xf32>
    %26 = tpu.matmul %24, %15, %cst_35 {dimension_numbers = #tpu.dot_dimension_numbers<[1], [0], [0], [1], [0, 0, 1, 1], [], []>} : vector<8x32xf32>, vector<32x32xf32>, vector<8x32xf32> -> vector<8x32xf32>
    %27 = vector.shape_cast %26 : vector<8x32xf32> to vector<8x1x32xf32>
    %28 = vector.broadcast %27 : vector<8x1x32xf32> to vector<8x8x32xf32>
    %29 = arith.addf %8, %28 : vector<8x8x32xf32>
    %30 = math.tanh %29 : vector<8x8x32xf32>
    %31 = vector.shape_cast %13 : vector<1x32xf32> to vector<1x1x32xf32>
    %32 = vector.broadcast %31 : vector<1x1x32xf32> to vector<8x8x32xf32>
    %33 = arith.mulf %30, %32 : vector<8x8x32xf32>
    %cst_36 = arith.constant dense<0.000000e+00> : vector<8x8xf32>
    %34 = vector.multi_reduction <add>, %33, %cst_36 [2] : vector<8x8x32xf32> to vector<8x8xf32>
    %35 = vector.broadcast %14 : vector<1x1xf32> to vector<8x8xf32>
    %36 = arith.addf %34, %35 : vector<8x8xf32>
    %cst_37 = arith.constant -1.000000e+30 : f32
    %37 = vector.broadcast %cst_37 : f32 to vector<8x8xf32>
    %38 = arith.select %12, %37, %36 : vector<8x8xi1>, vector<8x8xf32>
    %cst_38 = arith.constant dense<0xFF800000> : vector<8xf32>
    %39 = vector.multi_reduction <maximumf>, %38, %cst_38 [1] : vector<8x8xf32> to vector<8xf32>
    %40 = vector.shape_cast %39 : vector<8xf32> to vector<8x1xf32>
    %41 = vector.broadcast %40 : vector<8x1xf32> to vector<8x8xf32>
    %42 = arith.subf %38, %41 : vector<8x8xf32>
    %43 = math.exp %42 : vector<8x8xf32>
    %cst_39 = arith.constant dense<0.000000e+00> : vector<8xf32>
    %44 = vector.multi_reduction <add>, %43, %cst_39 [1] : vector<8x8xf32> to vector<8xf32>
    %45 = vector.shape_cast %44 : vector<8xf32> to vector<8x1xf32>
    %46 = vector.broadcast %45 : vector<8x1xf32> to vector<8x8xf32>
    %47 = arith.divf %43, %46 : vector<8x8xf32>
    %48 = vector.shape_cast %47 : vector<8x8xf32> to vector<8x8x1xf32>
    %49 = vector.broadcast %48 : vector<8x8x1xf32> to vector<8x8x64xf32>
    %50 = arith.mulf %49, %0 : vector<8x8x64xf32>
    %cst_40 = arith.constant dense<0.000000e+00> : vector<8x64xf32>
    %51 = vector.multi_reduction <add>, %50, %cst_40 [1] : vector<8x8x64xf32> to vector<8x64xf32>
    %c0_41 = arith.constant 0 : index
    %c0_42 = arith.constant 0 : index
    %c0_43 = arith.constant 0 : index
    %52 = vector.load %arg1[%c0_41, %c0_42, %c0_43] : memref<4x8x1xi32, #tpu.memory_space<vmem>>, vector<1x8x1xi32>
    %53 = vector.shape_cast %52 : vector<1x8x1xi32> to vector<8x1xi32>
    %54 = tpu.iota {dimensions = array<i32: 1>} : vector<8x16xi32>
    %55 = vector.broadcast %53 : vector<8x1xi32> to vector<8x16xi32>
    %56 = arith.cmpi eq, %55, %54 : vector<8x16xi32>
    %57 = arith.extui %56 : vector<8x16xi1> to vector<8x16xi32>
    %58 = arith.sitofp %57 : vector<8x16xi32> to vector<8x16xf32>
    %cst_44 = arith.constant dense<0.000000e+00> : vector<8x128xf32>
    %59 = tpu.matmul %58, %16, %cst_44 {dimension_numbers = #tpu.dot_dimension_numbers<[1], [0], [0], [1], [0, 0, 1, 1], [], []>} : vector<8x16xf32>, vector<16x128xf32>, vector<8x128xf32> -> vector<8x128xf32>
    %cst_45 = arith.constant dense<0.000000e+00> : vector<8x128xf32>
    %60 = tpu.matmul %51, %17, %cst_45 {dimension_numbers = #tpu.dot_dimension_numbers<[1], [0], [0], [1], [0, 0, 1, 1], [], []>} : vector<8x64xf32>, vector<64x128xf32>, vector<8x128xf32> -> vector<8x128xf32>
    %61 = arith.addf %59, %60 : vector<8x128xf32>
    %cst_46 = arith.constant dense<0.000000e+00> : vector<8x128xf32>
    %62 = tpu.matmul %24, %18, %cst_46 {dimension_numbers = #tpu.dot_dimension_numbers<[1], [0], [0], [1], [0, 0, 1, 1], [], []>} : vector<8x32xf32>, vector<32x128xf32>, vector<8x128xf32> -> vector<8x128xf32>
    %63 = arith.addf %61, %62 : vector<8x128xf32>
    %64 = vector.broadcast %19 : vector<1x128xf32> to vector<8x128xf32>
    %65 = arith.addf %63, %64 : vector<8x128xf32>
    %66 = vector.extract_strided_slice %65 {offsets = [0, 0], sizes = [8, 32], strides = [1, 1]} : vector<8x128xf32> to vector<8x32xf32>
    %67 = arith.negf %66 : vector<8x32xf32>
    %68 = math.exp %67 : vector<8x32xf32>
    %cst_47 = arith.constant 1.000000e+00 : f32
    %69 = vector.broadcast %cst_47 : f32 to vector<8x32xf32>
    %70 = arith.addf %69, %68 : vector<8x32xf32>
    %71 = arith.divf %69, %70 : vector<8x32xf32>
    %72 = vector.extract_strided_slice %65 {offsets = [0, 32], sizes = [8, 32], strides = [1, 1]} : vector<8x128xf32> to vector<8x32xf32>
    %73 = arith.negf %72 : vector<8x32xf32>
    %74 = math.exp %73 : vector<8x32xf32>
    %cst_48 = arith.constant 1.000000e+00 : f32
    %75 = vector.broadcast %cst_48 : f32 to vector<8x32xf32>
    %76 = arith.addf %75, %74 : vector<8x32xf32>
    %77 = arith.divf %75, %76 : vector<8x32xf32>
    %78 = vector.extract_strided_slice %65 {offsets = [0, 64], sizes = [8, 32], strides = [1, 1]} : vector<8x128xf32> to vector<8x32xf32>
    %79 = math.tanh %78 : vector<8x32xf32>
    %80 = vector.extract_strided_slice %65 {offsets = [0, 96], sizes = [8, 32], strides = [1, 1]} : vector<8x128xf32> to vector<8x32xf32>
    %81 = arith.negf %80 : vector<8x32xf32>
    %82 = math.exp %81 : vector<8x32xf32>
    %cst_49 = arith.constant 1.000000e+00 : f32
    %83 = vector.broadcast %cst_49 : f32 to vector<8x32xf32>
    %84 = arith.addf %83, %82 : vector<8x32xf32>
    %85 = arith.divf %83, %84 : vector<8x32xf32>
    %86 = arith.mulf %77, %25 : vector<8x32xf32>
    %87 = arith.mulf %71, %79 : vector<8x32xf32>
    %88 = arith.addf %86, %87 : vector<8x32xf32>
    %89 = math.tanh %88 : vector<8x32xf32>
    %90 = arith.mulf %85, %89 : vector<8x32xf32>
    %cst_50 = arith.constant dense<0.000000e+00> : vector<8x16xf32>
    %91 = tpu.matmul %90, %20, %cst_50 {dimension_numbers = #tpu.dot_dimension_numbers<[1], [0], [0], [1], [0, 0, 1, 1], [], []>} : vector<8x32xf32>, vector<32x16xf32>, vector<8x16xf32> -> vector<8x16xf32>
    %92 = vector.broadcast %21 : vector<1x16xf32> to vector<8x16xf32>
    %93 = arith.addf %91, %92 : vector<8x16xf32>
    %cst_51 = arith.constant dense<0xFF800000> : vector<8xf32>
    %94 = vector.multi_reduction <maximumf>, %93, %cst_51 [1] : vector<8x16xf32> to vector<8xf32>
    %95 = vector.shape_cast %94 : vector<8xf32> to vector<8x1xf32>
    %96 = vector.broadcast %95 : vector<8x1xf32> to vector<8x16xf32>
    %97 = arith.subf %93, %96 : vector<8x16xf32>
    %98 = math.exp %97 : vector<8x16xf32>
    %cst_52 = arith.constant dense<0.000000e+00> : vector<8xf32>
    %99 = vector.multi_reduction <add>, %98, %cst_52 [1] : vector<8x16xf32> to vector<8xf32>
    %100 = vector.shape_cast %99 : vector<8xf32> to vector<8x1xf32>
    %101 = math.log %100 : vector<8x1xf32>
    %102 = arith.addf %101, %95 : vector<8x1xf32>
    %103 = vector.broadcast %102 : vector<8x1xf32> to vector<8x16xf32>
    %104 = arith.subf %93, %103 : vector<8x16xf32>
    %c0_53 = arith.constant 0 : index
    %c0_54 = arith.constant 0 : index
    %c0_55 = arith.constant 0 : index
    %c0_56 = arith.constant 0 : index
    %105 = vector.load %arg17[%c0_53, %c0_54, %c0_55, %c0_56] : memref<4x4x8x128xf32, #tpu.memory_space<vmem>>, vector<1x1x8x16xf32>
    %106 = vector.shape_cast %105 : vector<1x1x8x16xf32> to vector<8x16xf32>
    %107 = vector.shape_cast %104 : vector<8x16xf32> to vector<1x1x8x16xf32>
    tpu.vector_store %arg17[%c0_53, %c0_54, %c0_55, %c0_56], %107 {strides = array<i32>} : memref<4x4x8x128xf32, #tpu.memory_space<vmem>>, vector<1x1x8x16xf32>,
    %c0_57 = arith.constant 0 : index
    %c1 = arith.constant 1 : index
    %c0_58 = arith.constant 0 : index
    %c0_59 = arith.constant 0 : index
    %108 = vector.load %arg17[%c0_57, %c1, %c0_58, %c0_59] : memref<4x4x8x128xf32, #tpu.memory_space<vmem>>, vector<1x1x8x32xf32>
    %109 = vector.shape_cast %108 : vector<1x1x8x32xf32> to vector<8x32xf32>
    %110 = vector.shape_cast %90 : vector<8x32xf32> to vector<1x1x8x32xf32>
    tpu.vector_store %arg17[%c0_57, %c1, %c0_58, %c0_59], %110 {strides = array<i32>} : memref<4x4x8x128xf32, #tpu.memory_space<vmem>>, vector<1x1x8x32xf32>,
    %c0_60 = arith.constant 0 : index
    %c2 = arith.constant 2 : index
    %c0_61 = arith.constant 0 : index
    %c0_62 = arith.constant 0 : index
    %111 = vector.load %arg17[%c0_60, %c2, %c0_61, %c0_62] : memref<4x4x8x128xf32, #tpu.memory_space<vmem>>, vector<1x1x8x32xf32>
    %112 = vector.shape_cast %111 : vector<1x1x8x32xf32> to vector<8x32xf32>
    %113 = vector.shape_cast %88 : vector<8x32xf32> to vector<1x1x8x32xf32>
    tpu.vector_store %arg17[%c0_60, %c2, %c0_61, %c0_62], %113 {strides = array<i32>} : memref<4x4x8x128xf32, #tpu.memory_space<vmem>>, vector<1x1x8x32xf32>,
    %c0_63 = arith.constant 0 : index
    %c3 = arith.constant 3 : index
    %c0_64 = arith.constant 0 : index
    %c0_65 = arith.constant 0 : index
    %114 = vector.load %arg17[%c0_63, %c3, %c0_64, %c0_65] : memref<4x4x8x128xf32, #tpu.memory_space<vmem>>, vector<1x1x8x8xf32>
    %115 = vector.shape_cast %114 : vector<1x1x8x8xf32> to vector<8x8xf32>
    %116 = vector.shape_cast %47 : vector<8x8xf32> to vector<1x1x8x8xf32>
    tpu.vector_store %arg17[%c0_63, %c3, %c0_64, %c0_65], %116 {strides = array<i32>} : memref<4x4x8x128xf32, #tpu.memory_space<vmem>>, vector<1x1x8x8xf32>,
    %cst_66 = arith.constant dense<0.000000e+00> : vector<8x32xf32>
    %117 = tpu.matmul %90, %15, %cst_66 {dimension_numbers = #tpu.dot_dimension_numbers<[1], [0], [0], [1], [0, 0, 1, 1], [], []>} : vector<8x32xf32>, vector<32x32xf32>, vector<8x32xf32> -> vector<8x32xf32>
    %118 = vector.shape_cast %117 : vector<8x32xf32> to vector<8x1x32xf32>
    %119 = vector.broadcast %118 : vector<8x1x32xf32> to vector<8x8x32xf32>
    %120 = arith.addf %8, %119 : vector<8x8x32xf32>
    %121 = math.tanh %120 : vector<8x8x32xf32>
    %122 = vector.shape_cast %13 : vector<1x32xf32> to vector<1x1x32xf32>
    %123 = vector.broadcast %122 : vector<1x1x32xf32> to vector<8x8x32xf32>
    %124 = arith.mulf %121, %123 : vector<8x8x32xf32>
    %cst_67 = arith.constant dense<0.000000e+00> : vector<8x8xf32>
    %125 = vector.multi_reduction <add>, %124, %cst_67 [2] : vector<8x8x32xf32> to vector<8x8xf32>
    %126 = vector.broadcast %14 : vector<1x1xf32> to vector<8x8xf32>
    %127 = arith.addf %125, %126 : vector<8x8xf32>
    %cst_68 = arith.constant -1.000000e+30 : f32
    %128 = vector.broadcast %cst_68 : f32 to vector<8x8xf32>
    %129 = arith.select %12, %128, %127 : vector<8x8xi1>, vector<8x8xf32>
    %cst_69 = arith.constant dense<0xFF800000> : vector<8xf32>
    %130 = vector.multi_reduction <maximumf>, %129, %cst_69 [1] : vector<8x8xf32> to vector<8xf32>
    %131 = vector.shape_cast %130 : vector<8xf32> to vector<8x1xf32>
    %132 = vector.broadcast %131 : vector<8x1xf32> to vector<8x8xf32>
    %133 = arith.subf %129, %132 : vector<8x8xf32>
    %134 = math.exp %133 : vector<8x8xf32>
    %cst_70 = arith.constant dense<0.000000e+00> : vector<8xf32>
    %135 = vector.multi_reduction <add>, %134, %cst_70 [1] : vector<8x8xf32> to vector<8xf32>
    %136 = vector.shape_cast %135 : vector<8xf32> to vector<8x1xf32>
    %137 = vector.broadcast %136 : vector<8x1xf32> to vector<8x8xf32>
    %138 = arith.divf %134, %137 : vector<8x8xf32>
    %139 = vector.shape_cast %138 : vector<8x8xf32> to vector<8x8x1xf32>
    %140 = vector.broadcast %139 : vector<8x8x1xf32> to vector<8x8x64xf32>
    %141 = arith.mulf %140, %0 : vector<8x8x64xf32>
    %cst_71 = arith.constant dense<0.000000e+00> : vector<8x64xf32>
    %142 = vector.multi_reduction <add>, %141, %cst_71 [1] : vector<8x8x64xf32> to vector<8x64xf32>
    %c1_72 = arith.constant 1 : index
    %c0_73 = arith.constant 0 : index
    %c0_74 = arith.constant 0 : index
    %143 = vector.load %arg1[%c1_72, %c0_73, %c0_74] : memref<4x8x1xi32, #tpu.memory_space<vmem>>, vector<1x8x1xi32>
    %144 = vector.shape_cast %143 : vector<1x8x1xi32> to vector<8x1xi32>
    %145 = tpu.iota {dimensions = array<i32: 1>} : vector<8x16xi32>
    %146 = vector.broadcast %144 : vector<8x1xi32> to vector<8x16xi32>
    %147 = arith.cmpi eq, %146, %145 : vector<8x16xi32>
    %148 = arith.extui %147 : vector<8x16xi1> to vector<8x16xi32>
    %149 = arith.sitofp %148 : vector<8x16xi32> to vector<8x16xf32>
    %cst_75 = arith.constant dense<0.000000e+00> : vector<8x128xf32>
    %150 = tpu.matmul %149, %16, %cst_75 {dimension_numbers = #tpu.dot_dimension_numbers<[1], [0], [0], [1], [0, 0, 1, 1], [], []>} : vector<8x16xf32>, vector<16x128xf32>, vector<8x128xf32> -> vector<8x128xf32>
    %cst_76 = arith.constant dense<0.000000e+00> : vector<8x128xf32>
    %151 = tpu.matmul %142, %17, %cst_76 {dimension_numbers = #tpu.dot_dimension_numbers<[1], [0], [0], [1], [0, 0, 1, 1], [], []>} : vector<8x64xf32>, vector<64x128xf32>, vector<8x128xf32> -> vector<8x128xf32>
    %152 = arith.addf %150, %151 : vector<8x128xf32>
    %cst_77 = arith.constant dense<0.000000e+00> : vector<8x128xf32>
    %153 = tpu.matmul %90, %18, %cst_77 {dimension_numbers = #tpu.dot_dimension_numbers<[1], [0], [0], [1], [0, 0, 1, 1], [], []>} : vector<8x32xf32>, vector<32x128xf32>, vector<8x128xf32> -> vector<8x128xf32>
    %154 = arith.addf %152, %153 : vector<8x128xf32>
    %155 = vector.broadcast %19 : vector<1x128xf32> to vector<8x128xf32>
    %156 = arith.addf %154, %155 : vector<8x128xf32>
    %157 = vector.extract_strided_slice %156 {offsets = [0, 0], sizes = [8, 32], strides = [1, 1]} : vector<8x128xf32> to vector<8x32xf32>
    %158 = arith.negf %157 : vector<8x32xf32>
    %159 = math.exp %158 : vector<8x32xf32>
    %cst_78 = arith.constant 1.000000e+00 : f32
    %160 = vector.broadcast %cst_78 : f32 to vector<8x32xf32>
    %161 = arith.addf %160, %159 : vector<8x32xf32>
    %162 = arith.divf %160, %161 : vector<8x32xf32>
    %163 = vector.extract_strided_slice %156 {offsets = [0, 32], sizes = [8, 32], strides = [1, 1]} : vector<8x128xf32> to vector<8x32xf32>
    %164 = arith.negf %163 : vector<8x32xf32>
    %165 = math.exp %164 : vector<8x32xf32>
    %cst_79 = arith.constant 1.000000e+00 : f32
    %166 = vector.broadcast %cst_79 : f32 to vector<8x32xf32>
    %167 = arith.addf %166, %165 : vector<8x32xf32>
    %168 = arith.divf %166, %167 : vector<8x32xf32>
    %169 = vector.extract_strided_slice %156 {offsets = [0, 64], sizes = [8, 32], strides = [1, 1]} : vector<8x128xf32> to vector<8x32xf32>
    %170 = math.tanh %169 : vector<8x32xf32>
    %171 = vector.extract_strided_slice %156 {offsets = [0, 96], sizes = [8, 32], strides = [1, 1]} : vector<8x128xf32> to vector<8x32xf32>
    %172 = arith.negf %171 : vector<8x32xf32>
    %173 = math.exp %172 : vector<8x32xf32>
    %cst_80 = arith.constant 1.000000e+00 : f32
    %174 = vector.broadcast %cst_80 : f32 to vector<8x32xf32>
    %175 = arith.addf %174, %173 : vector<8x32xf32>
    %176 = arith.divf %174, %175 : vector<8x32xf32>
    %177 = arith.mulf %168, %88 : vector<8x32xf32>
    %178 = arith.mulf %162, %170 : vector<8x32xf32>
    %179 = arith.addf %177, %178 : vector<8x32xf32>
    %180 = math.tanh %179 : vector<8x32xf32>
    %181 = arith.mulf %176, %180 : vector<8x32xf32>
    %cst_81 = arith.constant dense<0.000000e+00> : vector<8x16xf32>
    %182 = tpu.matmul %181, %20, %cst_81 {dimension_numbers = #tpu.dot_dimension_numbers<[1], [0], [0], [1], [0, 0, 1, 1], [], []>} : vector<8x32xf32>, vector<32x16xf32>, vector<8x16xf32> -> vector<8x16xf32>
    %183 = vector.broadcast %21 : vector<1x16xf32> to vector<8x16xf32>
    %184 = arith.addf %182, %183 : vector<8x16xf32>
    %cst_82 = arith.constant dense<0xFF800000> : vector<8xf32>
    %185 = vector.multi_reduction <maximumf>, %184, %cst_82 [1] : vector<8x16xf32> to vector<8xf32>
    %186 = vector.shape_cast %185 : vector<8xf32> to vector<8x1xf32>
    %187 = vector.broadcast %186 : vector<8x1xf32> to vector<8x16xf32>
    %188 = arith.subf %184, %187 : vector<8x16xf32>
    %189 = math.exp %188 : vector<8x16xf32>
    %cst_83 = arith.constant dense<0.000000e+00> : vector<8xf32>
    %190 = vector.multi_reduction <add>, %189, %cst_83 [1] : vector<8x16xf32> to vector<8xf32>
    %191 = vector.shape_cast %190 : vector<8xf32> to vector<8x1xf32>
    %192 = math.log %191 : vector<8x1xf32>
    %193 = arith.addf %192, %186 : vector<8x1xf32>
    %194 = vector.broadcast %193 : vector<8x1xf32> to vector<8x16xf32>
    %195 = arith.subf %184, %194 : vector<8x16xf32>
    %c1_84 = arith.constant 1 : index
    %c0_85 = arith.constant 0 : index
    %c0_86 = arith.constant 0 : index
    %c0_87 = arith.constant 0 : index
    %196 = vector.load %arg17[%c1_84, %c0_85, %c0_86, %c0_87] : memref<4x4x8x128xf32, #tpu.memory_space<vmem>>, vector<1x1x8x16xf32>
    %197 = vector.shape_cast %196 : vector<1x1x8x16xf32> to vector<8x16xf32>
    %198 = vector.shape_cast %195 : vector<8x16xf32> to vector<1x1x8x16xf32>
    tpu.vector_store %arg17[%c1_84, %c0_85, %c0_86, %c0_87], %198 {strides = array<i32>} : memref<4x4x8x128xf32, #tpu.memory_space<vmem>>, vector<1x1x8x16xf32>,
    %c1_88 = arith.constant 1 : index
    %c1_89 = arith.constant 1 : index
    %c0_90 = arith.constant 0 : index
    %c0_91 = arith.constant 0 : index
    %199 = vector.load %arg17[%c1_88, %c1_89, %c0_90, %c0_91] : memref<4x4x8x128xf32, #tpu.memory_space<vmem>>, vector<1x1x8x32xf32>
    %200 = vector.shape_cast %199 : vector<1x1x8x32xf32> to vector<8x32xf32>
    %201 = vector.shape_cast %181 : vector<8x32xf32> to vector<1x1x8x32xf32>
    tpu.vector_store %arg17[%c1_88, %c1_89, %c0_90, %c0_91], %201 {strides = array<i32>} : memref<4x4x8x128xf32, #tpu.memory_space<vmem>>, vector<1x1x8x32xf32>,
    %c1_92 = arith.constant 1 : index
    %c2_93 = arith.constant 2 : index
    %c0_94 = arith.constant 0 : index
    %c0_95 = arith.constant 0 : index
    %202 = vector.load %arg17[%c1_92, %c2_93, %c0_94, %c0_95] : memref<4x4x8x128xf32, #tpu.memory_space<vmem>>, vector<1x1x8x32xf32>
    %203 = vector.shape_cast %202 : vector<1x1x8x32xf32> to vector<8x32xf32>
    %204 = vector.shape_cast %179 : vector<8x32xf32> to vector<1x1x8x32xf32>
    tpu.vector_store %arg17[%c1_92, %c2_93, %c0_94, %c0_95], %204 {strides = array<i32>} : memref<4x4x8x128xf32, #tpu.memory_space<vmem>>, vector<1x1x8x32xf32>,
    %c1_96 = arith.constant 1 : index
    %c3_97 = arith.constant 3 : index
    %c0_98 = arith.constant 0 : index
    %c0_99 = arith.constant 0 : index
    %205 = vector.load %arg17[%c1_96, %c3_97, %c0_98, %c0_99] : memref<4x4x8x128xf32, #tpu.memory_space<vmem>>, vector<1x1x8x8xf32>
    %206 = vector.shape_cast %205 : vector<1x1x8x8xf32> to vector<8x8xf32>
    %207 = vector.shape_cast %138 : vector<8x8xf32> to vector<1x1x8x8xf32>
    tpu.vector_store %arg17[%c1_96, %c3_97, %c0_98, %c0_99], %207 {strides = array<i32>} : memref<4x4x8x128xf32, #tpu.memory_space<vmem>>, vector<1x1x8x8xf32>,
    %cst_100 = arith.constant dense<0.000000e+00> : vector<8x32xf32>
    %208 = tpu.matmul %181, %15, %cst_100 {dimension_numbers = #tpu.dot_dimension_numbers<[1], [0], [0], [1], [0, 0, 1, 1], [], []>} : vector<8x32xf32>, vector<32x32xf32>, vector<8x32xf32> -> vector<8x32xf32>
    %209 = vector.shape_cast %208 : vector<8x32xf32> to vector<8x1x32xf32>
    %210 = vector.broadcast %209 : vector<8x1x32xf32> to vector<8x8x32xf32>
    %211 = arith.addf %8, %210 : vector<8x8x32xf32>
    %212 = math.tanh %211 : vector<8x8x32xf32>
    %213 = vector.shape_cast %13 : vector<1x32xf32> to vector<1x1x32xf32>
    %214 = vector.broadcast %213 : vector<1x1x32xf32> to vector<8x8x32xf32>
    %215 = arith.mulf %212, %214 : vector<8x8x32xf32>
    %cst_101 = arith.constant dense<0.000000e+00> : vector<8x8xf32>
    %216 = vector.multi_reduction <add>, %215, %cst_101 [2] : vector<8x8x32xf32> to vector<8x8xf32>
    %217 = vector.broadcast %14 : vector<1x1xf32> to vector<8x8xf32>
    %218 = arith.addf %216, %217 : vector<8x8xf32>
    %cst_102 = arith.constant -1.000000e+30 : f32
    %219 = vector.broadcast %cst_102 : f32 to vector<8x8xf32>
    %220 = arith.select %12, %219, %218 : vector<8x8xi1>, vector<8x8xf32>
    %cst_103 = arith.constant dense<0xFF800000> : vector<8xf32>
    %221 = vector.multi_reduction <maximumf>, %220, %cst_103 [1] : vector<8x8xf32> to vector<8xf32>
    %222 = vector.shape_cast %221 : vector<8xf32> to vector<8x1xf32>
    %223 = vector.broadcast %222 : vector<8x1xf32> to vector<8x8xf32>
    %224 = arith.subf %220, %223 : vector<8x8xf32>
    %225 = math.exp %224 : vector<8x8xf32>
    %cst_104 = arith.constant dense<0.000000e+00> : vector<8xf32>
    %226 = vector.multi_reduction <add>, %225, %cst_104 [1] : vector<8x8xf32> to vector<8xf32>
    %227 = vector.shape_cast %226 : vector<8xf32> to vector<8x1xf32>
    %228 = vector.broadcast %227 : vector<8x1xf32> to vector<8x8xf32>
    %229 = arith.divf %225, %228 : vector<8x8xf32>
    %230 = vector.shape_cast %229 : vector<8x8xf32> to vector<8x8x1xf32>
    %231 = vector.broadcast %230 : vector<8x8x1xf32> to vector<8x8x64xf32>
    %232 = arith.mulf %231, %0 : vector<8x8x64xf32>
    %cst_105 = arith.constant dense<0.000000e+00> : vector<8x64xf32>
    %233 = vector.multi_reduction <add>, %232, %cst_105 [1] : vector<8x8x64xf32> to vector<8x64xf32>
    %c2_106 = arith.constant 2 : index
    %c0_107 = arith.constant 0 : index
    %c0_108 = arith.constant 0 : index
    %234 = vector.load %arg1[%c2_106, %c0_107, %c0_108] : memref<4x8x1xi32, #tpu.memory_space<vmem>>, vector<1x8x1xi32>
    %235 = vector.shape_cast %234 : vector<1x8x1xi32> to vector<8x1xi32>
    %236 = tpu.iota {dimensions = array<i32: 1>} : vector<8x16xi32>
    %237 = vector.broadcast %235 : vector<8x1xi32> to vector<8x16xi32>
    %238 = arith.cmpi eq, %237, %236 : vector<8x16xi32>
    %239 = arith.extui %238 : vector<8x16xi1> to vector<8x16xi32>
    %240 = arith.sitofp %239 : vector<8x16xi32> to vector<8x16xf32>
    %cst_109 = arith.constant dense<0.000000e+00> : vector<8x128xf32>
    %241 = tpu.matmul %240, %16, %cst_109 {dimension_numbers = #tpu.dot_dimension_numbers<[1], [0], [0], [1], [0, 0, 1, 1], [], []>} : vector<8x16xf32>, vector<16x128xf32>, vector<8x128xf32> -> vector<8x128xf32>
    %cst_110 = arith.constant dense<0.000000e+00> : vector<8x128xf32>
    %242 = tpu.matmul %233, %17, %cst_110 {dimension_numbers = #tpu.dot_dimension_numbers<[1], [0], [0], [1], [0, 0, 1, 1], [], []>} : vector<8x64xf32>, vector<64x128xf32>, vector<8x128xf32> -> vector<8x128xf32>
    %243 = arith.addf %241, %242 : vector<8x128xf32>
    %cst_111 = arith.constant dense<0.000000e+00> : vector<8x128xf32>
    %244 = tpu.matmul %181, %18, %cst_111 {dimension_numbers = #tpu.dot_dimension_numbers<[1], [0], [0], [1], [0, 0, 1, 1], [], []>} : vector<8x32xf32>, vector<32x128xf32>, vector<8x128xf32> -> vector<8x128xf32>
    %245 = arith.addf %243, %244 : vector<8x128xf32>
    %246 = vector.broadcast %19 : vector<1x128xf32> to vector<8x128xf32>
    %247 = arith.addf %245, %246 : vector<8x128xf32>
    %248 = vector.extract_strided_slice %247 {offsets = [0, 0], sizes = [8, 32], strides = [1, 1]} : vector<8x128xf32> to vector<8x32xf32>
    %249 = arith.negf %248 : vector<8x32xf32>
    %250 = math.exp %249 : vector<8x32xf32>
    %cst_112 = arith.constant 1.000000e+00 : f32
    %251 = vector.broadcast %cst_112 : f32 to vector<8x32xf32>
    %252 = arith.addf %251, %250 : vector<8x32xf32>
    %253 = arith.divf %251, %252 : vector<8x32xf32>
    %254 = vector.extract_strided_slice %247 {offsets = [0, 32], sizes = [8, 32], strides = [1, 1]} : vector<8x128xf32> to vector<8x32xf32>
    %255 = arith.negf %254 : vector<8x32xf32>
    %256 = math.exp %255 : vector<8x32xf32>
    %cst_113 = arith.constant 1.000000e+00 : f32
    %257 = vector.broadcast %cst_113 : f32 to vector<8x32xf32>
    %258 = arith.addf %257, %256 : vector<8x32xf32>
    %259 = arith.divf %257, %258 : vector<8x32xf32>
    %260 = vector.extract_strided_slice %247 {offsets = [0, 64], sizes = [8, 32], strides = [1, 1]} : vector<8x128xf32> to vector<8x32xf32>
    %261 = math.tanh %260 : vector<8x32xf32>
    %262 = vector.extract_strided_slice %247 {offsets = [0, 96], sizes = [8, 32], strides = [1, 1]} : vector<8x128xf32> to vector<8x32xf32>
    %263 = arith.negf %262 : vector<8x32xf32>
    %264 = math.exp %263 : vector<8x32xf32>
    %cst_114 = arith.constant 1.000000e+00 : f32
    %265 = vector.broadcast %cst_114 : f32 to vector<8x32xf32>
    %266 = arith.addf %265, %264 : vector<8x32xf32>
    %267 = arith.divf %265, %266 : vector<8x32xf32>
    %268 = arith.mulf %259, %179 : vector<8x32xf32>
    %269 = arith.mulf %253, %261 : vector<8x32xf32>
    %270 = arith.addf %268, %269 : vector<8x32xf32>
    %271 = math.tanh %270 : vector<8x32xf32>
    %272 = arith.mulf %267, %271 : vector<8x32xf32>
    %cst_115 = arith.constant dense<0.000000e+00> : vector<8x16xf32>
    %273 = tpu.matmul %272, %20, %cst_115 {dimension_numbers = #tpu.dot_dimension_numbers<[1], [0], [0], [1], [0, 0, 1, 1], [], []>} : vector<8x32xf32>, vector<32x16xf32>, vector<8x16xf32> -> vector<8x16xf32>
    %274 = vector.broadcast %21 : vector<1x16xf32> to vector<8x16xf32>
    %275 = arith.addf %273, %274 : vector<8x16xf32>
    %cst_116 = arith.constant dense<0xFF800000> : vector<8xf32>
    %276 = vector.multi_reduction <maximumf>, %275, %cst_116 [1] : vector<8x16xf32> to vector<8xf32>
    %277 = vector.shape_cast %276 : vector<8xf32> to vector<8x1xf32>
    %278 = vector.broadcast %277 : vector<8x1xf32> to vector<8x16xf32>
    %279 = arith.subf %275, %278 : vector<8x16xf32>
    %280 = math.exp %279 : vector<8x16xf32>
    %cst_117 = arith.constant dense<0.000000e+00> : vector<8xf32>
    %281 = vector.multi_reduction <add>, %280, %cst_117 [1] : vector<8x16xf32> to vector<8xf32>
    %282 = vector.shape_cast %281 : vector<8xf32> to vector<8x1xf32>
    %283 = math.log %282 : vector<8x1xf32>
    %284 = arith.addf %283, %277 : vector<8x1xf32>
    %285 = vector.broadcast %284 : vector<8x1xf32> to vector<8x16xf32>
    %286 = arith.subf %275, %285 : vector<8x16xf32>
    %c2_118 = arith.constant 2 : index
    %c0_119 = arith.constant 0 : index
    %c0_120 = arith.constant 0 : index
    %c0_121 = arith.constant 0 : index
    %287 = vector.load %arg17[%c2_118, %c0_119, %c0_120, %c0_121] : memref<4x4x8x128xf32, #tpu.memory_space<vmem>>, vector<1x1x8x16xf32>
    %288 = vector.shape_cast %287 : vector<1x1x8x16xf32> to vector<8x16xf32>
    %289 = vector.shape_cast %286 : vector<8x16xf32> to vector<1x1x8x16xf32>
    tpu.vector_store %arg17[%c2_118, %c0_119, %c0_120, %c0_121], %289 {strides = array<i32>} : memref<4x4x8x128xf32, #tpu.memory_space<vmem>>, vector<1x1x8x16xf32>,
    %c2_122 = arith.constant 2 : index
    %c1_123 = arith.constant 1 : index
    %c0_124 = arith.constant 0 : index
    %c0_125 = arith.constant 0 : index
    %290 = vector.load %arg17[%c2_122, %c1_123, %c0_124, %c0_125] : memref<4x4x8x128xf32, #tpu.memory_space<vmem>>, vector<1x1x8x32xf32>
    %291 = vector.shape_cast %290 : vector<1x1x8x32xf32> to vector<8x32xf32>
    %292 = vector.shape_cast %272 : vector<8x32xf32> to vector<1x1x8x32xf32>
    tpu.vector_store %arg17[%c2_122, %c1_123, %c0_124, %c0_125], %292 {strides = array<i32>} : memref<4x4x8x128xf32, #tpu.memory_space<vmem>>, vector<1x1x8x32xf32>,
    %c2_126 = arith.constant 2 : index
    %c2_127 = arith.constant 2 : index
    %c0_128 = arith.constant 0 : index
    %c0_129 = arith.constant 0 : index
    %293 = vector.load %arg17[%c2_126, %c2_127, %c0_128, %c0_129] : memref<4x4x8x128xf32, #tpu.memory_space<vmem>>, vector<1x1x8x32xf32>
    %294 = vector.shape_cast %293 : vector<1x1x8x32xf32> to vector<8x32xf32>
    %295 = vector.shape_cast %270 : vector<8x32xf32> to vector<1x1x8x32xf32>
    tpu.vector_store %arg17[%c2_126, %c2_127, %c0_128, %c0_129], %295 {strides = array<i32>} : memref<4x4x8x128xf32, #tpu.memory_space<vmem>>, vector<1x1x8x32xf32>,
    %c2_130 = arith.constant 2 : index
    %c3_131 = arith.constant 3 : index
    %c0_132 = arith.constant 0 : index
    %c0_133 = arith.constant 0 : index
    %296 = vector.load %arg17[%c2_130, %c3_131, %c0_132, %c0_133] : memref<4x4x8x128xf32, #tpu.memory_space<vmem>>, vector<1x1x8x8xf32>
    %297 = vector.shape_cast %296 : vector<1x1x8x8xf32> to vector<8x8xf32>
    %298 = vector.shape_cast %229 : vector<8x8xf32> to vector<1x1x8x8xf32>
    tpu.vector_store %arg17[%c2_130, %c3_131, %c0_132, %c0_133], %298 {strides = array<i32>} : memref<4x4x8x128xf32, #tpu.memory_space<vmem>>, vector<1x1x8x8xf32>,
    %cst_134 = arith.constant dense<0.000000e+00> : vector<8x32xf32>
    %299 = tpu.matmul %272, %15, %cst_134 {dimension_numbers = #tpu.dot_dimension_numbers<[1], [0], [0], [1], [0, 0, 1, 1], [], []>} : vector<8x32xf32>, vector<32x32xf32>, vector<8x32xf32> -> vector<8x32xf32>
    %300 = vector.shape_cast %299 : vector<8x32xf32> to vector<8x1x32xf32>
    %301 = vector.broadcast %300 : vector<8x1x32xf32> to vector<8x8x32xf32>
    %302 = arith.addf %8, %301 : vector<8x8x32xf32>
    %303 = math.tanh %302 : vector<8x8x32xf32>
    %304 = vector.shape_cast %13 : vector<1x32xf32> to vector<1x1x32xf32>
    %305 = vector.broadcast %304 : vector<1x1x32xf32> to vector<8x8x32xf32>
    %306 = arith.mulf %303, %305 : vector<8x8x32xf32>
    %cst_135 = arith.constant dense<0.000000e+00> : vector<8x8xf32>
    %307 = vector.multi_reduction <add>, %306, %cst_135 [2] : vector<8x8x32xf32> to vector<8x8xf32>
    %308 = vector.broadcast %14 : vector<1x1xf32> to vector<8x8xf32>
    %309 = arith.addf %307, %308 : vector<8x8xf32>
    %cst_136 = arith.constant -1.000000e+30 : f32
    %310 = vector.broadcast %cst_136 : f32 to vector<8x8xf32>
    %311 = arith.select %12, %310, %309 : vector<8x8xi1>, vector<8x8xf32>
    %cst_137 = arith.constant dense<0xFF800000> : vector<8xf32>
    %312 = vector.multi_reduction <maximumf>, %311, %cst_137 [1] : vector<8x8xf32> to vector<8xf32>
    %313 = vector.shape_cast %312 : vector<8xf32> to vector<8x1xf32>
    %314 = vector.broadcast %313 : vector<8x1xf32> to vector<8x8xf32>
    %315 = arith.subf %311, %314 : vector<8x8xf32>
    %316 = math.exp %315 : vector<8x8xf32>
    %cst_138 = arith.constant dense<0.000000e+00> : vector<8xf32>
    %317 = vector.multi_reduction <add>, %316, %cst_138 [1] : vector<8x8xf32> to vector<8xf32>
    %318 = vector.shape_cast %317 : vector<8xf32> to vector<8x1xf32>
    %319 = vector.broadcast %318 : vector<8x1xf32> to vector<8x8xf32>
    %320 = arith.divf %316, %319 : vector<8x8xf32>
    %321 = vector.shape_cast %320 : vector<8x8xf32> to vector<8x8x1xf32>
    %322 = vector.broadcast %321 : vector<8x8x1xf32> to vector<8x8x64xf32>
    %323 = arith.mulf %322, %0 : vector<8x8x64xf32>
    %cst_139 = arith.constant dense<0.000000e+00> : vector<8x64xf32>
    %324 = vector.multi_reduction <add>, %323, %cst_139 [1] : vector<8x8x64xf32> to vector<8x64xf32>
    %c3_140 = arith.constant 3 : index
    %c0_141 = arith.constant 0 : index
    %c0_142 = arith.constant 0 : index
    %325 = vector.load %arg1[%c3_140, %c0_141, %c0_142] : memref<4x8x1xi32, #tpu.memory_space<vmem>>, vector<1x8x1xi32>
    %326 = vector.shape_cast %325 : vector<1x8x1xi32> to vector<8x1xi32>
    %327 = tpu.iota {dimensions = array<i32: 1>} : vector<8x16xi32>
    %328 = vector.broadcast %326 : vector<8x1xi32> to vector<8x16xi32>
    %329 = arith.cmpi eq, %328, %327 : vector<8x16xi32>
    %330 = arith.extui %329 : vector<8x16xi1> to vector<8x16xi32>
    %331 = arith.sitofp %330 : vector<8x16xi32> to vector<8x16xf32>
    %cst_143 = arith.constant dense<0.000000e+00> : vector<8x128xf32>
    %332 = tpu.matmul %331, %16, %cst_143 {dimension_numbers = #tpu.dot_dimension_numbers<[1], [0], [0], [1], [0, 0, 1, 1], [], []>} : vector<8x16xf32>, vector<16x128xf32>, vector<8x128xf32> -> vector<8x128xf32>
    %cst_144 = arith.constant dense<0.000000e+00> : vector<8x128xf32>
    %333 = tpu.matmul %324, %17, %cst_144 {dimension_numbers = #tpu.dot_dimension_numbers<[1], [0], [0], [1], [0, 0, 1, 1], [], []>} : vector<8x64xf32>, vector<64x128xf32>, vector<8x128xf32> -> vector<8x128xf32>
    %334 = arith.addf %332, %333 : vector<8x128xf32>
    %cst_145 = arith.constant dense<0.000000e+00> : vector<8x128xf32>
    %335 = tpu.matmul %272, %18, %cst_145 {dimension_numbers = #tpu.dot_dimension_numbers<[1], [0], [0], [1], [0, 0, 1, 1], [], []>} : vector<8x32xf32>, vector<32x128xf32>, vector<8x128xf32> -> vector<8x128xf32>
    %336 = arith.addf %334, %335 : vector<8x128xf32>
    %337 = vector.broadcast %19 : vector<1x128xf32> to vector<8x128xf32>
    %338 = arith.addf %336, %337 : vector<8x128xf32>
    %339 = vector.extract_strided_slice %338 {offsets = [0, 0], sizes = [8, 32], strides = [1, 1]} : vector<8x128xf32> to vector<8x32xf32>
    %340 = arith.negf %339 : vector<8x32xf32>
    %341 = math.exp %340 : vector<8x32xf32>
    %cst_146 = arith.constant 1.000000e+00 : f32
    %342 = vector.broadcast %cst_146 : f32 to vector<8x32xf32>
    %343 = arith.addf %342, %341 : vector<8x32xf32>
    %344 = arith.divf %342, %343 : vector<8x32xf32>
    %345 = vector.extract_strided_slice %338 {offsets = [0, 32], sizes = [8, 32], strides = [1, 1]} : vector<8x128xf32> to vector<8x32xf32>
    %346 = arith.negf %345 : vector<8x32xf32>
    %347 = math.exp %346 : vector<8x32xf32>
    %cst_147 = arith.constant 1.000000e+00 : f32
    %348 = vector.broadcast %cst_147 : f32 to vector<8x32xf32>
    %349 = arith.addf %348, %347 : vector<8x32xf32>
    %350 = arith.divf %348, %349 : vector<8x32xf32>
    %351 = vector.extract_strided_slice %338 {offsets = [0, 64], sizes = [8, 32], strides = [1, 1]} : vector<8x128xf32> to vector<8x32xf32>
    %352 = math.tanh %351 : vector<8x32xf32>
    %353 = vector.extract_strided_slice %338 {offsets = [0, 96], sizes = [8, 32], strides = [1, 1]} : vector<8x128xf32> to vector<8x32xf32>
    %354 = arith.negf %353 : vector<8x32xf32>
    %355 = math.exp %354 : vector<8x32xf32>
    %cst_148 = arith.constant 1.000000e+00 : f32
    %356 = vector.broadcast %cst_148 : f32 to vector<8x32xf32>
    %357 = arith.addf %356, %355 : vector<8x32xf32>
    %358 = arith.divf %356, %357 : vector<8x32xf32>
    %359 = arith.mulf %350, %270 : vector<8x32xf32>
    %360 = arith.mulf %344, %352 : vector<8x32xf32>
    %361 = arith.addf %359, %360 : vector<8x32xf32>
    %362 = math.tanh %361 : vector<8x32xf32>
    %363 = arith.mulf %358, %362 : vector<8x32xf32>
    %cst_149 = arith.constant dense<0.000000e+00> : vector<8x16xf32>
    %364 = tpu.matmul %363, %20, %cst_149 {dimension_numbers = #tpu.dot_dimension_numbers<[1], [0], [0], [1], [0, 0, 1, 1], [], []>} : vector<8x32xf32>, vector<32x16xf32>, vector<8x16xf32> -> vector<8x16xf32>
    %365 = vector.broadcast %21 : vector<1x16xf32> to vector<8x16xf32>
    %366 = arith.addf %364, %365 : vector<8x16xf32>
    %cst_150 = arith.constant dense<0xFF800000> : vector<8xf32>
    %367 = vector.multi_reduction <maximumf>, %366, %cst_150 [1] : vector<8x16xf32> to vector<8xf32>
    %368 = vector.shape_cast %367 : vector<8xf32> to vector<8x1xf32>
    %369 = vector.broadcast %368 : vector<8x1xf32> to vector<8x16xf32>
    %370 = arith.subf %366, %369 : vector<8x16xf32>
    %371 = math.exp %370 : vector<8x16xf32>
    %cst_151 = arith.constant dense<0.000000e+00> : vector<8xf32>
    %372 = vector.multi_reduction <add>, %371, %cst_151 [1] : vector<8x16xf32> to vector<8xf32>
    %373 = vector.shape_cast %372 : vector<8xf32> to vector<8x1xf32>
    %374 = math.log %373 : vector<8x1xf32>
    %375 = arith.addf %374, %368 : vector<8x1xf32>
    %376 = vector.broadcast %375 : vector<8x1xf32> to vector<8x16xf32>
    %377 = arith.subf %366, %376 : vector<8x16xf32>
    %c3_152 = arith.constant 3 : index
    %c0_153 = arith.constant 0 : index
    %c0_154 = arith.constant 0 : index
    %c0_155 = arith.constant 0 : index
    %378 = vector.load %arg17[%c3_152, %c0_153, %c0_154, %c0_155] : memref<4x4x8x128xf32, #tpu.memory_space<vmem>>, vector<1x1x8x16xf32>
    %379 = vector.shape_cast %378 : vector<1x1x8x16xf32> to vector<8x16xf32>
    %380 = vector.shape_cast %377 : vector<8x16xf32> to vector<1x1x8x16xf32>
    tpu.vector_store %arg17[%c3_152, %c0_153, %c0_154, %c0_155], %380 {strides = array<i32>} : memref<4x4x8x128xf32, #tpu.memory_space<vmem>>, vector<1x1x8x16xf32>,
    %c3_156 = arith.constant 3 : index
    %c1_157 = arith.constant 1 : index
    %c0_158 = arith.constant 0 : index
    %c0_159 = arith.constant 0 : index
    %381 = vector.load %arg17[%c3_156, %c1_157, %c0_158, %c0_159] : memref<4x4x8x128xf32, #tpu.memory_space<vmem>>, vector<1x1x8x32xf32>
    %382 = vector.shape_cast %381 : vector<1x1x8x32xf32> to vector<8x32xf32>
    %383 = vector.shape_cast %363 : vector<8x32xf32> to vector<1x1x8x32xf32>
    tpu.vector_store %arg17[%c3_156, %c1_157, %c0_158, %c0_159], %383 {strides = array<i32>} : memref<4x4x8x128xf32, #tpu.memory_space<vmem>>, vector<1x1x8x32xf32>,
    %c3_160 = arith.constant 3 : index
    %c2_161 = arith.constant 2 : index
    %c0_162 = arith.constant 0 : index
    %c0_163 = arith.constant 0 : index
    %384 = vector.load %arg17[%c3_160, %c2_161, %c0_162, %c0_163] : memref<4x4x8x128xf32, #tpu.memory_space<vmem>>, vector<1x1x8x32xf32>
    %385 = vector.shape_cast %384 : vector<1x1x8x32xf32> to vector<8x32xf32>
    %386 = vector.shape_cast %361 : vector<8x32xf32> to vector<1x1x8x32xf32>
    tpu.vector_store %arg17[%c3_160, %c2_161, %c0_162, %c0_163], %386 {strides = array<i32>} : memref<4x4x8x128xf32, #tpu.memory_space<vmem>>, vector<1x1x8x32xf32>,
    %c3_164 = arith.constant 3 : index
    %c3_165 = arith.constant 3 : index
    %c0_166 = arith.constant 0 : index
    %c0_167 = arith.constant 0 : index
    %387 = vector.load %arg17[%c3_164, %c3_165, %c0_166, %c0_167] : memref<4x4x8x128xf32, #tpu.memory_space<vmem>>, vector<1x1x8x8xf32>
    %388 = vector.shape_cast %387 : vector<1x1x8x8xf32> to vector<8x8xf32>
    %389 = vector.shape_cast %320 : vector<8x8xf32> to vector<1x1x8x8xf32>
    tpu.vector_store %arg17[%c3_164, %c3_165, %c0_166, %c0_167], %389 {strides = array<i32>} : memref<4x4x8x128xf32, #tpu.memory_space<vmem>>, vector<1x1x8x8xf32>,
    return
  }
  func.func @transform_0(%arg0: i32) -> (i32, i32, i32) {
    %c0_i32 = arith.constant 0 : i32
    %c0_i32_0 = arith.constant 0 : i32
    %c0_i32_1 = arith.constant 0 : i32
    %c0_i32_2 = arith.constant 0 : i32
    return %c0_i32, %c0_i32_0, %c0_i32_1 : i32, i32, i32
  }
  func.func @transform_1(%arg0: i32) -> (i32, i32) {
    %c0_i32 = arith.constant 0 : i32
    %c0_i32_0 = arith.constant 0 : i32
    %c0_i32_1 = arith.constant 0 : i32
    return %c0_i32, %c0_i32_0 : i32, i32
  }
  func.func @transform_2(%arg0: i32) -> (i32, i32, i32) {
    %c0_i32 = arith.constant 0 : i32
    %c0_i32_0 = arith.constant 0 : i32
    %c0_i32_1 = arith.constant 0 : i32
    %c0_i32_2 = arith.constant 0 : i32
    return %c0_i32, %c0_i32_0, %c0_i32_1 : i32, i32, i32
  }
  func.func @transform_3(%arg0: i32) -> (i32, i32) {
    %c0_i32 = arith.constant 0 : i32
    %c0_i32_0 = arith.constant 0 : i32
    %c0_i32_1 = arith.constant 0 : i32
    return %c0_i32, %c0_i32_0 : i32, i32
  }
  func.func @transform_4(%arg0: i32) -> (i32, i32) {
    %c0_i32 = arith.constant 0 : i32
    %c0_i32_0 = arith.constant 0 : i32
    %c0_i32_1 = arith.constant 0 : i32
    return %c0_i32, %c0_i32_0 : i32, i32
  }
  func.func @transform_5(%arg0: i32) -> (i32, i32) {
    %c0_i32 = arith.constant 0 : i32
    %c0_i32_0 = arith.constant 0 : i32
    %c0_i32_1 = arith.constant 0 : i32
    return %c0_i32, %c0_i32_0 : i32, i32
  }
  func.func @transform_6(%arg0: i32) -> (i32, i32) {
    %c0_i32 = arith.constant 0 : i32
    %c0_i32_0 = arith.constant 0 : i32
    %c0_i32_1 = arith.constant 0 : i32
    return %c0_i32, %c0_i32_0 : i32, i32
  }
  func.func @transform_7(%arg0: i32) -> (i32, i32) {
    %c0_i32 = arith.constant 0 : i32
    %c0_i32_0 = arith.constant 0 : i32
    %c0_i32_1 = arith.constant 0 : i32
    return %c0_i32, %c0_i32_0 : i32, i32
  }
  func.func @transform_8(%arg0: i32) -> (i32, i32) {
    %c0_i32 = arith.constant 0 : i32
    %c0_i32_0 = arith.constant 0 : i32
    %c0_i32_1 = arith.constant 0 : i32
    return %c0_i32, %c0_i32_0 : i32, i32
  }
  func.func @transform_9(%arg0: i32) -> (i32, i32) {
    %c0_i32 = arith.constant 0 : i32
    %c0_i32_0 = arith.constant 0 : i32
    %c0_i32_1 = arith.constant 0 : i32
    return %c0_i32, %c0_i32_0 : i32, i32
  }
  func.func @transform_10(%arg0: i32) -> (i32, i32) {
    %c0_i32 = arith.constant 0 : i32
    %c0_i32_0 = arith.constant 0 : i32
    %c0_i32_1 = arith.constant 0 : i32
    return %c0_i32, %c0_i32_0 : i32, i32
  }
  func.func @transform_11(%arg0: i32) -> (i32, i32) {
    %c0_i32 = arith.constant 0 : i32
    %c0_i32_0 = arith.constant 0 : i32
    %c0_i32_1 = arith.constant 0 : i32
    return %c0_i32, %c0_i32_0 : i32, i32
  }
  func.func @transform_12(%arg0: i32) -> (i32, i32) {
    %c0_i32 = arith.constant 0 : i32
    %c0_i32_0 = arith.constant 0 : i32
    %c0_i32_1 = arith.constant 0 : i32
    return %c0_i32, %c0_i32_0 : i32, i32
  }
  func.func @transform_13(%arg0: i32) -> (i32, i32) {
    %c0_i32 = arith.constant 0 : i32
    %c0_i32_0 = arith.constant 0 : i32
    %c0_i32_1 = arith.constant 0 : i32
    return %c0_i32, %c0_i32_0 : i32, i32
  }
  func.func @transform_14(%arg0: i32) -> (i32, i32) {
    %c0_i32 = arith.constant 0 : i32
    %c0_i32_0 = arith.constant 0 : i32
    %c0_i32_1 = arith.constant 0 : i32
    return %c0_i32, %c0_i32_0 : i32, i32
  }
  func.func @transform_15(%arg0: i32) -> (i32, i32) {
    %c0_i32 = arith.constant 0 : i32
    %c0_i32_0 = arith.constant 0 : i32
    %c0_i32_1 = arith.constant 0 : i32
    return %c0_i32, %c0_i32_0 : i32, i32
  }
  func.func @transform_16(%arg0: i32) -> (i32, i32, i32, i32) {
    %c0_i32 = arith.constant 0 : i32
    %c0_i32_0 = arith.constant 0 : i32
    %c0_i32_1 = arith.constant 0 : i32
    %c0_i32_2 = arith.constant 0 : i32
    %c0_i32_3 = arith.constant 0 : i32
    return %c0_i32, %c0_i32_0, %c0_i32_1, %c0_i32_2 : i32, i32, i32, i32
  }
}

</mosaic_0001>

<bundles_post_ra>
// kernel: tpu_custom_call.1
= control target key start
LH: loop header
LB: loop body
LE: loop exit
PB: predicated region body
PF: predicated region fallthrough
CT: control target
= control target key end

     0   :  { %s5473_s0 = inlined_call_operand.vmem [shape: s32[4,8,1], index: 0, kind: input, shape index: {}]   ;;  %s5474_s1 = inlined_call_operand.vmem [shape: s32[8,1], index: 1, kind: input, shape index: {}]   ;;  %s5475_s2 = inlined_call_operand.vmem [shape: f32[8,8,64], index: 2, kind: input, shape index: {}]   ;;  %s5476_s3 = inlined_call_operand.hbm [shape: f32[8,32], index: 3, kind: input, shape index: {}]   ;;  %s5477_s4 = inlined_call_operand.hbm [shape: f32[8,32], index: 4, kind: input, shape index: {}]   ;;  %s5478_s5 = inlined_call_operand.hbm [shape: f32[16,128], index: 5, kind: input, shape index: {}]   ;;  %s5479_s6 = inlined_call_operand.vmem [shape: f32[64,128], index: 6, kind: input, shape index: {}]   ;;  %s5480_s7 = inlined_call_operand.vmem [shape: f32[32,128], index: 7, kind: input, shape index: {}]   ;;  %s5481_s8 = inlined_call_operand.vmem [shape: f32[1,128], index: 8, kind: input, shape index: {}]   ;;  %s5482_s9 = inlined_call_operand.vmem [shape: f32[64,32], index: 9, kind: input, shape index: {}]   ;;  %s5483_s10 = inlined_call_operand.vmem [shape: f32[32,32], index: 10, kind: input, shape index: {}]   ;;  %s5484_s11 = inlined_call_operand.hbm [shape: f32[1,32], index: 11, kind: input, shape index: {}]   ;;  %s5485_s12 = inlined_call_operand.hbm [shape: f32[1,32], index: 12, kind: input, shape index: {}]   ;;  %s5486_s13 = inlined_call_operand.<no memory space> [shape: f32[1,1], index: 13, kind: input, shape index: {}]   ;;  %s5487_s14 = inlined_call_operand.vmem [shape: f32[32,16], index: 14, kind: input, shape index: {}]   ;;  %s5488_s15 = inlined_call_operand.vmem [shape: f32[1,16], index: 15, kind: input, shape index: {}]   ;;  %s5489_s16 = inlined_call_operand.hbm [shape: f32[4,4,8,128], index: 16, kind: output, shape index: {}]  }
   0x1   :  { %5510 = sst [smem:[#allocation32_spill]] %s5473_s0  ;;  %v21_v0 = vstv %s5486_s13 }
   0x2   :  { %22 = vst [vmem:[#allocation2] sm:$0x1] %v21_v0 }
   0x3   :  { %23 = vsyncpa [#allocation4], 0 }
   0x4   :  { %24 = vsyncpa [#allocation7], 0 }
   0x5   :  { %25 = vsyncpa [#allocation10], 0 }
   0x6   :  { %26 = vsyncpa [#allocation5], 0  ;;  %s4319_s23 = smov [#allocation6]   ;;  %s4320_s25 = smov [#allocation9]  }
   0x7   :  { %s49_s24 = sshll.u32 %s4319_s23, 4  ;;  %s81_s26 = sshll.u32 %s4320_s25, 4  ;;  %s50_s24 = int_to_ptr.vmem [resolvable:$true] %s49_s24  ;;  %s82_s26 = int_to_ptr.vmem [resolvable:$true] %s81_s26 }
   0x8   :  { %s4179_s29 = scalar_lea.hbm %s5477_s4, 128 }
   0x9   :  { %p4180_p0 = scmp.ne.s32.totalorder %s5477_s4, %s4179_s29  ;;  %p4183_p1 = scmp.lt.u32.totalorder %s4179_s29, %s5477_s4 }
   0xb   :  { %p4185_p2 = pnand %p4183_p1, %p4180_p0 }
   0xd   :  { %4188 = shalt.err (!%p4185_p2)
}
   0xe   :  { %s4189_s18 = scalar_lea.vmem %s50_s24, 128  ;;  %p4194_p4 = scmp.lt.s32.totalorder %s50_s24, %s50_s24 }
   0xf   :  { %p4190_p3 = scmp.ne.s32.totalorder %s50_s24, %s4189_s18  ;;  %p4195_p5 = scmp.lt.s32.totalorder %s4189_s18, %s4189_s18 }
  0x11   :  { %p4196_p6 = por %p4195_p5, %p4194_p4 }
  0x13   :  { %p4197_p7 = pnand %p4196_p6, %p4190_p3 }
  0x15   :  { %4200 = shalt.err (!%p4197_p7)
}
  0x16   :  { %52 = dma.hbm_to_vmem [thread:$0]  %s5477_s4, 128, %s50_s24, [#allocation7]  }
  0x17   :  { %s4201_s23 = scalar_lea.hbm %s5484_s11, 16 }
  0x18   :  { %p4202_p8 = scmp.ne.s32.totalorder %s5484_s11, %s4201_s23  ;;  %p4205_p9 = scmp.lt.u32.totalorder %s4201_s23, %s5484_s11 }
  0x1a   :  { %p4207_p10 = pnand %p4205_p9, %p4202_p8 }
  0x1c   :  { %4210 = shalt.err (!%p4207_p10)
}
  0x1d   :  { %s4211_s30 = scalar_lea.vmem %s82_s26, 16  ;;  %s4215_s0 = scalar_lea.vmem %s82_s26, 32 }
  0x1e   :  { %p4212_p11 = scmp.ne.s32.totalorder %s82_s26, %s4211_s30  ;;  %p4216_p12 = scmp.lt.s32.totalorder %s82_s26, %s82_s26 }
  0x1f   :  { %p4217_p13 = scmp.lt.s32.totalorder %s4215_s0, %s4211_s30 }
  0x21   :  { %p4218_p0 = por %p4217_p13, %p4216_p12 }
  0x23   :  { %p4219_p1 = pnand %p4218_p0, %p4212_p11 }
  0x25   :  { %4222 = shalt.err (!%p4219_p1)
}
  0x26   :  { %84 = dma.hbm_to_vmem [thread:$0]  %s5484_s11, 16, %s82_s26, [#allocation10]  }
  0x27   :  { %s4321_s13 = smov [#allocation3]   ;;  %s4322_s18 = smov [#allocation8]  }
  0x28   :  { %s39_s17 = sshll.u32 %s4321_s13, 4  ;;  %s58_s19 = sshll.u32 %s4322_s18, 4  ;;  %s40_s17 = int_to_ptr.vmem [resolvable:$true] %s39_s17  ;;  %s4447_s19 = int_to_ptr.vmem [resolvable:$true] %s58_s19 }
  0x29   :  { %s4223_s22 = scalar_lea.hbm %s5476_s3, 128 }
  0x2a   :  { %p4224_p2 = scmp.ne.s32.totalorder %s5476_s3, %s4223_s22  ;;  %p4227_p3 = scmp.lt.u32.totalorder %s4223_s22, %s5476_s3 }
  0x2c   :  { %p4229_p4 = pnand %p4227_p3, %p4224_p2 }
  0x2e   :  { %4232 = shalt.err (!%p4229_p4)
}
  0x2f   :  { %s4233_s11 = scalar_lea.vmem %s40_s17, 128  ;;  %p4238_p6 = scmp.lt.s32.totalorder %s40_s17, %s40_s17 }
  0x30   :  { %p4234_p5 = scmp.ne.s32.totalorder %s40_s17, %s4233_s11  ;;  %p4239_p7 = scmp.lt.s32.totalorder %s4233_s11, %s4233_s11 }
  0x32   :  { %p4240_p8 = por %p4239_p7, %p4238_p6 }
  0x34   :  { %p4241_p9 = pnand %p4240_p8, %p4234_p5 }
  0x36   :  { %4244 = shalt.err (!%p4241_p9)
}
  0x37   :  { %42 = dma.hbm_to_vmem [thread:$0]  %s5476_s3, 128, %s40_s17, [#allocation4]  }
  0x38   :  { %s4245_s4 = scalar_lea.hbm %s5478_s5, 256 }
  0x39   :  { %p4246_p10 = scmp.ne.s32.totalorder %s5478_s5, %s4245_s4  ;;  %p4249_p11 = scmp.lt.u32.totalorder %s4245_s4, %s5478_s5 }
  0x3b   :  { %p4251_p12 = pnand %p4249_p11, %p4246_p10 }
  0x3d   :  { %4254 = shalt.err (!%p4251_p12)
}
  0x3e   :  { %s4255_s21 = scalar_lea.vmem %s4447_s19, 256  ;;  %p4260_p0 = scmp.lt.s32.totalorder %s4447_s19, %s4447_s19 }
  0x3f   :  { %p4256_p13 = scmp.ne.s32.totalorder %s4447_s19, %s4255_s21  ;;  %p4261_p1 = scmp.lt.s32.totalorder %s4255_s21, %s4255_s21 }
  0x41   :  { %p4262_p2 = por %p4261_p1, %p4260_p0 }
  0x43   :  { %p4263_p3 = pnand %p4262_p2, %p4256_p13 }
  0x45   :  { %4266 = shalt.err (!%p4263_p3)
}
  0x46   :  { %s4323_s3 = smov 128   ;;  %s4324_s17 = smov 8  }
  0x47   :  { %64 = dma.hbm_to_vmem [thread:$0]  %s5478_s5, 256, %s4447_s19, [#allocation7], %s4323_s3, %s4323_s3, %s4324_s17  }
  0x48   :  { %s4325_s25 = smov [#allocation11]   ;;  %s4267_s26 = scalar_lea.hbm %s5485_s12, 16 }
  0x49   :  { %s91_s27 = sshll.u32 %s4325_s25, 4  ;;  %p4268_p4 = scmp.ne.s32.totalorder %s5485_s12, %s4267_s26  ;;  %s92_s27 = int_to_ptr.vmem [resolvable:$true] %s91_s27 }
  0x4a   :  { %p4271_p5 = scmp.lt.u32.totalorder %s4267_s26, %s5485_s12 }
  0x4c   :  { %p4273_p6 = pnand %p4271_p5, %p4268_p4 }
  0x4e   :  { %4276 = shalt.err (!%p4273_p6)
}
  0x4f   :  { %s4277_s24 = scalar_lea.vmem %s92_s27, 16  ;;  %s4281_s5 = scalar_lea.vmem %s92_s27, 32 }
  0x50   :  { %p4278_p7 = scmp.ne.s32.totalorder %s92_s27, %s4277_s24  ;;  %p4282_p8 = scmp.lt.s32.totalorder %s92_s27, %s92_s27 }
  0x51   :  { %p4283_p9 = scmp.lt.s32.totalorder %s4281_s5, %s4277_s24 }
  0x53   :  { %p4284_p10 = por %p4283_p9, %p4282_p8 }
  0x55   :  { %p4285_p11 = pnand %p4284_p10, %p4278_p7 }
  0x57   :  { %4288 = shalt.err (!%p4285_p11)
}
  0x58   :  { %94 = dma.hbm_to_vmem [thread:$0]  %s5485_s12, 16, %s92_s27, [#allocation10]  }
  0x59   :  { %4311 = dma.done.wait [#allocation4], 128  }
  0x5a   :  { %4312 = vsyncadd [#allocation4], 4294967168 }
  0x5b   :  { %4313 = dma.done.wait [#allocation7], 384  }
  0x5c   :  { %4314 = vsyncadd [#allocation7], 4294966912 }
  0x5d   :  { %4315 = dma.done.wait [#allocation10], 32  }
  0x5e   :  { %4316 = vsyncadd [#allocation10], 4294967264  ;;  %v5491_v1 = vmov 0.0|0.0   ;;  %vm4327_vm0 = vmmov 0   ;;  %v4328_v2 = vmov 0.0   ;;  %v124_v3 = vld [vmem:[%s5482_s9] sm:$0xff]  ;;  %v277_v31 = vlaneseq }
  0x5f   :  { %3881 = vmatprep.subr.bf16.mxu1 %v5491_v1  ;;  %3637 = vmatprep.mubr.msk.f32.mxu1 %vm4327_vm0, %v4328_v2  ;;  %310 = vst [vmem:[#allocation12] sm:$0xff] %v4328_v2  ;;  %311 = vst [vmem:[#allocation12 + $0x8] sm:$0xff] %v4328_v2  ;;  %v125_v4 = vld [vmem:[%s5482_s9 + $0x8] sm:$0xff]  ;;  %v286_v5 = vld [vmem:[%s5483_s10] sm:$0xff]  ;;  %vm132_vm1 = vcmask 523264   ;;  %vm328_vm2 = vcmask 261120  }
  0x60   :  { %312 = vst [vmem:[#allocation12 + $0x10] sm:$0xff] %v4328_v2  ;;  %313 = vst [vmem:[#allocation12 + $0x18] sm:$0xff] %v4328_v2  ;;  %v3865_v6 = vpack.c.bf16 %v125_v4, %v124_v3  ;;  %v287_v7 = vld [vmem:[%s5483_s10 + $0x8] sm:$0xff]  ;;  %v126_v8 = vld [vmem:[%s5482_s9 + $0x10] sm:$0xff]  ;;  %v4329_v30 = vmov 0   ;;  %v4622_v35 = vshrl.u32 %v277_v31, 7 }
  0x61   :  { %314 = vst [vmem:[#allocation12 + $0x20] sm:$0xff] %v4328_v2  ;;  %315 = vst [vmem:[#allocation12 + $0x28] sm:$0xff] %v4328_v2  ;;  %v127_v9 = vld [vmem:[%s5482_s9 + $0x18] sm:$0xff]  ;;  %v4530_v10 = vpack.c.bf16 %v287_v7, %v286_v5  ;;  %v288_v12 = vld [vmem:[%s5483_s10 + $0x10] sm:$0xff]  ;;  %4029 = vset.pattern.permute.xlu0 %v4329_v30  ;;  %4030 = vset.pattern.permute.xlu1 %v4329_v30  ;;  %v4330_v32 = vmov 1966171168  }
  0x62   :  { %316 = vst [vmem:[#allocation12 + $0x30] sm:$0xff] %v4328_v2  ;;  %317 = vst [vmem:[#allocation12 + $0x38] sm:$0xff] %v4328_v2  ;;  %v3869_v11 = vpack.c.bf16 %v127_v9, %v126_v8  ;;  %v289_v13 = vld [vmem:[%s5483_s10 + $0x18] sm:$0xff]  ;;  %v128_v14 = vld [vmem:[%s5482_s9 + $0x20] sm:$0xff]  ;;  %3866 = vmatprep.subr.bf16.mxu0 %v3865_v6  ;;  %v405_v33 = vunpack.c.l.s4 %v4330_v32  ;;  %v4629_v42 = vsub.s32 0, %v4622_v35  ;;  %vm603_vm3 = vcmask 1041409  }
  0x63   :  { %318 = vst [vmem:[#allocation12 + $0x40] sm:$0xff] %v4328_v2  ;;  %319 = vst [vmem:[#allocation12 + $0x48] sm:$0xff] %v4328_v2  ;;  %v129_v15 = vld [vmem:[%s5482_s9 + $0x28] sm:$0xff]  ;;  %3868 = vmatpush3.bf16.msra.mxu0 %v3865_v6  ;;  %3883 = vmatpush3.bf16.msra.mxu1 %v4530_v10  ;;  %v4545_v16 = vpack.c.bf16 %v289_v13, %v288_v12  ;;  %v4550_v17 = vld [vmem:[%s5475_s2] sm:$0xff]  ;;  %vm605_vm4 = vcmask 1042434   ;;  %vm607_vm5 = vcmask 1043459  }
  0x64   :  { %320 = vst [vmem:[#allocation12 + $0x50] sm:$0xff] %v4328_v2  ;;  %321 = vst [vmem:[#allocation12 + $0x58] sm:$0xff] %v4328_v2  ;;  %3870 = vmatprep.subr.bf16.mxu0 %v3869_v11  ;;  %3884 = vmatprep.subr.bf16.mxu1 %v5491_v1  ;;  %v3873_v18 = vpack.c.bf16 %v129_v15, %v128_v14  ;;  %v130_v19 = vld [vmem:[%s5482_s9 + $0x30] sm:$0xff]  ;;  %v131_v20 = vld [vmem:[%s5482_s9 + $0x38] sm:$0xff]  ;;  %v406_v34 = vunpack.c.0.s8 %v405_v33  ;;  %vm609_vm6 = vcmask 1044484   ;;  %vm611_vm7 = vcmask 1045509  }
  0x65   :  { %322 = vst [vmem:[#allocation12 + $0x60] sm:$0xff] %v4328_v2  ;;  %323 = vst [vmem:[#allocation12 + $0x68] sm:$0xff] %v4328_v2  ;;  %3617 = vmatprep.mubr.msk.f32.mxu0 %vm132_vm1, %v4550_v17  ;;  %v4562_v21 = vld [vmem:[#allocation3] sm:$0xff]  ;;  %v3877_v22 = vpack.c.bf16 %v131_v20, %v130_v19  ;;  %v4577_v24 = vld [vmem:[%s5475_s2 + $0x10] sm:$0xff]  ;;  %vm613_vm8 = vcmask 1046534   ;;  %vm615_vm9 = vcmask 1047559  }
  0x66   :  { %324 = vst [vmem:[#allocation12 + $0x70] sm:$0xff] %v4328_v2  ;;  %325 = vst [vmem:[#allocation12 + $0x78] sm:$0xff] %v4328_v2  ;;  %v4572_v23 = vld [vmem:[%s5475_s2 + $0x8] sm:$0xff]  ;;  %v4587_v25 = vld [vmem:[%s5475_s2 + $0x18] sm:$0xff]  ;;  %v4625_v36 = vsub.s32 %v406_v34, %v4622_v35  ;;  %vm619_vm11 = vcmask 64512   ;;  %s5513_s21 = sld [smem:[#allocation32_spill]] }
  0x67   :  { %3872 = vmatpush3.bf16.msra.mxu0 %v3869_v11  ;;  %3886 = vmatpush3.bf16.msra.mxu1 %v4545_v16  ;;  %v4592_v26 = vld [vmem:[%s5475_s2 + $0x20] sm:$0xff]  ;;  %v4601_v27 = vld [vmem:[%s5475_s2 + $0x28] sm:$0xff]  ;;  %v4606_v28 = vld [vmem:[%s5475_s2 + $0x30] sm:$0xff]  ;;  %vm845_vm13 = vcmask 130048   ;;  %s4332_s9 = smov 64  }
  0x68   :  { %3874 = vmatprep.subr.bf16.mxu0 %v3873_v18  ;;  %3887 = vmatprep.subr.bf16.mxu1 %v5491_v1  ;;  %v4615_v29 = vld [vmem:[%s5475_s2 + $0x38] sm:$0xff]  ;;  %v3441_v47 = vld [vmem:[#allocation9] ss:$0 sm:$0xff]  ;;  %v4666_v34 = vld [vmem:[#allocation11] ss:$0 sm:$0xff] }
  0x6a   :  { %3638 = vmatmul.mubr.msk.f32.vlgmr.msra.gmra.mrb[0].mxu1 %vm328_vm2, %v4562_v21 }
  0x6b   :  { %3876 = vmatpush3.bf16.msra.mxu0 %v3873_v18  ;;  %3656 = vmatprep.mubr.msk.f32.mxu1 %vm4327_vm0, %v4328_v2 }
  0x6c   :  { %3878 = vmatprep.subr.bf16.mxu0 %v3877_v22 }
  0x6f   :  { %3880 = vmatpush3.bf16.msra.mxu0 %v3877_v22 }
  0x70   :  { %3902 = vmatprep.subr.bf16.mxu0 %v5491_v1 }
  0x72   :  { %3618 = vmatmul.mubr.msk.f32.vlgmr.msra.gmra.mrb[0].mxu0 %vm132_vm1, %v4572_v23 }
  0x73   :  { %3620 = vmatprep.mubr.msk.f32.mxu0 %vm132_vm1, %v4577_v24 }
  0x76   :  { %3621 = vmatmul.mubr.msk.f32.gmra.mrb[2].mxu0 %vm132_vm1, %v4587_v25 }
  0x77   :  { %3623 = vmatprep.mubr.msk.f32.mxu0 %vm132_vm1, %v4592_v26 }
  0x7a   :  { %3624 = vmatmul.mubr.msk.f32.gmra.mrb[4].mxu0 %vm132_vm1, %v4601_v27 }
  0x7b   :  { %3626 = vmatprep.mubr.msk.f32.mxu0 %vm132_vm1, %v4606_v28 }
  0x7e   :  { %3627 = vmatmul.mubr.msk.f32.gmra.mrb[6].mxu0 %vm132_vm1, %v4615_v29 }
  0x7f   :  { %3674 = vmatprep.mubr.msk.f32.mxu0 %vm4327_vm0, %v4328_v2 }
 0x13d   :  { %v398_v37 = vpop.f32.mrb[0].mxu1 }
 0x13e   :  { %v403_v38 = vcombine.high %v398_v37, %v398_v37  ;;  %v410_v39 = vrot.slane %v398_v37, %v4625_v36  ;;  %v3639_v40 = vpop.f32.mrb[1].mxu1 }
 0x140   :  { %v418_v41 = vcombine.high %v410_v39, %v410_v39  ;;  %v417_v43 = vrot.slane %v403_v38, %v4625_v36  ;;  %v426_v45 = vrot.slane %v410_v39, %v4625_v36 }
 0x142   :  { %v440_v44 = vrot.slane %v418_v41, %v4625_v36  ;;  %v419_v50 = vcombine.high %v417_v43, %v417_v43  ;;  %v448_v52 = vcombine.high %v426_v45, %v426_v45  ;;  %v455_v53 = vrot.slane %v426_v45, %v4629_v42 }
 0x143   :  { %v433_v63 = vrot.slane %v417_v43, %v4625_v36 }
 0x144   :  { %v450_v46 = vcombine.high %v440_v44, %v440_v44  ;;  %v459_v48 = vrot.slane %v440_v44, %v4629_v42  ;;  %v447_v60 = vrot.slane %v419_v50, %v4625_v36  ;;  %v463_v0 = vrot.slane %v448_v52, %v4629_v42 }
 0x145   :  { %v3619_v49 = vpop.f32.mrb[0].mxu0  ;;  %v449_v12 = vcombine.high %v433_v63, %v433_v63  ;;  %v471_v13 = vrot.slane %v433_v63, %v4629_v42 }
 0x146   :  { %v223_v51 = vpop.f32.mrb[1].mxu0  ;;  %v4636_v54 = vadd.f32 %v3619_v49, %v3441_v47  ;;  %v467_v56 = vrot.slane %v450_v46, %v4629_v42  ;;  %v451_v7 = vcombine.high %v447_v60, %v447_v60  ;;  %v475_v8 = vrot.slane %v447_v60, %v4629_v42 }
 0x147   :  { %v4638_v55 = vadd.f32 %v3441_v47, %v223_v51  ;;  %v479_v32 = vrot.slane %v449_v12, %v4629_v42 }
 0x148   :  { %v493_v57 = vadd.f32 %v459_v48, %v4636_v54  ;;  %v483_v22 = vrot.slane %v451_v7, %v4629_v42  ;;  %v3444_v7 = vld [vmem:[#allocation2] ss:$0 sm:$0xff] }
 0x149   :  { %v492_v58 = vadd.f32 %v455_v53, %v4638_v55  ;;  %v3622_v59 = vpop.f32.mrb[2].mxu0 }
 0x14a   :  { %v4644_v61 = vadd.f32 %v3622_v59, %v3441_v47  ;;  %v233_v62 = vpop.f32.mrb[3].mxu0  ;;  %4031 = vtanh.f32 %v493_v57 }
 0x14b   :  { %v4648_v3 = vadd.f32 %v3441_v47, %v233_v62  ;;  %4033 = vtanh.f32 %v492_v58 }
 0x14c   :  { %v495_v4 = vadd.f32 %v467_v56, %v4644_v61 }
 0x14d   :  { %v494_v5 = vadd.f32 %v463_v0, %v4648_v3  ;;  %v3625_v6 = vpop.f32.mrb[4].mxu0 }
 0x14e   :  { %4035 = vtanh.f32 %v495_v4  ;;  %v4653_v9 = vadd.f32 %v3625_v6, %v3441_v47  ;;  %v243_v11 = vpop.f32.mrb[5].mxu0  ;;  %v279_v6 = vld [vmem:[%s5474_s1] sm:$0xff] }
 0x14f   :  { %4037 = vtanh.f32 %v494_v5  ;;  %v4656_v14 = vadd.f32 %v3441_v47, %v243_v11 }
 0x150   :  { %v497_v15 = vadd.f32 %v475_v8, %v4653_v9 }
 0x151   :  { %v496_v18 = vadd.f32 %v471_v13, %v4656_v14  ;;  %v3628_v19 = vpop.f32.mrb[6].mxu0 }
 0x152   :  { %4039 = vtanh.f32 %v497_v15  ;;  %v4660_v20 = vadd.f32 %v3628_v19, %v3441_v47  ;;  %v253_v30 = vpop.f32.mrb[7].mxu0 }
 0x153   :  { %4041 = vtanh.f32 %v496_v18  ;;  %v4664_v33 = vadd.f32 %v3441_v47, %v253_v30  ;;  %v4690_v18 = vand.u32 127, %v277_v31 }
 0x154   :  { %v499_v37 = vadd.f32 %v483_v22, %v4660_v20  ;;  %v4032_v38 = vpop.eup %4031 }
 0x155   :  { %v498_v39 = vadd.f32 %v479_v32, %v4664_v33  ;;  %v4034_v40 = vpop.eup %4033  ;;  %v515_v41 = vmul.f32 %v4032_v38, %v4666_v34  ;;  %v4694_v30 = vsub.s32 %v4690_v18, %v4622_v35 }
 0x156   :  { %4043 = vtanh.f32 %v499_v37  ;;  %v514_v45 = vmul.f32 %v4034_v40, %v4666_v34 }
 0x157   :  { %4045 = vtanh.f32 %v498_v39  ;;  %v525_v44 = vsel %vm328_vm2, %v515_v41, 0.0 }
 0x158   :  { %v4036_v43 = vpop.eup %4035  ;;  %526 = vadd.xlane.f32.xlu0 %v525_v44  ;;  %v522_v51 = vsel %vm328_vm2, %v514_v45, 0.0 }
 0x159   :  { %v4038_v46 = vpop.eup %4037  ;;  %v517_v47 = vmul.f32 %v4036_v43, %v4666_v34 }
 0x15a   :  { %v516_v49 = vmul.f32 %v4038_v46, %v4666_v34 }
 0x15b   :  { %v531_v48 = vsel %vm328_vm2, %v517_v47, 0.0 }
 0x15c   :  { %v4040_v50 = vpop.eup %4039  ;;  %532 = vadd.xlane.f32.xlu1 %v531_v48  ;;  %523 = vadd.xlane.f32.xlu0 %v522_v51  ;;  %v528_v56 = vsel %vm328_vm2, %v516_v49, 0.0 }
 0x15d   :  { %v4042_v52 = vpop.eup %4041  ;;  %v519_v57 = vmul.f32 %v4040_v50, %v4666_v34 }
 0x15e   :  { %v518_v53 = vmul.f32 %v4042_v52, %v4666_v34 }
 0x15f   :  { %v537_v63 = vsel %vm328_vm2, %v519_v57, 0.0 }
 0x160   :  { %v4044_v58 = vpop.eup %4043  ;;  %529 = vadd.xlane.f32.xlu1 %v528_v56  ;;  %v534_v59 = vsel %vm328_vm2, %v518_v53, 0.0 }
 0x161   :  { %v4046_v60 = vpop.eup %4045  ;;  %535 = vadd.xlane.f32.xlu0 %v534_v59  ;;  %v521_v0 = vmul.f32 %v4044_v58, %v4666_v34 }
 0x162   :  { %v520_v62 = vmul.f32 %v4046_v60, %v4666_v34 }
 0x163   :  { %v543_v5 = vsel %vm328_vm2, %v521_v0, 0.0 }
 0x164   :  { %538 = vadd.xlane.f32.xlu1 %v537_v63  ;;  %v540_v4 = vsel %vm328_vm2, %v520_v62, 0.0 }
 0x165   :  { %541 = vadd.xlane.f32.xlu0 %v540_v4 }
 0x168   :  { %544 = vadd.xlane.f32.xlu1 %v543_v5 }
 0x179   :  { %281 = vperm.xlu1 %4030, %v279_v6  }
 0x17b   :  { %552 = vperm.xlu0 %4029, %v3444_v7  }
 0x1e5   :  { %v527_v8 = vpop.xlane.xlu0 %526 }
 0x1e9   :  { %v524_v11 = vpop.xlane.xlu0 %523  ;;  %v533_v12 = vpop.xlane.xlu1 %532 }
 0x1ed   :  { %v530_v13 = vpop.xlane.xlu1 %529 }
 0x1ee   :  { %v536_v15 = vpop.xlane.xlu0 %535 }
 0x1f1   :  { %v539_v19 = vpop.xlane.xlu1 %538 }
 0x1f2   :  { %v542_v22 = vpop.xlane.xlu0 %541 }
 0x1f5   :  { %v545_v41 = vpop.xlane.xlu1 %544 }
 0x1f9   :  { %v4711_v51 = vpop.permute.xlu1 %281 }
 0x1fa   :  { %v4696_v32 = vpop.permute.xlu0 %552  ;;  %vm283_vm10 = vcmp.ge.s32.totalorder %v4690_v18, %v4711_v51 }
 0x1fb   :  { %v555_v37 = vadd.f32 %v4696_v32, %v524_v11  ;;  %v556_v38 = vadd.f32 %v4696_v32, %v527_v8  ;;  %v557_v39 = vadd.f32 %v4696_v32, %v530_v13  ;;  %v558_v40 = vadd.f32 %v4696_v32, %v533_v12 }
 0x1fc   :  { %v559_v31 = vadd.f32 %v4696_v32, %v536_v15  ;;  %v560_v43 = vadd.f32 %v4696_v32, %v539_v19  ;;  %v561_v47 = vadd.f32 %v4696_v32, %v542_v22  ;;  %v562_v48 = vadd.f32 %v4696_v32, %v545_v41 }
 0x1fd   :  { %v574_v44 = vrot.slane %v555_v37, %v4694_v30  ;;  %v578_v45 = vrot.slane %v556_v38, %v4694_v30  ;;  %v582_v46 = vrot.slane %v557_v39, %v4694_v30  ;;  %v586_v49 = vrot.slane %v558_v40, %v4694_v30 }
 0x1fe   :  { %v590_v52 = vrot.slane %v559_v31, %v4694_v30  ;;  %v594_v56 = vrot.slane %v560_v43, %v4694_v30  ;;  %v598_v58 = vrot.slane %v561_v47, %v4694_v30  ;;  %v602_v60 = vrot.slane %v562_v48, %v4694_v30  ;;  %v293_v47 = vld [vmem:[%s5479_s6 + $0x8] sm:$0xff] }
 0x1ff   :  { %v604_v50 = vsel %vm603_vm3, %v578_v45, %v574_v44  ;;  %v4731_v15 = vsub.s32 3, %v4622_v35  ;;  %v4737_v39 = vsub.s32 1, %v4622_v35  ;;  %v4741_v41 = vsub.s32 2, %v4622_v35 }
 0x200   :  { %v606_v53 = vsel %vm605_vm4, %v582_v46, %v604_v50  ;;  %v4745_v43 = vsub.s32 4, %v4622_v35  ;;  %v4749_v45 = vsub.s32 5, %v4622_v35  ;;  %v292_v46 = vld [vmem:[%s5479_s6] sm:$0xff]  ;;  %v4762_v50 = vsub.s32 6, %v4622_v35 }
 0x201   :  { %v608_v57 = vsel %vm607_vm5, %v586_v49, %v606_v53  ;;  %v4757_v48 = vpack.c.bf16 %v293_v47, %v292_v46  ;;  %v295_v53 = vld [vmem:[%s5479_s6 + $0x18] sm:$0xff] }
 0x202   :  { %v610_v59 = vsel %vm609_vm6, %v590_v52, %v608_v57  ;;  %v294_v52 = vld [vmem:[%s5479_s6 + $0x10] sm:$0xff] }
 0x203   :  { %v612_v62 = vsel %vm611_vm7, %v594_v56, %v610_v59  ;;  %3889 = vmatpush3.bf16.msra.mxu1 %v4757_v48  ;;  %v4771_v56 = vpack.c.bf16 %v295_v53, %v294_v52  ;;  %v296_v59 = vld [vmem:[%s5479_s6 + $0x20] sm:$0xff] }
 0x204   :  { %v614_v63 = vsel %vm613_vm8, %v598_v58, %v612_v62  ;;  %3890 = vmatprep.subr.bf16.mxu1 %v5491_v1  ;;  %v4776_v58 = vsub.s32 7, %v4622_v35  ;;  %v298_v35 = vld [vmem:[%s5479_s6 + $0x30] sm:$0xff] }
 0x205   :  { %v616_v0 = vsel %vm615_vm9, %v602_v60, %v614_v63  ;;  %v297_v60 = vld [vmem:[%s5479_s6 + $0x28] sm:$0xff] }
 0x206   :  { %v618_v4 = vsel %vm283_vm10, -1e+30, %v616_v0  ;;  %5511 = vst [vmem:[#allocation17_spill] sm:$0xff] %v4776_v58  ;;  %v4785_v62 = vpack.c.bf16 %v297_v60, %v296_v59  ;;  %v299_v0 = vld [vmem:[%s5479_s6 + $0x38] sm:$0xff] }
 0x207   :  { %v620_v5 = vsel %vm619_vm11, %v618_v4, -inf  ;;  %3892 = vmatpush3.bf16.msra.mxu1 %v4771_v56 }
 0x208   :  { %621 = vmax.xlane.f32.xlu1 %v620_v5  ;;  %3893 = vmatprep.subr.bf16.mxu1 %v5491_v1  ;;  %v301_v5 = vld [vmem:[%s5480_s7 + $0x8] sm:$0xff] }
 0x20b   :  { %3895 = vmatpush3.bf16.msra.mxu1 %v4785_v62 }
 0x20c   :  { %3896 = vmatprep.subr.bf16.mxu1 %v5491_v1 }
 0x295   :  { %v622_v6 = vpop.xlane.xlu1 %621 }
 0x296   :  { %v623_v7 = vsub.f32 %v618_v4, %v622_v6  ;;  %v300_v4 = vld [vmem:[%s5480_s7] sm:$0xff]  ;;  %v4802_v6 = vpack.c.bf16 %v299_v0, %v298_v35 }
 0x298   :  { %v624_v8 = vmul.f32 1.442695, %v623_v7  ;;  %v4804_v7 = vpack.c.bf16 %v301_v5, %v300_v4  ;;  %3898 = vmatpush3.bf16.msra.mxu1 %v4802_v6 }
 0x299   :  { %3899 = vmatprep.subr.bf16.mxu1 %v5491_v1 }
 0x29a   :  { %4047 = vpow2.f32 %v624_v8  ;;  %5512 = vst [vmem:[#allocation18_spill] sm:$0xff] %v4804_v7  ;;  %v302_v8 = vld [vmem:[%s5480_s7 + $0x10] sm:$0xff]  ;;  %3904 = vmatpush3.bf16.msra.mxu0 %v4804_v7 }
 0x29b   :  { %3905 = vmatprep.subr.bf16.mxu0 %v5491_v1 }
 0x2a4   :  { %v4048_v11 = vpop.eup %4047 }
 0x2a5   :  { %v626_v12 = vsel %vm619_vm11, %v4048_v11, 0.0 }
 0x2a6   :  { %627 = vadd.xlane.f32.xlu0 %v626_v12  ;;  %v751_v12 = vld [vmem:[%s5513_s21] sm:$0xff] }
 0x333   :  { %v628_v13 = vpop.xlane.xlu0 %627 }
 0x334   :  { %4049 = vrcp.f32 %v628_v13 }
 0x33e   :  { %v4050_v19 = vpop.eup %4049 }
 0x33f   :  { %v630_v22 = vmul.f32 %v4050_v19, %v4048_v11  ;;  %v303_v11 = vld [vmem:[%s5480_s7 + $0x18] sm:$0xff]  ;;  %v327_v19 = vld [vmem:[#allocation6] sm:$0xff]  ;;  %s4331_s7 = smov 32  }
 0x340   :  { %v4817_v13 = vpack.c.bf16 %v303_v11, %v302_v8 }
 0x341   :  { %1130 = vst.msk [vmem:[#allocation12 + $0x18] sm:$0xff] %vm619_vm11, %v630_v22  ;;  %v655_v37 = vrot.slane %v630_v22, %v4731_v15  ;;  %v634_v38 = vrot.slane %v630_v22, %v4629_v42  ;;  %v641_v40 = vrot.slane %v630_v22, %v4737_v39  ;;  %v648_v31 = vrot.slane %v630_v22, %v4741_v41 }
 0x342   :  { %v662_v44 = vrot.slane %v630_v22, %v4745_v43  ;;  %v669_v49 = vrot.slane %v630_v22, %v4749_v45  ;;  %v676_v57 = vrot.slane %v630_v22, %v4762_v50  ;;  %v683_v63 = vrot.slane %v630_v22, %v4776_v58  ;;  %5514 = vst [vmem:[#allocation19_spill] sm:$0xff] %v4817_v13 }
 0x343   :  { %657 = vbcast.lane.b32.xlu0 %v655_v37, 256  ;;  %636 = vbcast.lane.b32.xlu1 %v634_v38, 256 }
 0x344   :  { %3907 = vmatpush3.bf16.msra.mxu0 %v4817_v13 }
 0x345   :  { %3914 = vmatprep.subr.bf16.mxu0 %v5491_v1 }
 0x347   :  { %643 = vbcast.lane.b32.xlu1 %v641_v40, 256  ;;  %3675 = vmatmul.mubr.msk.f32.vlgmr.msra.gmra.mrb[8].mxu0 %vm328_vm2, %v4562_v21 }
 0x348   :  { %3916 = vmatpush3.bf16.msra.mxu0 %v4530_v10  ;;  %3696 = vmatprep.mubr.msk.f32.mxu0 %vm4327_vm0, %v4328_v2 }
 0x349   :  { %3917 = vmatprep.subr.bf16.mxu0 %v5491_v1 }
 0x34b   :  { %650 = vbcast.lane.b32.xlu1 %v648_v31, 256 }
 0x34c   :  { %3919 = vmatpush3.bf16.msra.mxu0 %v4545_v16 }
 0x34d   :  { %3935 = vmatprep.subr.bf16.mxu0 %v5491_v1 }
 0x34f   :  { %664 = vbcast.lane.b32.xlu1 %v662_v44, 256 }
 0x353   :  { %671 = vbcast.lane.b32.xlu1 %v669_v49, 256 }
 0x357   :  { %678 = vbcast.lane.b32.xlu1 %v676_v57, 256 }
 0x35b   :  { %685 = vbcast.lane.b32.xlu1 %v683_v63, 256 }
 0x35f   :  { %753 = vperm.xlu1 %4030, %v751_v12  }
 0x363   :  { %1005 = vrot.lane.b32.xlu1 %v327_v19, %s4331_s7 }
 0x3b5   :  { %v637_v22 = vpop.permute.xlu1 %636  ;;  %v658_v37 = vpop.permute.xlu0 %657 }
 0x3b6   :  { %v687_v38 = vmul.f32 %v637_v22, %v4550_v17  ;;  %v690_v21 = vmul.f32 %v658_v37, %v4587_v25 }
 0x3b8   :  { %v695_v44 = vsel %vm132_vm1, %v687_v38, 0.0  ;;  %v716_v53 = vsel %vm132_vm1, %v690_v21, 0.0 }
 0x3b9   :  { %v644_v40 = vpop.permute.xlu1 %643  ;;  %v696_v57 = vrot.slane %v695_v44, 4  ;;  %v717_v35 = vrot.slane %v716_v53, 4 }
 0x3ba   :  { %v688_v31 = vmul.f32 %v644_v40, %v4572_v23 }
 0x3bb   :  { %v697_v25 = vadd.f32 %v696_v57, %v695_v44  ;;  %v718_v12 = vadd.f32 %v717_v35, %v716_v53 }
 0x3bc   :  { %v702_v46 = vsel %vm132_vm1, %v688_v31, 0.0 }
 0x3bd   :  { %v703_v47 = vrot.slane %v702_v46, 4  ;;  %v651_v49 = vpop.permute.xlu1 %650  ;;  %v698_v22 = vrot.slane %v697_v25, 2 }
 0x3be   :  { %v689_v52 = vmul.f32 %v651_v49, %v4577_v24 }
 0x3bf   :  { %v704_v60 = vadd.f32 %v703_v47, %v702_v46  ;;  %v719_v46 = vrot.slane %v718_v12, 2  ;;  %v699_v49 = vadd.f32 %v698_v22, %v697_v25 }
 0x3c0   :  { %v709_v59 = vsel %vm132_vm1, %v689_v52, 0.0 }
 0x3c1   :  { %v710_v17 = vrot.slane %v709_v59, 4  ;;  %v665_v63 = vpop.permute.xlu1 %664  ;;  %v705_v5 = vrot.slane %v704_v60, 2 }
 0x3c2   :  { %v691_v23 = vmul.f32 %v665_v63, %v4592_v26  ;;  %v720_v63 = vadd.f32 %v719_v46, %v718_v12 }
 0x3c3   :  { %v711_v0 = vadd.f32 %v710_v17, %v709_v59  ;;  %v706_v40 = vadd.f32 %v705_v5, %v704_v60 }
 0x3c4   :  { %v723_v4 = vsel %vm132_vm1, %v691_v23, 0.0 }
 0x3c5   :  { %v724_v8 = vrot.slane %v723_v4, 4  ;;  %v672_v11 = vpop.permute.xlu1 %671  ;;  %v712_v24 = vrot.slane %v711_v0, 2  ;;  %v707_v53 = vrot.slane %v706_v40, 1 }
 0x3c6   :  { %v692_v19 = vmul.f32 %v672_v11, %v4601_v27 }
 0x3c7   :  { %v725_v37 = vadd.f32 %v724_v8, %v723_v4  ;;  %v713_v26 = vadd.f32 %v712_v24, %v711_v0  ;;  %v700_v4 = vrot.slane %v699_v49, 1  ;;  %v708_v11 = vadd.f32 %v707_v53, %v706_v40  ;;  %v290_v53 = vld [vmem:[#allocation8] sm:$0xff] }
 0x3c8   :  { %v730_v38 = vsel %vm132_vm1, %v692_v19, 0.0  ;;  %v721_v24 = vrot.slane %v720_v63, 1 }
 0x3c9   :  { %v731_v31 = vrot.slane %v730_v38, 4  ;;  %v679_v21 = vpop.permute.xlu1 %678  ;;  %v726_v44 = vrot.slane %v725_v37, 2  ;;  %v714_v35 = vrot.slane %v713_v26, 1 }
 0x3ca   :  { %v693_v47 = vmul.f32 %v679_v21, %v4606_v28 }
 0x3cb   :  { %v732_v52 = vadd.f32 %v731_v31, %v730_v38  ;;  %v727_v23 = vadd.f32 %v726_v44, %v725_v37  ;;  %v715_v19 = vadd.f32 %v714_v35, %v713_v26  ;;  %v701_v38 = vadd.f32 %v700_v4, %v699_v49 }
 0x3cc   :  { %v737_v57 = vsel %vm132_vm1, %v693_v47, 0.0 }
 0x3cd   :  { %v733_v59 = vrot.slane %v732_v52, 2  ;;  %v738_v17 = vrot.slane %v737_v57, 4  ;;  %v686_v27 = vpop.permute.xlu1 %685  ;;  %v728_v22 = vrot.slane %v727_v23, 1  ;;  %v766_v12 = vsel %vm603_vm3, %v708_v11, %v701_v38  ;;  %v4870_v38 = vld [vmem:[%s5481_s8] ss:$0 sm:$0xff] }
 0x3ce   :  { %v694_v60 = vmul.f32 %v686_v27, %v4615_v29  ;;  %v767_v29 = vsel %vm605_vm4, %v715_v19, %v766_v12 }
 0x3cf   :  { %v734_v5 = vadd.f32 %v733_v59, %v732_v52  ;;  %v739_v8 = vadd.f32 %v738_v17, %v737_v57  ;;  %v729_v44 = vadd.f32 %v728_v22, %v727_v23  ;;  %v722_v52 = vadd.f32 %v721_v24, %v720_v63  ;;  %v291_v17 = vld [vmem:[#allocation8 + $0x8] sm:$0xff] }
 0x3d0   :  { %v744_v0 = vsel %vm132_vm1, %v694_v60, 0.0  ;;  %v4853_v4 = vpack.c.bf16 %v291_v17, %v290_v53  ;;  %v305_v17 = vld [vmem:[%s5487_s14] sm:$0xff] }
 0x3d1   :  { %v740_v28 = vrot.slane %v739_v8, 2  ;;  %v745_v25 = vrot.slane %v744_v0, 4  ;;  %v735_v31 = vrot.slane %v734_v5, 1  ;;  %v768_v26 = vsel %vm607_vm5, %v722_v52, %v767_v29 }
 0x3d2   :  { %v769_v49 = vsel %vm609_vm6, %v729_v44, %v768_v26  ;;  %v306_v26 = vld [vmem:[%s5487_s14 + $0x8] sm:$0xff] }
 0x3d3   :  { %v741_v21 = vadd.f32 %v740_v28, %v739_v8  ;;  %v746_v47 = vadd.f32 %v745_v25, %v744_v0  ;;  %v736_v57 = vadd.f32 %v735_v31, %v734_v5 }
 0x3d5   :  { %v742_v37 = vrot.slane %v741_v21, 1  ;;  %v747_v46 = vrot.slane %v746_v47, 2  ;;  %v770_v60 = vsel %vm611_vm7, %v736_v57, %v769_v49  ;;  %v4887_v49 = vpack.c.bf16 %v306_v26, %v305_v17 }
 0x3d7   :  { %v748_v59 = vadd.f32 %v747_v46, %v746_v47  ;;  %v743_v40 = vadd.f32 %v742_v37, %v741_v21  ;;  %5516 = vst [vmem:[#allocation21_spill] sm:$0xff] %v4887_v49 }
 0x3d9   :  { %v749_v27 = vrot.slane %v748_v59, 1  ;;  %v771_v8 = vsel %vm613_vm8, %v743_v40, %v770_v60 }
 0x3db   :  { %v750_v35 = vadd.f32 %v749_v27, %v748_v59  ;;  %v307_v27 = vld [vmem:[%s5487_s14 + $0x10] sm:$0xff] }
 0x3dd   :  { %v772_v23 = vsel %vm615_vm9, %v750_v35, %v771_v8  ;;  %v308_v35 = vld [vmem:[%s5487_s14 + $0x18] sm:$0xff] }
 0x3de   :  { %3657 = vmatmul.mubr.msk.f32.vlgmr.msra.gmra.mrb[2].mxu1 %vm132_vm1, %v772_v23  ;;  %v754_v63 = vpop.permute.xlu1 %753  ;;  %v4893_v60 = vpack.c.bf16 %v308_v35, %v307_v27 }
 0x3df   :  { %3901 = vmatpush3.bf16.msra.mxu1 %v4853_v4  ;;  %vm755_vm12 = vcmp.eq.s32.totalorder %v754_v63, %v4690_v18  ;;  %3663 = vmatprep.mubr.msk.f32.mxu1 %vm4327_vm0, %v4328_v2 }
 0x3e0   :  { %v3445_v5 = vsel %vm755_vm12, 1.0, %v4328_v2  ;;  %3908 = vmatprep.subr.bf16.mxu1 %v5491_v1  ;;  %5517 = vst [vmem:[#allocation22_spill] sm:$0xff] %v4893_v60 }
 0x3e2   :  { %3664 = vmatmul.mubr.msk.f32.vlgmr.msra.gmra.mrb[4].mxu1 %vm845_vm13, %v3445_v5  ;;  %v1006_v57 = vpop.permute.xlu1 %1005 }
 0x3e3   :  { %3685 = vmatprep.mubr.msk.f32.mxu1 %vm4327_vm0, %v4328_v2  ;;  %3910 = vmatpush3.bf16.msra.mxu1 %v4887_v49 }
 0x3e4   :  { %3911 = vmatprep.subr.bf16.mxu1 %v5491_v1 }
 0x3e7   :  { %3913 = vmatpush3.bf16.msra.mxu1 %v4893_v60 }
 0x3e8   :  { %3920 = vmatprep.subr.bf16.mxu1 %v5491_v1 }
 0x41a   :  { %v985_v0 = vpop.f32.mrb[8].mxu0 }
 0x41b   :  { %v3676_v11 = vpop.f32.mrb[9].mxu0 }
 0x4b1   :  { %v841_v28 = vpop.f32.mrb[2].mxu1 }
 0x4b2   :  { %v3658_v25 = vpop.f32.mrb[3].mxu1 }
 0x4b5   :  { %v915_v24 = vpop.f32.mrb[4].mxu1 }
 0x4b6   :  { %v916_v19 = vadd.f32 %v915_v24, %v841_v28  ;;  %v3665_v22 = vpop.f32.mrb[5].mxu1 }
 0x4b8   :  { %v989_v31 = vadd.f32 %v985_v0, %v916_v19 }
 0x4ba   :  { %v996_v21 = vadd.f32 %v4870_v38, %v989_v31 }
 0x4bc   :  { %4051 = vtanh.f32 %v996_v21  ;;  %v3450_v12 = vmul.f32 -1.442695, %v996_v21 }
 0x4be   :  { %4053 = vpow2.f32 %v3450_v12 }
 0x4c6   :  { %v4052_v47 = vpop.eup %4051 }
 0x4c7   :  { %1010 = vrot.lane.b32.xlu0 %v4052_v47, %s4332_s9 }
 0x4c8   :  { %v4054_v37 = vpop.eup %4053 }
 0x4c9   :  { %v1000_v46 = vadd.f32 1.0, %v4054_v37 }
 0x4cb   :  { %4055 = vrcp.f32 %v1000_v46 }
 0x4d5   :  { %v4056_v29 = vpop.eup %4055 }
 0x4d6   :  { %v1008_v59 = vmul.f32 %v4056_v29, %v1006_v57 }
 0x539   :  { %v1011_v44 = vpop.permute.xlu0 %1010 }
 0x53a   :  { %v1013_v52 = vmul.f32 %v4056_v29, %v1011_v44 }
 0x53c   :  { %1015 = vrot.lane.b32.xlu0 %v1013_v52, %s4331_s7 }
 0x5ae   :  { %v1016_v40 = vpop.permute.xlu0 %1015 }
 0x5af   :  { %v4875_v53 = vadd.f32 %v1016_v40, %v1008_v59 }
 0x5b1   :  { %5515 = vst [vmem:[#allocation20_spill] sm:$0xff] %v4875_v53  ;;  %4057 = vtanh.f32 %v4875_v53 }
 0x5bb   :  { %v4058_v8 = vpop.eup %4057 }
 0x5bc   :  { %1021 = vrot.lane.b32.xlu1 %v4058_v8, %s4332_s9 }
 0x62e   :  { %v1022_v23 = vpop.permute.xlu1 %1021 }
 0x62f   :  { %v1024_v63 = vmul.f32 %v4056_v29, %v1022_v23 }
 0x631   :  { %1032 = vrot.lane.b32.xlu0 %v1024_v63, %s4331_s7 }
 0x6a3   :  { %v1033_v5 = vpop.permute.xlu0 %1032 }
 0x6a4   :  { %1122 = vst.msk [vmem:[#allocation12 + $0x8] sm:$0xff] %vm328_vm2, %v1033_v5  ;;  %3686 = vmatmul.mubr.msk.f32.vlgmr.msra.gmra.mrb[6].mxu1 %vm328_vm2, %v1033_v5  ;;  %3697 = vmatmul.mubr.msk.f32.vlgmr.msra.gmra.mrb[10].mxu0 %vm328_vm2, %v1033_v5 }
 0x6a5   :  { %3937 = vmatpush3.bf16.msra.mxu0 %v4804_v7  ;;  %3733 = vmatprep.mubr.msk.f32.mxu0 %vm4327_vm0, %v4328_v2 }
 0x6a6   :  { %3938 = vmatprep.subr.bf16.mxu0 %v5491_v1  ;;  %3922 = vmatpush3.bf16.msra.mxu1 %v4757_v48 }
 0x6a7   :  { %3923 = vmatprep.subr.bf16.mxu1 %v5491_v1  ;;  %3715 = vmatprep.mubr.msk.f32.mxu1 %vm4327_vm0, %v4328_v2 }
 0x6a9   :  { %3940 = vmatpush3.bf16.msra.mxu0 %v4817_v13 }
 0x6aa   :  { %3925 = vmatpush3.bf16.msra.mxu1 %v4771_v56  ;;  %3941 = vmatprep.subr.bf16.mxu0 %v5491_v1 }
 0x6ab   :  { %3926 = vmatprep.subr.bf16.mxu1 %v5491_v1 }
 0x6ac   :  { %3734 = vmatmul.mubr.msk.f32.vlgmr.msra.gmra.mrb[12].mxu0 %vm328_vm2, %v1033_v5 }
 0x6ad   :  { %3943 = vmatpush3.bf16.msra.mxu0 %v4887_v49  ;;  %3744 = vmatprep.mubr.msk.f32.mxu0 %vm4327_vm0, %v4328_v2 }
 0x6ae   :  { %3928 = vmatpush3.bf16.msra.mxu1 %v4785_v62  ;;  %3944 = vmatprep.subr.bf16.mxu0 %v5491_v1 }
 0x6af   :  { %3929 = vmatprep.subr.bf16.mxu1 %v5491_v1 }
 0x6b1   :  { %3946 = vmatpush3.bf16.msra.mxu0 %v4893_v60 }
 0x6b2   :  { %3931 = vmatpush3.bf16.msra.mxu1 %v4802_v6  ;;  %3953 = vmatprep.subr.bf16.mxu0 %v5491_v1 }
 0x6b3   :  { %3932 = vmatprep.subr.bf16.mxu1 %v5491_v1 }
 0x777   :  { %v4926_v0 = vpop.f32.mrb[6].mxu1  ;;  %v1197_v11 = vpop.f32.mrb[10].mxu0 }
 0x778   :  { %5518 = vst [vmem:[#allocation23_spill] sm:$0xff] %v4926_v0  ;;  %v1202_v28 = vcombine.high %v1197_v11, %v1197_v11  ;;  %v1209_v2 = vrot.slane %v1197_v11, %v4625_v36  ;;  %v3687_v25 = vpop.f32.mrb[7].mxu1  ;;  %v3698_v24 = vpop.f32.mrb[11].mxu0 }
 0x77a   :  { %v1216_v19 = vrot.slane %v1202_v28, %v4625_v36  ;;  %v1217_v22 = vcombine.high %v1209_v2, %v1209_v2  ;;  %v1225_v31 = vrot.slane %v1209_v2, %v4625_v36 }
 0x77c   :  { %v1218_v21 = vcombine.high %v1216_v19, %v1216_v19  ;;  %v1232_v47 = vrot.slane %v1216_v19, %v4625_v36  ;;  %v1239_v12 = vrot.slane %v1217_v22, %v4625_v36  ;;  %v1247_v37 = vcombine.high %v1225_v31, %v1225_v31 }
 0x77d   :  { %v1254_v46 = vrot.slane %v1225_v31, %v4629_v42 }
 0x77e   :  { %v1246_v29 = vrot.slane %v1218_v21, %v4625_v36  ;;  %v1249_v44 = vcombine.high %v1239_v12, %v1239_v12  ;;  %v1258_v52 = vrot.slane %v1239_v12, %v4629_v42  ;;  %v1248_v57 = vcombine.high %v1232_v47, %v1232_v47 }
 0x77f   :  { %v1262_v59 = vrot.slane %v1247_v37, %v4629_v42  ;;  %v1270_v40 = vrot.slane %v1232_v47, %v4629_v42  ;;  %v1291_v17 = vadd.f32 %v1254_v46, %v4638_v55  ;;  %v4939_v26 = vpop.f32.mrb[12].mxu0 }
 0x780   :  { %v1250_v27 = vcombine.high %v1246_v29, %v1246_v29  ;;  %v1266_v35 = vrot.slane %v1249_v44, %v4629_v42  ;;  %v1274_v8 = vrot.slane %v1246_v29, %v4629_v42  ;;  %v3735_v23 = vpop.f32.mrb[13].mxu0  ;;  %v1292_v63 = vadd.f32 %v1258_v52, %v4636_v54 }
 0x781   :  { %v1293_v5 = vadd.f32 %v1262_v59, %v4648_v3  ;;  %4059 = vtanh.f32 %v1291_v17  ;;  %v1295_v2 = vadd.f32 %v1270_v40, %v4656_v14  ;;  %v1278_v25 = vrot.slane %v1248_v57, %v4629_v42 }
 0x782   :  { %v1282_v11 = vrot.slane %v1250_v27, %v4629_v42  ;;  %v1294_v28 = vadd.f32 %v1266_v35, %v4644_v61  ;;  %v1296_v24 = vadd.f32 %v1274_v8, %v4653_v9  ;;  %4061 = vtanh.f32 %v1292_v63 }
 0x783   :  { %4063 = vtanh.f32 %v1293_v5  ;;  %v1297_v22 = vadd.f32 %v1278_v25, %v4664_v33 }
 0x784   :  { %v1298_v19 = vadd.f32 %v1282_v11, %v4660_v20  ;;  %4065 = vtanh.f32 %v1294_v28 }
 0x785   :  { %4067 = vtanh.f32 %v1295_v2 }
 0x786   :  { %4069 = vtanh.f32 %v1296_v24 }
 0x787   :  { %4071 = vtanh.f32 %v1298_v19 }
 0x788   :  { %4073 = vtanh.f32 %v1297_v22 }
 0x78b   :  { %v4060_v31 = vpop.eup %4059 }
 0x78c   :  { %v1307_v21 = vmul.f32 %v4060_v31, %v4666_v34  ;;  %v4062_v47 = vpop.eup %4061 }
 0x78d   :  { %v4064_v12 = vpop.eup %4063  ;;  %v1308_v46 = vmul.f32 %v4062_v47, %v4666_v34 }
 0x78e   :  { %v1315_v37 = vsel %vm328_vm2, %v1307_v21, 0.0  ;;  %v4066_v29 = vpop.eup %4065  ;;  %v1309_v59 = vmul.f32 %v4064_v12, %v4666_v34 }
 0x78f   :  { %1316 = vadd.xlane.f32.xlu1 %v1315_v37  ;;  %v4068_v44 = vpop.eup %4067  ;;  %v1318_v52 = vsel %vm328_vm2, %v1308_v46, 0.0  ;;  %v1310_v57 = vmul.f32 %v4066_v29, %v4666_v34 }
 0x790   :  { %v4070_v40 = vpop.eup %4069  ;;  %1319 = vadd.xlane.f32.xlu0 %v1318_v52  ;;  %v1321_v8 = vsel %vm328_vm2, %v1309_v59, 0.0  ;;  %v1311_v23 = vmul.f32 %v4068_v44, %v4666_v34 }
 0x791   :  { %v1324_v17 = vsel %vm328_vm2, %v1310_v57, 0.0  ;;  %v1312_v27 = vmul.f32 %v4070_v40, %v4666_v34  ;;  %v4072_v35 = vpop.eup %4071 }
 0x792   :  { %v4074_v63 = vpop.eup %4073  ;;  %v1314_v11 = vmul.f32 %v4072_v35, %v4666_v34  ;;  %v1327_v28 = vsel %vm328_vm2, %v1311_v23, 0.0 }
 0x793   :  { %1325 = vadd.xlane.f32.xlu1 %v1324_v17  ;;  %v1330_v5 = vsel %vm328_vm2, %v1312_v27, 0.0  ;;  %v1313_v2 = vmul.f32 %v4074_v63, %v4666_v34 }
 0x794   :  { %1322 = vadd.xlane.f32.xlu0 %v1321_v8  ;;  %v1336_v25 = vsel %vm328_vm2, %v1314_v11, 0.0 }
 0x795   :  { %v1333_v24 = vsel %vm328_vm2, %v1313_v2, 0.0 }
 0x797   :  { %1331 = vadd.xlane.f32.xlu1 %v1330_v5 }
 0x798   :  { %1328 = vadd.xlane.f32.xlu0 %v1327_v28 }
 0x79b   :  { %1337 = vadd.xlane.f32.xlu1 %v1336_v25 }
 0x79c   :  { %1334 = vadd.xlane.f32.xlu0 %v1333_v24 }
 0x81c   :  { %v1317_v19 = vpop.xlane.xlu1 %1316 }
 0x81d   :  { %v1320_v22 = vpop.xlane.xlu0 %1319  ;;  %v1339_v21 = vadd.f32 %v1317_v19, %v4696_v32 }
 0x81e   :  { %v1340_v31 = vadd.f32 %v1320_v22, %v4696_v32 }
 0x81f   :  { %v1358_v34 = vrot.slane %v1339_v21, %v4694_v30 }
 0x820   :  { %v1326_v47 = vpop.xlane.xlu1 %1325  ;;  %v1362_v12 = vrot.slane %v1340_v31, %v4694_v30 }
 0x821   :  { %v1323_v37 = vpop.xlane.xlu0 %1322  ;;  %v1342_v29 = vadd.f32 %v1326_v47, %v4696_v32 }
 0x822   :  { %v1341_v46 = vadd.f32 %v1323_v37, %v4696_v32  ;;  %v1387_v57 = vsel %vm603_vm3, %v1362_v12, %v1358_v34 }
 0x823   :  { %v1370_v27 = vrot.slane %v1342_v29, %v4694_v30 }
 0x824   :  { %v1332_v44 = vpop.xlane.xlu1 %1331  ;;  %v1366_v52 = vrot.slane %v1341_v46, %v4694_v30 }
 0x825   :  { %v1329_v59 = vpop.xlane.xlu0 %1328  ;;  %v1344_v35 = vadd.f32 %v1332_v44, %v4696_v32 }
 0x826   :  { %v1388_v40 = vsel %vm605_vm4, %v1366_v52, %v1387_v57  ;;  %v1343_v17 = vadd.f32 %v1329_v59, %v4696_v32 }
 0x827   :  { %v1389_v63 = vsel %vm607_vm5, %v1370_v27, %v1388_v40  ;;  %v1378_v25 = vrot.slane %v1344_v35, %v4694_v30 }
 0x828   :  { %v1338_v8 = vpop.xlane.xlu1 %1337  ;;  %v1374_v23 = vrot.slane %v1343_v17, %v4694_v30 }
 0x829   :  { %v1346_v5 = vadd.f32 %v1338_v8, %v4696_v32  ;;  %v1335_v11 = vpop.xlane.xlu0 %1334 }
 0x82a   :  { %v1390_v28 = vsel %vm609_vm6, %v1374_v23, %v1389_v63  ;;  %v1345_v2 = vadd.f32 %v1335_v11, %v4696_v32  ;;  %v3454_v11 = vld [vmem:[%s5513_s21 + $0x8] sm:$0xff] }
 0x82b   :  { %v1386_v19 = vrot.slane %v1346_v5, %v4694_v30  ;;  %v1391_v22 = vsel %vm611_vm7, %v1378_v25, %v1390_v28  ;;  %v5011_v25 = vld [vmem:[%s5475_s2 + $0x8] sm:$0xff] }
 0x82c   :  { %v1382_v24 = vrot.slane %v1345_v2, %v4694_v30  ;;  %5519 = vst [vmem:[#allocation24_spill] sm:$0xff] %v5011_v25 }
 0x82e   :  { %v1392_v31 = vsel %vm613_vm8, %v1382_v24, %v1391_v22 }
 0x82f   :  { %v1393_v21 = vsel %vm615_vm9, %v1386_v19, %v1392_v31  ;;  %v5017_v19 = vld [vmem:[%s5475_s2] sm:$0xff] }
 0x830   :  { %v1395_v47 = vsel %vm283_vm10, -1e+30, %v1393_v21  ;;  %5520 = vst [vmem:[#allocation25_spill] sm:$0xff] %v5017_v19 }
 0x831   :  { %v1396_v12 = vsel %vm619_vm11, %v1395_v47, -inf }
 0x832   :  { %1397 = vmax.xlane.f32.xlu0 %v1396_v12 }
 0x8bf   :  { %v1398_v37 = vpop.xlane.xlu0 %1397 }
 0x8c0   :  { %v1399_v46 = vsub.f32 %v1395_v47, %v1398_v37 }
 0x8c2   :  { %v1400_v34 = vmul.f32 1.442695, %v1399_v46 }
 0x8c4   :  { %4075 = vpow2.f32 %v1400_v34  ;;  %v5025_v34 = vld [vmem:[%s5475_s2 + $0x10] sm:$0xff] }
 0x8c5   :  { %5521 = vst [vmem:[#allocation26_spill] sm:$0xff] %v5025_v34 }
 0x8ce   :  { %v4076_v29 = vpop.eup %4075 }
 0x8cf   :  { %v1402_v44 = vsel %vm619_vm11, %v4076_v29, 0.0 }
 0x8d0   :  { %1403 = vadd.xlane.f32.xlu1 %v1402_v44  ;;  %v5031_v44 = vld [vmem:[%s5475_s2 + $0x18] sm:$0xff] }
 0x8d1   :  { %5522 = vst [vmem:[#allocation27_spill] sm:$0xff] %v5031_v44 }
 0x95d   :  { %v1404_v52 = vpop.xlane.xlu1 %1403 }
 0x95e   :  { %4077 = vrcp.f32 %v1404_v52 }
 0x968   :  { %v4078_v57 = vpop.eup %4077 }
 0x969   :  { %v1406_v59 = vmul.f32 %v4078_v57, %v4076_v29 }
 0x96b   :  { %1891 = vst.msk [vmem:[#allocation12 + $0x38] sm:$0xff] %vm619_vm11, %v1406_v59  ;;  %v1417_v40 = vrot.slane %v1406_v59, %v4737_v39  ;;  %v1410_v17 = vrot.slane %v1406_v59, %v4629_v42  ;;  %v1424_v27 = vrot.slane %v1406_v59, %v4741_v41  ;;  %v1431_v35 = vrot.slane %v1406_v59, %v4731_v15 }
 0x96c   :  { %v1438_v8 = vrot.slane %v1406_v59, %v4745_v43  ;;  %v1445_v23 = vrot.slane %v1406_v59, %v4749_v45  ;;  %v1452_v63 = vrot.slane %v1406_v59, %v4762_v50  ;;  %v1459_v5 = vrot.slane %v1406_v59, %v4776_v58 }
 0x96d   :  { %1419 = vbcast.lane.b32.xlu1 %v1417_v40, 256  ;;  %1412 = vbcast.lane.b32.xlu0 %v1410_v17, 256 }
 0x971   :  { %1426 = vbcast.lane.b32.xlu1 %v1424_v27, 256  ;;  %1433 = vbcast.lane.b32.xlu0 %v1431_v35, 256 }
 0x975   :  { %1440 = vbcast.lane.b32.xlu1 %v1438_v8, 256  ;;  %1447 = vbcast.lane.b32.xlu0 %v1445_v23, 256 }
 0x979   :  { %1454 = vbcast.lane.b32.xlu1 %v1452_v63, 256  ;;  %1461 = vbcast.lane.b32.xlu0 %v1459_v5, 256 }
 0x97d   :  { %1530 = vperm.xlu1 %4030, %v3454_v11   ;;  %v5039_v11 = vld [vmem:[%s5475_s2 + $0x20] sm:$0xff] }
 0x97e   :  { %5523 = vst [vmem:[#allocation28_spill] sm:$0xff] %v5039_v11 }
 0x9df   :  { %v1420_v28 = vpop.permute.xlu1 %1419  ;;  %v1413_v2 = vpop.permute.xlu0 %1412 }
 0x9e0   :  { %v1464_v24 = vmul.f32 %v5011_v25, %v1420_v28  ;;  %v1463_v22 = vmul.f32 %v5017_v19, %v1413_v2  ;;  %v5045_v2 = vld [vmem:[%s5475_s2 + $0x28] sm:$0xff] }
 0x9e1   :  { %5524 = vst [vmem:[#allocation29_spill] sm:$0xff] %v5045_v2 }
 0x9e2   :  { %v1478_v31 = vsel %vm132_vm1, %v1464_v24, 0.0  ;;  %v1471_v21 = vsel %vm132_vm1, %v1463_v22, 0.0 }
 0x9e3   :  { %v1479_v47 = vrot.slane %v1478_v31, 4  ;;  %v1472_v12 = vrot.slane %v1471_v21, 4  ;;  %v1427_v37 = vpop.permute.xlu1 %1426  ;;  %v1434_v46 = vpop.permute.xlu0 %1433 }
 0x9e4   :  { %v1465_v29 = vmul.f32 %v5025_v34, %v1427_v37  ;;  %v1466_v52 = vmul.f32 %v5031_v44, %v1434_v46 }
 0x9e5   :  { %v1480_v57 = vadd.f32 %v1479_v47, %v1478_v31  ;;  %v1473_v59 = vadd.f32 %v1472_v12, %v1471_v21 }
 0x9e6   :  { %v1485_v40 = vsel %vm132_vm1, %v1465_v29, 0.0  ;;  %v1492_v17 = vsel %vm132_vm1, %v1466_v52, 0.0 }
 0x9e7   :  { %v1481_v27 = vrot.slane %v1480_v57, 2  ;;  %v1474_v35 = vrot.slane %v1473_v59, 2  ;;  %v1486_v8 = vrot.slane %v1485_v40, 4  ;;  %v1493_v23 = vrot.slane %v1492_v17, 4  ;;  %v1441_v63 = vpop.permute.xlu1 %1440  ;;  %v1448_v5 = vpop.permute.xlu0 %1447 }
 0x9e8   :  { %v1467_v28 = vmul.f32 %v5039_v11, %v1441_v63  ;;  %v1468_v24 = vmul.f32 %v5045_v2, %v1448_v5  ;;  %v5053_v5 = vld [vmem:[%s5475_s2 + $0x30] sm:$0xff] }
 0x9e9   :  { %v1482_v22 = vadd.f32 %v1481_v27, %v1480_v57  ;;  %v1475_v31 = vadd.f32 %v1474_v35, %v1473_v59  ;;  %v1487_v21 = vadd.f32 %v1486_v8, %v1485_v40  ;;  %v1494_v47 = vadd.f32 %v1493_v23, %v1492_v17  ;;  %5525 = vst [vmem:[#allocation30_spill] sm:$0xff] %v5053_v5  ;;  %v5059_v59 = vld [vmem:[%s5475_s2 + $0x38] sm:$0xff] }
 0x9ea   :  { %v1499_v12 = vsel %vm132_vm1, %v1467_v28, 0.0  ;;  %v1506_v37 = vsel %vm132_vm1, %v1468_v24, 0.0 }
 0x9eb   :  { %v1483_v46 = vrot.slane %v1482_v22, 1  ;;  %v1476_v29 = vrot.slane %v1475_v31, 1  ;;  %v1488_v52 = vrot.slane %v1487_v21, 2  ;;  %v1495_v1 = vrot.slane %v1494_v47, 2  ;;  %v1455_v63 = vpop.permute.xlu1 %1454  ;;  %v1462_v0 = vpop.permute.xlu0 %1461 }
 0x9ec   :  { %v1500_v60 = vrot.slane %v1499_v12, 4  ;;  %v1507_v49 = vrot.slane %v1506_v37, 4  ;;  %v1469_v57 = vmul.f32 %v5053_v5, %v1455_v63  ;;  %v1470_v40 = vmul.f32 %v5059_v59, %v1462_v0 }
 0x9ed   :  { %v1484_v17 = vadd.f32 %v1483_v46, %v1482_v22  ;;  %v1489_v27 = vadd.f32 %v1488_v52, %v1487_v21  ;;  %v1496_v35 = vadd.f32 %v1495_v1, %v1494_v47  ;;  %v1477_v13 = vadd.f32 %v1476_v29, %v1475_v31 }
 0x9ee   :  { %v1501_v8 = vadd.f32 %v1500_v60, %v1499_v12  ;;  %v1508_v23 = vadd.f32 %v1507_v49, %v1506_v37  ;;  %v1513_v28 = vsel %vm132_vm1, %v1469_v57, 0.0  ;;  %v1520_v24 = vsel %vm132_vm1, %v1470_v40, 0.0 }
 0x9ef   :  { %v1490_v7 = vrot.slane %v1489_v27, 1  ;;  %v1497_v2 = vrot.slane %v1496_v35, 1  ;;  %v1514_v63 = vrot.slane %v1513_v28, 4  ;;  %v1521_v34 = vrot.slane %v1520_v24, 4 }
 0x9f0   :  { %v1502_v44 = vrot.slane %v1501_v8, 2  ;;  %v1509_v5 = vrot.slane %v1508_v23, 2  ;;  %v1543_v1 = vsel %vm603_vm3, %v1484_v17, %v1477_v13 }
 0x9f1   :  { %v1491_v11 = vadd.f32 %v1490_v7, %v1489_v27  ;;  %v1515_v19 = vadd.f32 %v1514_v63, %v1513_v28  ;;  %v1522_v22 = vadd.f32 %v1521_v34, %v1520_v24  ;;  %v1498_v60 = vadd.f32 %v1497_v2, %v1496_v35 }
 0x9f2   :  { %v1503_v25 = vadd.f32 %v1502_v44, %v1501_v8  ;;  %v1510_v0 = vadd.f32 %v1509_v5, %v1508_v23 }
 0x9f3   :  { %v1516_v49 = vrot.slane %v1515_v19, 2  ;;  %v1544_v21 = vsel %vm605_vm4, %v1491_v11, %v1543_v1  ;;  %v1523_v31 = vrot.slane %v1522_v22, 2 }
 0x9f4   :  { %v1504_v47 = vrot.slane %v1503_v25, 1  ;;  %v1511_v12 = vrot.slane %v1510_v0, 1  ;;  %v1545_v57 = vsel %vm607_vm5, %v1498_v60, %v1544_v21 }
 0x9f5   :  { %v1517_v37 = vadd.f32 %v1516_v49, %v1515_v19  ;;  %v1524_v52 = vadd.f32 %v1523_v31, %v1522_v22  ;;  %v5526_v19 = vmov 0.0|0.0  }
 0x9f6   :  { %v1505_v46 = vadd.f32 %v1504_v47, %v1503_v25  ;;  %v1512_v29 = vadd.f32 %v1511_v12, %v1510_v0  ;;  %v5074_v25 = vld [vmem:[#allocation12] sm:$0xff] }
 0x9f7   :  { %v1518_v7 = vrot.slane %v1517_v37, 1  ;;  %v1525_v5 = vrot.slane %v1524_v52, 1 }
 0x9f8   :  { %v1546_v44 = vsel %vm609_vm6, %v1505_v46, %v1545_v57 }
 0x9f9   :  { %v1519_v34 = vadd.f32 %v1518_v7, %v1517_v37  ;;  %v1526_v40 = vadd.f32 %v1525_v5, %v1524_v52  ;;  %v1547_v13 = vsel %vm611_vm7, %v1512_v29, %v1546_v44 }
 0x9fb   :  { %v1548_v2 = vsel %vm613_vm8, %v1519_v34, %v1547_v13 }
 0x9fc   :  { %v1531_v11 = vpop.permute.xlu1 %1530  ;;  %v1549_v17 = vsel %vm615_vm9, %v1526_v40, %v1548_v2 }
 0x9fd   :  { %vm1532_vm14 = vcmp.eq.s32.totalorder %v1531_v11, %v4690_v18  ;;  %3716 = vmatmul.mubr.msk.f32.vlgmr.msra.gmra.mrb[8].mxu1 %vm132_vm1, %v1549_v17 }
 0x9fe   :  { %3934 = vmatpush3.bf16.msra.mxu1 %v4853_v4  ;;  %3722 = vmatprep.mubr.msk.f32.mxu1 %vm4327_vm0, %v5074_v25  ;;  %v3455_v27 = vsel %vm1532_vm14, 1.0, %v5074_v25 }
 0x9ff   :  { %3947 = vmatprep.subr.bf16.mxu1 %v5526_v19 }
 0xa01   :  { %3723 = vmatmul.mubr.msk.f32.vlgmr.msra.gmra.mrb[10].mxu1 %vm845_vm13, %v3455_v27 }
 0xa02   :  { %3949 = vmatpush3.bf16.msra.mxu1 %v4530_v10  ;;  %3755 = vmatprep.mubr.msk.f32.mxu1 %vm4327_vm0, %v5074_v25 }
 0xa03   :  { %3950 = vmatprep.subr.bf16.mxu1 %v5526_v19 }
 0xa06   :  { %3952 = vmatpush3.bf16.msra.mxu1 %v4545_v16 }
 0xa07   :  { %3965 = vmatprep.subr.bf16.mxu1 %v5526_v19 }
 0xad0   :  { %v1618_v35 = vpop.f32.mrb[8].mxu1 }
 0xad1   :  { %v3717_v8 = vpop.f32.mrb[9].mxu1 }
 0xad4   :  { %v1691_v23 = vpop.f32.mrb[10].mxu1 }
 0xad5   :  { %v1692_v28 = vadd.f32 %v1691_v23, %v1618_v35  ;;  %v3724_v24 = vpop.f32.mrb[11].mxu1 }
 0xad7   :  { %v1765_v63 = vadd.f32 %v4939_v26, %v1692_v28 }
 0xad9   :  { %v1766_v0 = vadd.f32 %v4870_v38, %v1765_v63 }
 0xadb   :  { %4079 = vtanh.f32 %v1766_v0  ;;  %v3459_v1 = vmul.f32 -1.442695, %v1766_v0 }
 0xadd   :  { %4081 = vpow2.f32 %v3459_v1 }
 0xae5   :  { %v4080_v22 = vpop.eup %4079 }
 0xae6   :  { %1776 = vrot.lane.b32.xlu0 %v4080_v22, %s4332_s9 }
 0xae7   :  { %v4082_v60 = vpop.eup %4081 }
 0xae8   :  { %v1770_v49 = vadd.f32 1.0, %v4082_v60 }
 0xaea   :  { %4083 = vrcp.f32 %v1770_v49 }
 0xaf4   :  { %v4084_v21 = vpop.eup %4083 }
 0xaf5   :  { %v1774_v31 = vmul.f32 %v4084_v21, %v4875_v53 }
 0xb58   :  { %v1777_v47 = vpop.permute.xlu0 %1776 }
 0xb59   :  { %v1779_v12 = vmul.f32 %v4084_v21, %v1777_v47 }
 0xb5b   :  { %1781 = vrot.lane.b32.xlu1 %v1779_v12, %s4331_s7 }
 0xbcd   :  { %v1782_v37 = vpop.permute.xlu1 %1781 }
 0xbce   :  { %v5092_v26 = vadd.f32 %v1782_v37, %v1774_v31 }
 0xbd0   :  { %4085 = vtanh.f32 %v5092_v26 }
 0xbda   :  { %v4086_v38 = vpop.eup %4085 }
 0xbdb   :  { %1787 = vrot.lane.b32.xlu0 %v4086_v38, %s4332_s9 }
 0xc4d   :  { %v1788_v46 = vpop.permute.xlu0 %1787 }
 0xc4e   :  { %v1790_v29 = vmul.f32 %v4084_v21, %v1788_v46 }
 0xc50   :  { %1792 = vrot.lane.b32.xlu1 %v1790_v29, %s4331_s7 }
 0xcc2   :  { %v5097_v52 = vpop.permute.xlu1 %1792 }
 0xcc3   :  { %1883 = vst.msk [vmem:[#allocation12 + $0x28] sm:$0xff] %vm328_vm2, %v5097_v52  ;;  %3745 = vmatmul.mubr.msk.f32.vlgmr.msra.gmra.mrb[14].mxu0 %vm328_vm2, %v5097_v52  ;;  %3756 = vmatmul.mubr.msk.f32.vlgmr.msra.gmra.mrb[12].mxu1 %vm328_vm2, %v5097_v52 }
 0xcc4   :  { %3955 = vmatpush3.bf16.msra.mxu0 %v4757_v48  ;;  %3967 = vmatpush3.bf16.msra.mxu1 %v4853_v4 }
 0xcc5   :  { %3956 = vmatprep.subr.bf16.mxu0 %v5526_v19  ;;  %3781 = vmatprep.mubr.msk.f32.mxu1 %vm4327_vm0, %v5074_v25 }
 0xcc6   :  { %3968 = vmatprep.subr.bf16.mxu1 %v5526_v19  ;;  %3774 = vmatprep.mubr.msk.f32.mxu0 %vm4327_vm0, %v5074_v25 }
 0xcc8   :  { %3958 = vmatpush3.bf16.msra.mxu0 %v4771_v56 }
 0xcc9   :  { %3959 = vmatprep.subr.bf16.mxu0 %v5526_v19 }
 0xccc   :  { %3961 = vmatpush3.bf16.msra.mxu0 %v4785_v62 }
 0xccd   :  { %3962 = vmatprep.subr.bf16.mxu0 %v5526_v19 }
 0xcd0   :  { %3964 = vmatpush3.bf16.msra.mxu0 %v4802_v6 }
 0xcd1   :  { %3980 = vmatprep.subr.bf16.mxu0 %v5526_v19 }
 0xd96   :  { %v5119_v57 = vpop.f32.mrb[14].mxu0  ;;  %v1958_v7 = vpop.f32.mrb[12].mxu1 }
 0xd97   :  { %5527 = vst [vmem:[#allocation31_spill] sm:$0xff] %v5119_v57  ;;  %v1963_v44 = vcombine.high %v1958_v7, %v1958_v7  ;;  %v1970_v5 = vrot.slane %v1958_v7, %v4625_v36  ;;  %v3746_v34 = vpop.f32.mrb[15].mxu0  ;;  %v3757_v40 = vpop.f32.mrb[13].mxu1 }
 0xd98   :  { %v5143_v40 = vld [vmem:[#allocation11] ss:$0 sm:$0xff] }
 0xd99   :  { %v1977_v13 = vrot.slane %v1963_v44, %v4625_v36  ;;  %v1978_v2 = vcombine.high %v1970_v5, %v1970_v5  ;;  %v1986_v11 = vrot.slane %v1970_v5, %v4625_v36 }
 0xd9b   :  { %v1979_v17 = vcombine.high %v1977_v13, %v1977_v13  ;;  %v1993_v27 = vrot.slane %v1977_v13, %v4625_v36  ;;  %v2000_v35 = vrot.slane %v1978_v2, %v4625_v36  ;;  %v2008_v8 = vcombine.high %v1986_v11, %v1986_v11 }
 0xd9c   :  { %v2015_v23 = vrot.slane %v1986_v11, %v4629_v42 }
 0xd9d   :  { %v2007_v28 = vrot.slane %v1979_v17, %v4625_v36  ;;  %v2009_v24 = vcombine.high %v1993_v27, %v1993_v27  ;;  %v2010_v63 = vcombine.high %v2000_v35, %v2000_v35  ;;  %v2019_v0 = vrot.slane %v2000_v35, %v4629_v42 }
 0xd9e   :  { %v2023_v22 = vrot.slane %v2008_v8, %v4629_v42  ;;  %v2031_v1 = vrot.slane %v1993_v27, %v4629_v42  ;;  %v2052_v60 = vadd.f32 %v2015_v23, %v4638_v55 }
 0xd9f   :  { %v2011_v49 = vcombine.high %v2007_v28, %v2007_v28  ;;  %v2027_v21 = vrot.slane %v2010_v63, %v4629_v42  ;;  %v2039_v47 = vrot.slane %v2009_v24, %v4629_v42  ;;  %v2035_v12 = vrot.slane %v2007_v28, %v4629_v42 }
 0xda0   :  { %v2053_v31 = vadd.f32 %v2019_v0, %v4636_v54  ;;  %v2054_v37 = vadd.f32 %v2023_v22, %v4648_v3  ;;  %4087 = vtanh.f32 %v2052_v60  ;;  %v2056_v46 = vadd.f32 %v2031_v1, %v4656_v14 }
 0xda1   :  { %v2055_v38 = vadd.f32 %v2027_v21, %v4644_v61  ;;  %v2058_v29 = vadd.f32 %v2039_v47, %v4664_v33  ;;  %v2043_v7 = vrot.slane %v2011_v49, %v4629_v42  ;;  %v2057_v44 = vadd.f32 %v2035_v12, %v4653_v9 }
 0xda2   :  { %4089 = vtanh.f32 %v2053_v31 }
 0xda3   :  { %4091 = vtanh.f32 %v2054_v37  ;;  %v2059_v5 = vadd.f32 %v2043_v7, %v4660_v20 }
 0xda4   :  { %4093 = vtanh.f32 %v2055_v38 }
 0xda5   :  { %4095 = vtanh.f32 %v2056_v46 }
 0xda6   :  { %4097 = vtanh.f32 %v2058_v29 }
 0xda7   :  { %4099 = vtanh.f32 %v2057_v44 }
 0xda8   :  { %4101 = vtanh.f32 %v2059_v5 }
 0xdaa   :  { %v4088_v34 = vpop.eup %4087 }
 0xdab   :  { %v2068_v13 = vmul.f32 %v5143_v40, %v4088_v34 }
 0xdac   :  { %v4090_v2 = vpop.eup %4089 }
 0xdad   :  { %v4092_v11 = vpop.eup %4091  ;;  %v2076_v17 = vsel %vm328_vm2, %v2068_v13, 0.0  ;;  %v2069_v27 = vmul.f32 %v5143_v40, %v4090_v2 }
 0xdae   :  { %v4094_v35 = vpop.eup %4093  ;;  %2077 = vadd.xlane.f32.xlu0 %v2076_v17  ;;  %v2070_v8 = vmul.f32 %v5143_v40, %v4092_v11 }
 0xdaf   :  { %v4096_v23 = vpop.eup %4095  ;;  %v2079_v28 = vsel %vm328_vm2, %v2069_v27, 0.0  ;;  %v2071_v22 = vmul.f32 %v5143_v40, %v4094_v35 }
 0xdb0   :  { %2080 = vadd.xlane.f32.xlu1 %v2079_v28  ;;  %v2072_v24 = vmul.f32 %v5143_v40, %v4096_v23  ;;  %v4098_v63 = vpop.eup %4097  ;;  %v2082_v0 = vsel %vm328_vm2, %v2070_v8, 0.0 }
 0xdb1   :  { %v4100_v1 = vpop.eup %4099  ;;  %v2074_v49 = vmul.f32 %v5143_v40, %v4098_v63  ;;  %v2085_v21 = vsel %vm328_vm2, %v2071_v22, 0.0 }
 0xdb2   :  { %2083 = vadd.xlane.f32.xlu0 %v2082_v0  ;;  %v2088_v60 = vsel %vm328_vm2, %v2072_v24, 0.0  ;;  %v2073_v47 = vmul.f32 %v5143_v40, %v4100_v1  ;;  %v4102_v12 = vpop.eup %4101 }
 0xdb3   :  { %v2094_v31 = vsel %vm328_vm2, %v2074_v49, 0.0  ;;  %v2075_v38 = vmul.f32 %v5143_v40, %v4102_v12 }
 0xdb4   :  { %2089 = vadd.xlane.f32.xlu1 %v2088_v60  ;;  %v2091_v37 = vsel %vm328_vm2, %v2073_v47, 0.0 }
 0xdb5   :  { %v2097_v46 = vsel %vm328_vm2, %v2075_v38, 0.0 }
 0xdb6   :  { %2086 = vadd.xlane.f32.xlu0 %v2085_v21 }
 0xdb8   :  { %2095 = vadd.xlane.f32.xlu1 %v2094_v31 }
 0xdba   :  { %2092 = vadd.xlane.f32.xlu0 %v2091_v37 }
 0xdbe   :  { %2098 = vadd.xlane.f32.xlu0 %v2097_v46 }
 0xe3b   :  { %v2078_v29 = vpop.xlane.xlu0 %2077 }
 0xe3c   :  { %v2100_v44 = vadd.f32 %v2078_v29, %v4696_v32 }
 0xe3d   :  { %v2081_v7 = vpop.xlane.xlu1 %2080 }
 0xe3e   :  { %v2101_v5 = vadd.f32 %v2081_v7, %v4696_v32  ;;  %v2119_v17 = vrot.slane %v2100_v44, %v4694_v30 }
 0xe3f   :  { %v2084_v34 = vpop.xlane.xlu0 %2083 }
 0xe40   :  { %v2123_v13 = vrot.slane %v2101_v5, %v4694_v30  ;;  %v2102_v2 = vadd.f32 %v2084_v34, %v4696_v32 }
 0xe41   :  { %v2090_v11 = vpop.xlane.xlu1 %2089 }
 0xe42   :  { %v2127_v27 = vrot.slane %v2102_v2, %v4694_v30  ;;  %v2148_v8 = vsel %vm603_vm3, %v2123_v13, %v2119_v17  ;;  %v2104_v28 = vadd.f32 %v2090_v11, %v4696_v32 }
 0xe43   :  { %v2087_v35 = vpop.xlane.xlu0 %2086 }
 0xe44   :  { %v2103_v23 = vadd.f32 %v2087_v35, %v4696_v32  ;;  %v2149_v0 = vsel %vm605_vm4, %v2127_v27, %v2148_v8  ;;  %v2135_v49 = vrot.slane %v2104_v28, %v4694_v30 }
 0xe45   :  { %v2096_v63 = vpop.xlane.xlu1 %2095 }
 0xe46   :  { %v2131_v24 = vrot.slane %v2103_v23, %v4694_v30  ;;  %v2106_v21 = vadd.f32 %v2096_v63, %v4696_v32 }
 0xe47   :  { %v2093_v22 = vpop.xlane.xlu0 %2092 }
 0xe48   :  { %v2150_v1 = vsel %vm607_vm5, %v2131_v24, %v2149_v0  ;;  %v2105_v60 = vadd.f32 %v2093_v22, %v4696_v32  ;;  %v2143_v46 = vrot.slane %v2106_v21, %v4694_v30 }
 0xe49   :  { %v2151_v31 = vsel %vm609_vm6, %v2135_v49, %v2150_v1 }
 0xe4a   :  { %v2139_v47 = vrot.slane %v2105_v60, %v4694_v30  ;;  %v3462_v60 = vld [vmem:[%s5513_s21 + $0x10] sm:$0xff] }
 0xe4b   :  { %v2099_v12 = vpop.xlane.xlu0 %2098 }
 0xe4c   :  { %v2107_v37 = vadd.f32 %v2099_v12, %v4696_v32  ;;  %v2152_v38 = vsel %vm611_vm7, %v2139_v47, %v2151_v31  ;;  %v5528_v31 = vld [vmem:[#allocation24_spill] sm:$0xff] }
 0xe4d   :  { %v2153_v7 = vsel %vm613_vm8, %v2143_v46, %v2152_v38  ;;  %v5529_v38 = vld [vmem:[#allocation25_spill] sm:$0xff] }
 0xe4e   :  { %v2147_v29 = vrot.slane %v2107_v37, %v4694_v30 }
 0xe50   :  { %v2154_v44 = vsel %vm615_vm9, %v2147_v29, %v2153_v7 }
 0xe51   :  { %v2156_v5 = vsel %vm283_vm10, -1e+30, %v2154_v44 }
 0xe52   :  { %v2157_v34 = vsel %vm619_vm11, %v2156_v5, -inf }
 0xe53   :  { %2158 = vmax.xlane.f32.xlu1 %v2157_v34 }
 0xee0   :  { %v2159_v13 = vpop.xlane.xlu1 %2158 }
 0xee1   :  { %v2160_v2 = vsub.f32 %v2156_v5, %v2159_v13 }
 0xee3   :  { %v2161_v11 = vmul.f32 1.442695, %v2160_v2  ;;  %v5530_v2 = vld [vmem:[#allocation28_spill] sm:$0xff] }
 0xee5   :  { %4103 = vpow2.f32 %v2161_v11 }
 0xeef   :  { %v4104_v17 = vpop.eup %4103 }
 0xef0   :  { %v2163_v27 = vsel %vm619_vm11, %v4104_v17, 0.0 }
 0xef1   :  { %2164 = vadd.xlane.f32.xlu0 %v2163_v27 }
 0xf7e   :  { %v2165_v35 = vpop.xlane.xlu0 %2164 }
 0xf7f   :  { %4105 = vrcp.f32 %v2165_v35 }
 0xf89   :  { %v4106_v8 = vpop.eup %4105 }
 0xf8a   :  { %v2167_v23 = vmul.f32 %v4106_v8, %v4104_v17  ;;  %v5531_v17 = vld [vmem:[#allocation26_spill] sm:$0xff] }
 0xf8c   :  { %2652 = vst.msk [vmem:[#allocation12 + $0x58] sm:$0xff] %vm619_vm11, %v2167_v23  ;;  %v2178_v28 = vrot.slane %v2167_v23, %v4737_v39  ;;  %v2171_v24 = vrot.slane %v2167_v23, %v4629_v42  ;;  %v2199_v63 = vrot.slane %v2167_v23, %v4745_v43  ;;  %v2185_v0 = vrot.slane %v2167_v23, %v4741_v41 }
 0xf8d   :  { %v2213_v22 = vrot.slane %v2167_v23, %v4762_v50  ;;  %v2192_v1 = vrot.slane %v2167_v23, %v4731_v15  ;;  %v2206_v49 = vrot.slane %v2167_v23, %v4749_v45  ;;  %v2220_v21 = vrot.slane %v2167_v23, %v4776_v58 }
 0xf8e   :  { %2180 = vbcast.lane.b32.xlu0 %v2178_v28, 256  ;;  %2173 = vbcast.lane.b32.xlu1 %v2171_v24, 256 }
 0xf92   :  { %2201 = vbcast.lane.b32.xlu0 %v2199_v63, 256  ;;  %2187 = vbcast.lane.b32.xlu1 %v2185_v0, 256 }
 0xf96   :  { %2215 = vbcast.lane.b32.xlu0 %v2213_v22, 256  ;;  %2194 = vbcast.lane.b32.xlu1 %v2192_v1, 256 }
 0xf9a   :  { %2291 = vperm.xlu0 %4029, %v3462_v60   ;;  %2208 = vbcast.lane.b32.xlu1 %v2206_v49, 256  ;;  %v5532_v49 = vld [vmem:[#allocation30_spill] sm:$0xff] }
 0xf9e   :  { %2222 = vbcast.lane.b32.xlu1 %v2220_v21, 256 }
0x1000   :  { %v2181_v47 = vpop.permute.xlu0 %2180  ;;  %v2174_v12 = vpop.permute.xlu1 %2173 }
0x1001   :  { %v2225_v37 = vmul.f32 %v5528_v31, %v2181_v47  ;;  %v2224_v46 = vmul.f32 %v5529_v38, %v2174_v12  ;;  %v5533_v47 = vld [vmem:[#allocation27_spill] sm:$0xff] }
0x1003   :  { %v2239_v29 = vsel %vm132_vm1, %v2225_v37, 0.0  ;;  %v2232_v7 = vsel %vm132_vm1, %v2224_v46, 0.0 }
0x1004   :  { %v2240_v44 = vrot.slane %v2239_v29, 4  ;;  %v2233_v5 = vrot.slane %v2232_v7, 4  ;;  %v2202_v34 = vpop.permute.xlu0 %2201  ;;  %v2188_v13 = vpop.permute.xlu1 %2187 }
0x1005   :  { %v2228_v11 = vmul.f32 %v5530_v2, %v2202_v34  ;;  %v2226_v27 = vmul.f32 %v5531_v17, %v2188_v13 }
0x1006   :  { %v2241_v35 = vadd.f32 %v2240_v44, %v2239_v29  ;;  %v2234_v8 = vadd.f32 %v2233_v5, %v2232_v7 }
0x1007   :  { %v2260_v23 = vsel %vm132_vm1, %v2228_v11, 0.0  ;;  %v2246_v28 = vsel %vm132_vm1, %v2226_v27, 0.0  ;;  %v5534_v11 = vld [vmem:[#allocation29_spill] sm:$0xff] }
0x1008   :  { %v2242_v24 = vrot.slane %v2241_v35, 2  ;;  %v2235_v63 = vrot.slane %v2234_v8, 2  ;;  %v2261_v0 = vrot.slane %v2260_v23, 4  ;;  %v2247_v22 = vrot.slane %v2246_v28, 4  ;;  %v2216_v1 = vpop.permute.xlu0 %2215  ;;  %v2195_v60 = vpop.permute.xlu1 %2194 }
0x1009   :  { %v2230_v21 = vmul.f32 %v5532_v49, %v2216_v1  ;;  %v2227_v12 = vmul.f32 %v5533_v47, %v2195_v60 }
0x100a   :  { %v2243_v31 = vadd.f32 %v2242_v24, %v2241_v35  ;;  %v2262_v37 = vadd.f32 %v2261_v0, %v2260_v23  ;;  %v2248_v38 = vadd.f32 %v2247_v22, %v2246_v28  ;;  %v2236_v46 = vadd.f32 %v2235_v63, %v2234_v8 }
0x100b   :  { %v2274_v29 = vsel %vm132_vm1, %v2230_v21, 0.0  ;;  %v2253_v7 = vsel %vm132_vm1, %v2227_v12, 0.0 }
0x100c   :  { %v2249_v44 = vrot.slane %v2248_v38, 2  ;;  %v2209_v5 = vpop.permute.xlu1 %2208  ;;  %v2263_v34 = vrot.slane %v2262_v37, 2  ;;  %v2275_v13 = vrot.slane %v2274_v29, 4  ;;  %v2254_v2 = vrot.slane %v2253_v7, 4 }
0x100d   :  { %v2229_v17 = vmul.f32 %v5534_v11, %v2209_v5  ;;  %v2244_v27 = vrot.slane %v2243_v31, 1  ;;  %v2237_v1 = vrot.slane %v2236_v46, 1 }
0x100e   :  { %v2250_v53 = vadd.f32 %v2249_v44, %v2248_v38  ;;  %v2276_v49 = vadd.f32 %v2275_v13, %v2274_v29  ;;  %v2255_v60 = vadd.f32 %v2254_v2, %v2253_v7  ;;  %v2264_v24 = vadd.f32 %v2263_v34, %v2262_v37 }
0x100f   :  { %v2267_v35 = vsel %vm132_vm1, %v2229_v17, 0.0  ;;  %v2245_v47 = vadd.f32 %v2244_v27, %v2243_v31  ;;  %v2238_v12 = vadd.f32 %v2237_v1, %v2236_v46 }
0x1010   :  { %v2251_v23 = vrot.slane %v2250_v53, 1  ;;  %v2268_v8 = vrot.slane %v2267_v35, 4  ;;  %v2223_v28 = vpop.permute.xlu1 %2222  ;;  %v2277_v63 = vrot.slane %v2276_v49, 2  ;;  %v2256_v0 = vrot.slane %v2255_v60, 2 }
0x1011   :  { %v2231_v22 = vmul.f32 %v5059_v59, %v2223_v28  ;;  %v2265_v7 = vrot.slane %v2264_v24, 1  ;;  %v2304_v37 = vsel %vm603_vm3, %v2245_v47, %v2238_v12 }
0x1012   :  { %v2269_v21 = vadd.f32 %v2268_v8, %v2267_v35  ;;  %v2257_v57 = vadd.f32 %v2256_v0, %v2255_v60  ;;  %v2252_v38 = vadd.f32 %v2251_v23, %v2250_v53  ;;  %v2278_v13 = vadd.f32 %v2277_v63, %v2276_v49  ;;  %v5535_v63 = vld [vmem:[#allocation18_spill] sm:$0xff] }
0x1013   :  { %v2281_v5 = vsel %vm132_vm1, %v2231_v22, 0.0  ;;  %v2266_v31 = vadd.f32 %v2265_v7, %v2264_v24  ;;  %v5536_v22 = vld [vmem:[#allocation19_spill] sm:$0xff] }
0x1014   :  { %v2270_v44 = vrot.slane %v2269_v21, 2  ;;  %v2282_v29 = vrot.slane %v2281_v5, 4  ;;  %v2258_v2 = vrot.slane %v2257_v57, 1  ;;  %v2305_v58 = vsel %vm605_vm4, %v2252_v38, %v2304_v37 }
0x1015   :  { %v2279_v46 = vrot.slane %v2278_v13, 1 }
0x1016   :  { %v2271_v11 = vadd.f32 %v2270_v44, %v2269_v21  ;;  %v2283_v17 = vadd.f32 %v2282_v29, %v2281_v5  ;;  %v2259_v34 = vadd.f32 %v2258_v2, %v2257_v57  ;;  %v5537_v21 = vld [vmem:[#allocation21_spill] sm:$0xff] }
0x1017   :  { %v2280_v28 = vadd.f32 %v2279_v46, %v2278_v13  ;;  %v5251_v13 = vld [vmem:[%s5481_s8] ss:$0 sm:$0xff] }
0x1018   :  { %v2272_v59 = vrot.slane %v2271_v11, 1  ;;  %v2284_v35 = vrot.slane %v2283_v17, 2  ;;  %v2306_v27 = vsel %vm607_vm5, %v2259_v34, %v2305_v58 }
0x1019   :  { %v2292_v1 = vpop.permute.xlu0 %2291  ;;  %v2307_v23 = vsel %vm609_vm6, %v2266_v31, %v2306_v27 }
0x101a   :  { %v2273_v53 = vadd.f32 %v2272_v59, %v2271_v11  ;;  %v2285_v60 = vadd.f32 %v2284_v35, %v2283_v17  ;;  %vm2293_vm15 = vcmp.eq.s32.totalorder %v2292_v1, %v4690_v18 }
0x101b   :  { %v3463_v49 = vsel %vm2293_vm15, 1.0, %v5074_v25 }
0x101c   :  { %v2286_v8 = vrot.slane %v2285_v60, 1  ;;  %3782 = vmatmul.mubr.msk.f32.vlgmr.msra.gmra.mrb[14].mxu1 %vm845_vm13, %v3463_v49  ;;  %v2308_v57 = vsel %vm611_vm7, %v2273_v53, %v2307_v23 }
0x101d   :  { %3970 = vmatpush3.bf16.msra.mxu1 %v5535_v63  ;;  %3792 = vmatprep.mubr.msk.f32.mxu1 %vm4327_vm0, %v5074_v25  ;;  %v2309_v24 = vsel %vm613_vm8, %v2280_v28, %v2308_v57 }
0x101e   :  { %v2287_v58 = vadd.f32 %v2286_v8, %v2285_v60  ;;  %3971 = vmatprep.subr.bf16.mxu1 %v5526_v19 }
0x1020   :  { %v2310_v0 = vsel %vm615_vm9, %v2287_v58, %v2309_v24 }
0x1021   :  { %3973 = vmatpush3.bf16.msra.mxu1 %v5536_v22  ;;  %3775 = vmatmul.mubr.msk.f32.vlgmr.msra.gmra.mrb[16].mxu0 %vm132_vm1, %v2310_v0 }
0x1022   :  { %3974 = vmatprep.subr.bf16.mxu1 %v5526_v19  ;;  %3982 = vmatpush3.bf16.msra.mxu0 %v4530_v10  ;;  %v5538_v10 = vld [vmem:[#allocation22_spill] sm:$0xff] }
0x1023   :  { %3983 = vmatprep.subr.bf16.mxu0 %v5526_v19  ;;  %3814 = vmatprep.mubr.msk.f32.mxu0 %vm4327_vm0, %v5074_v25 }
0x1024   :  { %3793 = vmatmul.mubr.msk.f32.vlgmr.msra.gmra.mrb[16].mxu1 %vm328_vm2, %v5097_v52 }
0x1025   :  { %3976 = vmatpush3.bf16.msra.mxu1 %v5537_v21  ;;  %3803 = vmatprep.mubr.msk.f32.mxu1 %vm4327_vm0, %v5074_v25 }
0x1026   :  { %3977 = vmatprep.subr.bf16.mxu1 %v5526_v19  ;;  %3985 = vmatpush3.bf16.msra.mxu0 %v4545_v16 }
0x1027   :  { %3998 = vmatprep.subr.bf16.mxu0 %v5526_v19 }
0x1029   :  { %3979 = vmatpush3.bf16.msra.mxu1 %v5538_v10 }
0x102a   :  { %3986 = vmatprep.subr.bf16.mxu1 %v5526_v19 }
0x10ef   :  { %v2452_v47 = vpop.f32.mrb[14].mxu1 }
0x10f0   :  { %v3783_v12 = vpop.f32.mrb[15].mxu1 }
0x10f4   :  { %v2379_v5 = vpop.f32.mrb[16].mxu0 }
0x10f5   :  { %v2453_v38 = vadd.f32 %v2452_v47, %v2379_v5  ;;  %v3776_v52 = vpop.f32.mrb[17].mxu0 }
0x10f7   :  { %v2522_v44 = vpop.f32.mrb[16].mxu1 }
0x10f8   :  { %v2526_v29 = vadd.f32 %v2522_v44, %v2453_v38  ;;  %v3794_v7 = vpop.f32.mrb[17].mxu1 }
0x10fa   :  { %v2527_v16 = vadd.f32 %v5251_v13, %v2526_v29 }
0x10fc   :  { %4107 = vtanh.f32 %v2527_v16  ;;  %v3467_v11 = vmul.f32 -1.442695, %v2527_v16 }
0x10fe   :  { %4109 = vpow2.f32 %v3467_v11 }
0x1106   :  { %v4108_v2 = vpop.eup %4107 }
0x1107   :  { %2537 = vrot.lane.b32.xlu1 %v4108_v2, %s4332_s9 }
0x1108   :  { %v4110_v17 = vpop.eup %4109 }
0x1109   :  { %v2531_v37 = vadd.f32 1.0, %v4110_v17 }
0x110b   :  { %4111 = vrcp.f32 %v2531_v37 }
0x1115   :  { %v4112_v34 = vpop.eup %4111 }
0x1116   :  { %v2535_v31 = vmul.f32 %v4112_v34, %v5092_v26 }
0x1179   :  { %v2538_v59 = vpop.permute.xlu1 %2537 }
0x117a   :  { %v2540_v35 = vmul.f32 %v4112_v34, %v2538_v59 }
0x117c   :  { %2542 = vrot.lane.b32.xlu0 %v2540_v35, %s4331_s7 }
0x11ee   :  { %v2543_v46 = vpop.permute.xlu0 %2542 }
0x11ef   :  { %v5257_v27 = vadd.f32 %v2543_v46, %v2535_v31 }
0x11f1   :  { %4113 = vtanh.f32 %v5257_v27 }
0x11fb   :  { %v4114_v1 = vpop.eup %4113 }
0x11fc   :  { %2548 = vrot.lane.b32.xlu1 %v4114_v1, %s4332_s9 }
0x126e   :  { %v2549_v53 = vpop.permute.xlu1 %2548 }
0x126f   :  { %v2551_v60 = vmul.f32 %v4112_v34, %v2549_v53 }
0x1271   :  { %2553 = vrot.lane.b32.xlu0 %v2551_v60, %s4331_s7 }
0x12e3   :  { %v5262_v49 = vpop.permute.xlu0 %2553 }
0x12e4   :  { %2644 = vst.msk [vmem:[#allocation12 + $0x48] sm:$0xff] %vm328_vm2, %v5262_v49  ;;  %3804 = vmatmul.mubr.msk.f32.vlgmr.msra.gmra.mrb[18].mxu1 %vm328_vm2, %v5262_v49  ;;  %3815 = vmatmul.mubr.msk.f32.vlgmr.msra.gmra.mrb[18].mxu0 %vm328_vm2, %v5262_v49 }
0x12e5   :  { %3988 = vmatpush3.bf16.msra.mxu1 %v4757_v48  ;;  %4000 = vmatpush3.bf16.msra.mxu0 %v4853_v4 }
0x12e6   :  { %3989 = vmatprep.subr.bf16.mxu1 %v5526_v19  ;;  %3833 = vmatprep.mubr.msk.f32.mxu1 %vm4327_vm0, %v5074_v25 }
0x12e7   :  { %3840 = vmatprep.mubr.msk.f32.mxu0 %vm4327_vm0, %v5074_v25  ;;  %4001 = vmatprep.subr.bf16.mxu0 %v5526_v19 }
0x12e9   :  { %3991 = vmatpush3.bf16.msra.mxu1 %v4771_v56 }
0x12ea   :  { %3992 = vmatprep.subr.bf16.mxu1 %v5526_v19 }
0x12ed   :  { %3994 = vmatpush3.bf16.msra.mxu1 %v4785_v62 }
0x12ee   :  { %3995 = vmatprep.subr.bf16.mxu1 %v5526_v19 }
0x12f1   :  { %3997 = vmatpush3.bf16.msra.mxu1 %v4802_v6 }
0x13b7   :  { %v5283_v48 = vpop.f32.mrb[18].mxu1  ;;  %v2719_v4 = vpop.f32.mrb[18].mxu0 }
0x13b8   :  { %v2724_v23 = vcombine.high %v2719_v4, %v2719_v4  ;;  %v2731_v8 = vrot.slane %v2719_v4, %v4625_v36  ;;  %v3805_v57 = vpop.f32.mrb[19].mxu1  ;;  %v3816_v25 = vpop.f32.mrb[19].mxu0 }
0x13ba   :  { %v2738_v28 = vrot.slane %v2724_v23, %v4625_v36  ;;  %v2739_v58 = vcombine.high %v2731_v8, %v2731_v8  ;;  %v2747_v56 = vrot.slane %v2731_v8, %v4625_v36 }
0x13bc   :  { %v2740_v24 = vcombine.high %v2738_v28, %v2738_v28  ;;  %v2754_v62 = vrot.slane %v2738_v28, %v4625_v36  ;;  %v2761_v0 = vrot.slane %v2739_v58, %v4625_v36  ;;  %v2769_v47 = vcombine.high %v2747_v56, %v2747_v56 }
0x13bd   :  { %v2776_v6 = vrot.slane %v2747_v56, %v4629_v42 }
0x13be   :  { %v2768_v12 = vrot.slane %v2740_v24, %v4625_v36  ;;  %v2771_v5 = vcombine.high %v2761_v0, %v2761_v0  ;;  %v2780_v38 = vrot.slane %v2761_v0, %v4629_v42  ;;  %v2770_v52 = vcombine.high %v2754_v62, %v2754_v62 }
0x13bf   :  { %v2784_v44 = vrot.slane %v2769_v47, %v4629_v42  ;;  %v2792_v29 = vrot.slane %v2754_v62, %v4629_v42  ;;  %v2813_v7 = vadd.f32 %v2776_v6, %v4638_v55 }
0x13c0   :  { %v2772_v16 = vcombine.high %v2768_v12, %v2768_v12  ;;  %v2788_v2 = vrot.slane %v2771_v5, %v4629_v42  ;;  %v2796_v11 = vrot.slane %v2768_v12, %v4629_v42  ;;  %v2814_v17 = vadd.f32 %v2780_v38, %v4636_v54 }
0x13c1   :  { %v2815_v37 = vadd.f32 %v2784_v44, %v4648_v3  ;;  %4115 = vtanh.f32 %v2813_v7  ;;  %v2817_v59 = vadd.f32 %v2792_v29, %v4656_v14  ;;  %v2800_v35 = vrot.slane %v2770_v52, %v4629_v42 }
0x13c2   :  { %v2804_v36 = vrot.slane %v2772_v16, %v4629_v42  ;;  %v2816_v34 = vadd.f32 %v2788_v2, %v4644_v61  ;;  %v2818_v55 = vadd.f32 %v2796_v11, %v4653_v9  ;;  %4117 = vtanh.f32 %v2814_v17 }
0x13c3   :  { %4119 = vtanh.f32 %v2815_v37  ;;  %v2819_v54 = vadd.f32 %v2800_v35, %v4664_v33 }
0x13c4   :  { %v2820_v31 = vadd.f32 %v2804_v36, %v4660_v20  ;;  %4121 = vtanh.f32 %v2816_v34 }
0x13c5   :  { %4123 = vtanh.f32 %v2817_v59 }
0x13c6   :  { %4125 = vtanh.f32 %v2818_v55 }
0x13c7   :  { %4127 = vtanh.f32 %v2820_v31 }
0x13c8   :  { %4129 = vtanh.f32 %v2819_v54 }
0x13cb   :  { %v4116_v3 = vpop.eup %4115 }
0x13cc   :  { %v2829_v61 = vmul.f32 %v5143_v40, %v4116_v3  ;;  %v4118_v46 = vpop.eup %4117 }
0x13cd   :  { %v4120_v14 = vpop.eup %4119  ;;  %v2830_v9 = vmul.f32 %v5143_v40, %v4118_v46 }
0x13ce   :  { %v2837_v1 = vsel %vm328_vm2, %v2829_v61, 0.0  ;;  %v4122_v53 = vpop.eup %4121  ;;  %v2831_v33 = vmul.f32 %v5143_v40, %v4120_v14 }
0x13cf   :  { %2838 = vadd.xlane.f32.xlu1 %v2837_v1  ;;  %v4124_v60 = vpop.eup %4123  ;;  %v2840_v20 = vsel %vm328_vm2, %v2830_v9, 0.0  ;;  %v2832_v4 = vmul.f32 %v5143_v40, %v4122_v53 }
0x13d0   :  { %v4126_v23 = vpop.eup %4125  ;;  %2841 = vadd.xlane.f32.xlu0 %v2840_v20  ;;  %v2843_v28 = vsel %vm328_vm2, %v2831_v33, 0.0  ;;  %v2833_v58 = vmul.f32 %v5143_v40, %v4124_v60 }
0x13d1   :  { %v2846_v8 = vsel %vm328_vm2, %v2832_v4, 0.0  ;;  %v2834_v57 = vmul.f32 %v5143_v40, %v4126_v23  ;;  %v4128_v25 = vpop.eup %4127 }
0x13d2   :  { %v4130_v56 = vpop.eup %4129  ;;  %v2836_v62 = vmul.f32 %v5143_v40, %v4128_v25  ;;  %v2849_v0 = vsel %vm328_vm2, %v2833_v58, 0.0 }
0x13d3   :  { %2847 = vadd.xlane.f32.xlu1 %v2846_v8  ;;  %v2852_v24 = vsel %vm328_vm2, %v2834_v57, 0.0  ;;  %v2835_v47 = vmul.f32 %v5143_v40, %v4130_v56 }
0x13d4   :  { %2844 = vadd.xlane.f32.xlu0 %v2843_v28  ;;  %v2858_v6 = vsel %vm328_vm2, %v2836_v62, 0.0 }
0x13d5   :  { %v2855_v12 = vsel %vm328_vm2, %v2835_v47, 0.0 }
0x13d7   :  { %2853 = vadd.xlane.f32.xlu1 %v2852_v24 }
0x13d8   :  { %2850 = vadd.xlane.f32.xlu0 %v2849_v0 }
0x13db   :  { %2859 = vadd.xlane.f32.xlu1 %v2858_v6 }
0x13dc   :  { %2856 = vadd.xlane.f32.xlu0 %v2855_v12 }
0x145c   :  { %v2839_v5 = vpop.xlane.xlu1 %2838 }
0x145d   :  { %v2842_v38 = vpop.xlane.xlu0 %2841  ;;  %v2861_v44 = vadd.f32 %v2839_v5, %v4696_v32 }
0x145e   :  { %v2862_v52 = vadd.f32 %v2842_v38, %v4696_v32 }
0x145f   :  { %v2880_v40 = vrot.slane %v2861_v44, %v4694_v30 }
0x1460   :  { %v2848_v29 = vpop.xlane.xlu1 %2847  ;;  %v2884_v7 = vrot.slane %v2862_v52, %v4694_v30  ;;  %v5539_v52 = vld [vmem:[#allocation17_spill] sm:$0xff] }
0x1461   :  { %v2845_v16 = vpop.xlane.xlu0 %2844  ;;  %v2864_v11 = vadd.f32 %v2848_v29, %v4696_v32 }
0x1462   :  { %v2863_v2 = vadd.f32 %v2845_v16, %v4696_v32  ;;  %v2909_v36 = vsel %vm603_vm3, %v2884_v7, %v2880_v40 }
0x1463   :  { %v2892_v55 = vrot.slane %v2864_v11, %v4694_v30 }
0x1464   :  { %v2854_v17 = vpop.xlane.xlu1 %2853  ;;  %v2888_v37 = vrot.slane %v2863_v2, %v4694_v30 }
0x1465   :  { %v2851_v34 = vpop.xlane.xlu0 %2850  ;;  %v2866_v31 = vadd.f32 %v2854_v17, %v4696_v32  ;;  %v4172_v17 = vld [vmem:[%s5475_s2 + $0x10] sm:$0xff] }
0x1466   :  { %v2910_v59 = vsel %vm605_vm4, %v2888_v37, %v2909_v36  ;;  %v2865_v35 = vadd.f32 %v2851_v34, %v4696_v32  ;;  %v4173_v36 = vld [vmem:[%s5475_s2 + $0x18] sm:$0xff] }
0x1467   :  { %v2911_v61 = vsel %vm607_vm5, %v2892_v55, %v2910_v59  ;;  %v2900_v53 = vrot.slane %v2866_v31, %v4694_v30 }
0x1468   :  { %v2860_v54 = vpop.xlane.xlu1 %2859  ;;  %v2896_v3 = vrot.slane %v2865_v35, %v4694_v30 }
0x1469   :  { %v2868_v46 = vadd.f32 %v2860_v54, %v4696_v32  ;;  %v2857_v14 = vpop.xlane.xlu0 %2856 }
0x146a   :  { %v2912_v1 = vsel %vm609_vm6, %v2896_v3, %v2911_v61  ;;  %v2867_v9 = vadd.f32 %v2857_v14, %v4696_v32 }
0x146b   :  { %v2908_v20 = vrot.slane %v2868_v46, %v4694_v30  ;;  %v2913_v4 = vsel %vm611_vm7, %v2900_v53, %v2912_v1 }
0x146c   :  { %v2904_v60 = vrot.slane %v2867_v9, %v4694_v30  ;;  %v4174_v9 = vld [vmem:[%s5475_s2 + $0x20] sm:$0xff] }
0x146e   :  { %v2914_v33 = vsel %vm613_vm8, %v2904_v60, %v2913_v4  ;;  %v4175_v60 = vld [vmem:[%s5475_s2 + $0x28] sm:$0xff] }
0x146f   :  { %v2915_v23 = vsel %vm615_vm9, %v2908_v20, %v2914_v33 }
0x1470   :  { %v2917_v8 = vsel %vm283_vm10, -1e+30, %v2915_v23 }
0x1471   :  { %v2918_v57 = vsel %vm619_vm11, %v2917_v8, -inf }
0x1472   :  { %2919 = vmax.xlane.f32.xlu0 %v2918_v57 }
0x14ff   :  { %v2920_v32 = vpop.xlane.xlu0 %2919 }
0x1500   :  { %v2921_v25 = vsub.f32 %v2917_v8, %v2920_v32 }
0x1502   :  { %v2922_v28 = vmul.f32 1.442695, %v2921_v25 }
0x1504   :  { %4131 = vpow2.f32 %v2922_v28 }
0x150e   :  { %v4132_v58 = vpop.eup %4131 }
0x150f   :  { %v2924_v30 = vsel %vm619_vm11, %v4132_v58, 0.0 }
0x1510   :  { %2925 = vadd.xlane.f32.xlu1 %v2924_v30 }
0x159d   :  { %v2926_v56 = vpop.xlane.xlu1 %2925 }
0x159e   :  { %4133 = vrcp.f32 %v2926_v56 }
0x15a8   :  { %v4134_v24 = vpop.eup %4133 }
0x15a9   :  { %v2928_v62 = vmul.f32 %v4134_v24, %v4132_v58 }
0x15ab   :  { %3413 = vst.msk [vmem:[#allocation12 + $0x78] sm:$0xff] %vm619_vm11, %v2928_v62  ;;  %v2939_v51 = vrot.slane %v2928_v62, %v4737_v39  ;;  %v2932_v0 = vrot.slane %v2928_v62, %v4629_v42  ;;  %v2946_v47 = vrot.slane %v2928_v62, %v4741_v41  ;;  %v2953_v6 = vrot.slane %v2928_v62, %v4731_v15  ;;  %v3470_v42 = vld [vmem:[%s5513_s21 + $0x18] sm:$0xff] }
0x15ac   :  { %v2960_v12 = vrot.slane %v2928_v62, %v4745_v43  ;;  %v2967_v5 = vrot.slane %v2928_v62, %v4749_v45  ;;  %v2974_v38 = vrot.slane %v2928_v62, %v4762_v50  ;;  %v2981_v39 = vrot.slane %v2928_v62, %v5539_v52  ;;  %v4170_v43 = vld [vmem:[%s5475_s2 + $0x8] sm:$0xff]  ;;  %v4171_v50 = vld [vmem:[%s5475_s2] sm:$0xff] }
0x15ad   :  { %2941 = vbcast.lane.b32.xlu1 %v2939_v51, 256  ;;  %2934 = vbcast.lane.b32.xlu0 %v2932_v0, 256  ;;  %v4176_v0 = vld [vmem:[%s5475_s2 + $0x30] sm:$0xff] }
0x15b1   :  { %2948 = vbcast.lane.b32.xlu1 %v2946_v47, 256  ;;  %2955 = vbcast.lane.b32.xlu0 %v2953_v6, 256  ;;  %v4177_v6 = vld [vmem:[%s5475_s2 + $0x38] sm:$0xff] }
0x15b5   :  { %2962 = vbcast.lane.b32.xlu1 %v2960_v12, 256  ;;  %2969 = vbcast.lane.b32.xlu0 %v2967_v5, 256 }
0x15b9   :  { %2976 = vbcast.lane.b32.xlu1 %v2974_v38, 256  ;;  %2983 = vbcast.lane.b32.xlu0 %v2981_v39, 256 }
0x15bd   :  { %3052 = vperm.xlu1 %4030, %v3470_v42  }
0x161f   :  { %v2942_v15 = vpop.permute.xlu1 %2941  ;;  %v2935_v41 = vpop.permute.xlu0 %2934 }
0x1620   :  { %v2986_v45 = vmul.f32 %v4170_v43, %v2942_v15  ;;  %v2985_v44 = vmul.f32 %v4171_v50, %v2935_v41 }
0x1622   :  { %v3000_v29 = vsel %vm132_vm1, %v2986_v45, 0.0  ;;  %v2993_v7 = vsel %vm132_vm1, %v2985_v44, 0.0 }
0x1623   :  { %v3001_v16 = vrot.slane %v3000_v29, 4  ;;  %v2994_v2 = vrot.slane %v2993_v7, 4  ;;  %v2949_v40 = vpop.permute.xlu1 %2948  ;;  %v2956_v11 = vpop.permute.xlu0 %2955 }
0x1624   :  { %v2987_v37 = vmul.f32 %v4172_v17, %v2949_v40  ;;  %v2988_v34 = vmul.f32 %v4173_v36, %v2956_v11 }
0x1625   :  { %v3002_v59 = vadd.f32 %v3001_v16, %v3000_v29  ;;  %v2995_v35 = vadd.f32 %v2994_v2, %v2993_v7 }
0x1626   :  { %v3007_v55 = vsel %vm132_vm1, %v2987_v37, 0.0  ;;  %v3014_v31 = vsel %vm132_vm1, %v2988_v34, 0.0 }
0x1627   :  { %v3003_v54 = vrot.slane %v3002_v59, 2  ;;  %v2996_v3 = vrot.slane %v2995_v35, 2  ;;  %v3008_v61 = vrot.slane %v3007_v55, 4  ;;  %v3015_v46 = vrot.slane %v3014_v31, 4  ;;  %v2963_v14 = vpop.permute.xlu1 %2962  ;;  %v2970_v1 = vpop.permute.xlu0 %2969 }
0x1628   :  { %v2989_v53 = vmul.f32 %v4174_v9, %v2963_v14  ;;  %v2990_v20 = vmul.f32 %v4175_v60, %v2970_v1 }
0x1629   :  { %v3004_v4 = vadd.f32 %v3003_v54, %v3002_v59  ;;  %v2997_v33 = vadd.f32 %v2996_v3, %v2995_v35  ;;  %v3009_v23 = vadd.f32 %v3008_v61, %v3007_v55  ;;  %v3016_v8 = vadd.f32 %v3015_v46, %v3014_v31 }
0x162a   :  { %v3021_v57 = vsel %vm132_vm1, %v2989_v53, 0.0  ;;  %v3028_v32 = vsel %vm132_vm1, %v2990_v20, 0.0 }
0x162b   :  { %v3005_v25 = vrot.slane %v3004_v4, 1  ;;  %v2998_v28 = vrot.slane %v2997_v33, 1  ;;  %v3010_v58 = vrot.slane %v3009_v23, 2  ;;  %v3017_v30 = vrot.slane %v3016_v8, 2  ;;  %v2977_v56 = vpop.permute.xlu1 %2976  ;;  %v2984_v24 = vpop.permute.xlu0 %2983 }
0x162c   :  { %v3022_v62 = vrot.slane %v3021_v57, 4  ;;  %v3029_v51 = vrot.slane %v3028_v32, 4  ;;  %v2991_v47 = vmul.f32 %v4176_v0, %v2977_v56  ;;  %v2992_v12 = vmul.f32 %v4177_v6, %v2984_v24 }
0x162d   :  { %v3006_v5 = vadd.f32 %v3005_v25, %v3004_v4  ;;  %v3011_v38 = vadd.f32 %v3010_v58, %v3009_v23  ;;  %v3018_v52 = vadd.f32 %v3017_v30, %v3016_v8  ;;  %v2999_v43 = vadd.f32 %v2998_v28, %v2997_v33 }
0x162e   :  { %v3023_v39 = vadd.f32 %v3022_v62, %v3021_v57  ;;  %v3030_v42 = vadd.f32 %v3029_v51, %v3028_v32  ;;  %v3035_v15 = vsel %vm132_vm1, %v2991_v47, 0.0  ;;  %v3042_v41 = vsel %vm132_vm1, %v2992_v12, 0.0  ;;  %v4178_v32 = vld [vmem:[#allocation12] sm:$0xff] }
0x162f   :  { %v3012_v45 = vrot.slane %v3011_v38, 1  ;;  %v3019_v50 = vrot.slane %v3018_v52, 1  ;;  %v3036_v44 = vrot.slane %v3035_v15, 4  ;;  %v3043_v16 = vrot.slane %v3042_v41, 4 }
0x1630   :  { %v3024_v29 = vrot.slane %v3023_v39, 2  ;;  %v3031_v7 = vrot.slane %v3030_v42, 2  ;;  %v3065_v36 = vsel %vm603_vm3, %v3006_v5, %v2999_v43 }
0x1631   :  { %v3013_v2 = vadd.f32 %v3012_v45, %v3011_v38  ;;  %v3037_v40 = vadd.f32 %v3036_v44, %v3035_v15  ;;  %v3044_v37 = vadd.f32 %v3043_v16, %v3042_v41  ;;  %v3020_v34 = vadd.f32 %v3019_v50, %v3018_v52  ;;  %v3451_v38 = vld [vmem:[%s5488_s15] ss:$0 sm:$0xff]  ;;  %v5540_v52 = vld [vmem:[#allocation23_spill] sm:$0xff]  ;;  %s4333_s15 = smov 96  }
0x1632   :  { %v3025_v11 = vadd.f32 %v3024_v29, %v3023_v39  ;;  %v3032_v17 = vadd.f32 %v3031_v7, %v3030_v42  ;;  %v1103_v39 = vadd.f32 %v3451_v38, %v5540_v52  ;;  %v5429_v42 = vadd.f32 %v3451_v38, %v5283_v48  ;;  %v5541_v50 = vld [vmem:[#allocation31_spill] sm:$0xff] }
0x1633   :  { %v3038_v59 = vrot.slane %v3037_v40, 2  ;;  %v3066_v35 = vsel %vm605_vm4, %v3013_v2, %v3065_v36  ;;  %v3045_v54 = vrot.slane %v3044_v37, 2  ;;  %v1863_v44 = vadd.f32 %v3451_v38, %v5541_v50 }
0x1634   :  { %v3026_v55 = vrot.slane %v3025_v11, 1  ;;  %v3033_v31 = vrot.slane %v3032_v17, 1  ;;  %v3067_v1 = vsel %vm607_vm5, %v3020_v34, %v3066_v35  ;;  %v1106_v15 = vsel %vm845_vm13, %v1103_v39, -inf }
0x1635   :  { %v3039_v3 = vadd.f32 %v3038_v59, %v3037_v40  ;;  %v3046_v14 = vadd.f32 %v3045_v54, %v3044_v37  ;;  %v2627_v41 = vsel %vm845_vm13, %v5429_v42, -inf  ;;  %v1866_v29 = vsel %vm845_vm13, %v1863_v44, -inf }
0x1636   :  { %v3027_v61 = vadd.f32 %v3026_v55, %v3025_v11  ;;  %v3034_v46 = vadd.f32 %v3033_v31, %v3032_v17 }
0x1637   :  { %v3040_v9 = vrot.slane %v3039_v3, 1  ;;  %v3047_v60 = vrot.slane %v3046_v14, 1 }
0x1638   :  { %v3068_v53 = vsel %vm609_vm6, %v3027_v61, %v3067_v1 }
0x1639   :  { %v3041_v20 = vadd.f32 %v3040_v9, %v3039_v3  ;;  %v3048_v4 = vadd.f32 %v3047_v60, %v3046_v14  ;;  %v3069_v33 = vsel %vm611_vm7, %v3034_v46, %v3068_v53 }
0x163b   :  { %v3070_v23 = vsel %vm613_vm8, %v3041_v20, %v3069_v33 }
0x163c   :  { %v3053_v8 = vpop.permute.xlu1 %3052  ;;  %v3071_v57 = vsel %vm615_vm9, %v3048_v4, %v3070_v23 }
0x163d   :  { %vm3054_vm3 = vcmp.eq.s32.totalorder %v3053_v8, %v4690_v18  ;;  %3834 = vmatmul.mubr.msk.f32.vlgmr.msra.gmra.mrb[20].mxu1 %vm132_vm1, %v3071_v57 }
0x163e   :  { %v3471_v25 = vsel %vm3054_vm3, 1.0, %v4178_v32 }
0x163f   :  { %3841 = vmatmul.mubr.msk.f32.vlgmr.msra.gmra.mrb[20].mxu0 %vm845_vm13, %v3471_v25 }
0x1640   :  { %4003 = vmatpush3.bf16.msra.mxu0 %v5535_v63  ;;  %3851 = vmatprep.mubr.msk.f32.mxu0 %vm4327_vm0, %v4178_v32 }
0x1641   :  { %4004 = vmatprep.subr.bf16.mxu0 %v5526_v19 }
0x1644   :  { %4006 = vmatpush3.bf16.msra.mxu0 %v5536_v22 }
0x1645   :  { %4007 = vmatprep.subr.bf16.mxu0 %v5526_v19 }
0x1647   :  { %3852 = vmatmul.mubr.msk.f32.vlgmr.msra.gmra.mrb[22].mxu0 %vm328_vm2, %v5262_v49 }
0x1648   :  { %4009 = vmatpush3.bf16.msra.mxu0 %v5537_v21  ;;  %3862 = vmatprep.mubr.msk.f32.mxu0 %vm4327_vm0, %v4178_v32 }
0x1649   :  { %4010 = vmatprep.subr.bf16.mxu0 %v5526_v19 }
0x164c   :  { %4012 = vmatpush3.bf16.msra.mxu0 %v5538_v10 }
0x1710   :  { %v3140_v18 = vpop.f32.mrb[20].mxu1 }
0x1711   :  { %v3835_v63 = vpop.f32.mrb[21].mxu1 }
0x1712   :  { %v3213_v28 = vpop.f32.mrb[20].mxu0 }
0x1713   :  { %v3214_v58 = vadd.f32 %v3213_v28, %v3140_v18  ;;  %v3842_v30 = vpop.f32.mrb[21].mxu0  ;;  %v5542_v28 = vld [vmem:[#allocation20_spill] sm:$0xff] }
0x171a   :  { %v3283_v56 = vpop.f32.mrb[22].mxu0 }
0x171b   :  { %v3287_v22 = vadd.f32 %v3283_v56, %v3214_v58  ;;  %v3853_v24 = vpop.f32.mrb[23].mxu0 }
0x171d   :  { %v3288_v62 = vadd.f32 %v5251_v13, %v3287_v22 }
0x171f   :  { %4135 = vtanh.f32 %v3288_v62  ;;  %v3475_v21 = vmul.f32 -1.442695, %v3288_v62 }
0x1721   :  { %4137 = vpow2.f32 %v3475_v21 }
0x1729   :  { %v4136_v49 = vpop.eup %4135 }
0x172a   :  { %3298 = vrot.lane.b32.xlu0 %v4136_v49, %s4332_s9 }
0x172b   :  { %v4138_v51 = vpop.eup %4137 }
0x172c   :  { %v3292_v19 = vadd.f32 1.0, %v4138_v51 }
0x172e   :  { %4139 = vrcp.f32 %v3292_v19 }
0x1738   :  { %v4140_v10 = vpop.eup %4139 }
0x1739   :  { %v3296_v6 = vmul.f32 %v4140_v10, %v5257_v27 }
0x179c   :  { %v3299_v0 = vpop.permute.xlu0 %3298 }
0x179d   :  { %v3301_v47 = vmul.f32 %v4140_v10, %v3299_v0 }
0x179f   :  { %3303 = vrot.lane.b32.xlu1 %v3301_v47, %s4331_s7 }
0x1811   :  { %v3304_v12 = vpop.permute.xlu1 %3303 }
0x1812   :  { %v5420_v5 = vadd.f32 %v3304_v12, %v3296_v6 }
0x1814   :  { %4141 = vtanh.f32 %v5420_v5 }
0x181e   :  { %v4142_v13 = vpop.eup %4141 }
0x181f   :  { %3309 = vrot.lane.b32.xlu0 %v4142_v13, %s4332_s9 }
0x183e   :  { %1107 = vmax.xlane.f32.xlu0 %v1106_v15 }
0x1842   :  { %2628 = vmax.xlane.f32.xlu0 %v2627_v41 }
0x1891   :  { %v3310_v43 = vpop.permute.xlu0 %3309 }
0x1892   :  { %v3312_v45 = vmul.f32 %v4140_v10, %v3310_v43 }
0x1894   :  { %3314 = vrot.lane.b32.xlu1 %v3312_v45, %s4331_s7  ;;  %s4334_s7 = smov [#allocation12]  }
0x1895   :  { %s3419_s9 = sshll.u32 %s4334_s7, 4  ;;  %s3420_s9 = int_to_ptr.vmem [resolvable:$true] %s3419_s9 }
0x1896   :  { %s4289_s11 = scalar_lea.vmem %s3420_s9, 2048  ;;  %p4294_p13 = scmp.lt.s32.totalorder %s3420_s9, %s3420_s9 }
0x1897   :  { %p4290_p12 = scmp.ne.s32.totalorder %s3420_s9, %s4289_s11  ;;  %p4295_p0 = scmp.lt.s32.totalorder %s4289_s11, %s4289_s11 }
0x1899   :  { %p4296_p1 = por %p4295_p0, %p4294_p13 }
0x189b   :  { %p4297_p2 = pnand %p4296_p1, %p4290_p12 }
0x18b8   :  { %1867 = vmax.xlane.f32.xlu1 %v1866_v29 }
0x18cb   :  { %v1108_v7 = vpop.xlane.xlu0 %1107 }
0x18cc   :  { %v1109_v16 = vsub.f32 %v1103_v39, %v1108_v7 }
0x18ce   :  { %v1110_v48 = vmul.f32 1.442695, %v1109_v16 }
0x18cf   :  { %v2629_v17 = vpop.xlane.xlu0 %2628 }
0x18d0   :  { %4143 = vpow2.f32 %v1110_v48  ;;  %v2630_v37 = vsub.f32 %v5429_v42, %v2629_v17 }
0x18d2   :  { %v2631_v59 = vmul.f32 1.442695, %v2630_v37 }
0x18da   :  { %v4144_v2 = vpop.eup %4143 }
0x18db   :  { %v1112_v40 = vsel %vm845_vm13, %v4144_v2, 0.0 }
0x18dc   :  { %1113 = vadd.xlane.f32.xlu1 %v1112_v40 }
0x1906   :  { %v3315_v11 = vpop.permute.xlu1 %3314 }
0x1907   :  { %3405 = vst.msk [vmem:[#allocation12 + $0x68] sm:$0xff] %vm328_vm2, %v3315_v11  ;;  %3863 = vmatmul.mubr.msk.f32.vlgmr.msra.gmra.mrb[24].mxu0 %vm328_vm2, %v3315_v11 }
0x1945   :  { %v1868_v36 = vpop.xlane.xlu1 %1867 }
0x1946   :  { %v1869_v34 = vsub.f32 %v1863_v44, %v1868_v36 }
0x1948   :  { %v1870_v35 = vmul.f32 1.442695, %v1869_v34 }
0x194a   :  { %4145 = vpow2.f32 %v1870_v35 }
0x194b   :  { %4147 = vpow2.f32 %v2631_v59 }
0x1954   :  { %v4146_v55 = vpop.eup %4145 }
0x1955   :  { %v1872_v31 = vsel %vm845_vm13, %v4146_v55, 0.0  ;;  %v4148_v54 = vpop.eup %4147 }
0x1956   :  { %1873 = vadd.xlane.f32.xlu1 %v1872_v31  ;;  %v2633_v3 = vsel %vm845_vm13, %v4148_v54, 0.0 }
0x195a   :  { %2634 = vadd.xlane.f32.xlu1 %v2633_v3 }
0x1969   :  { %v1114_v61 = vpop.xlane.xlu1 %1113 }
0x196a   :  { %4149 = vlog2.f32 %v1114_v61 }
0x1974   :  { %v4150_v46 = vpop.eup %4149 }
0x1975   :  { %v1116_v14 = vmul.f32 0.6931472, %v4150_v46 }
0x1977   :  { %v1117_v1 = vadd.f32 %v1116_v14, %v1108_v7 }
0x1979   :  { %v1118_v9 = vsub.f32 %v1103_v39, %v1117_v1 }
0x197b   :  { %1119 = vst.msk [vmem:[#allocation12] sm:$0xff] %vm845_vm13, %v1118_v9 }
0x19da   :  { %v3384_v53 = vpop.f32.mrb[24].mxu0 }
0x19db   :  { %v3385_v60 = vadd.f32 %v3451_v38, %v3384_v53  ;;  %v3864_v20 = vpop.f32.mrb[25].mxu0 }
0x19dd   :  { %v3388_v4 = vsel %vm845_vm13, %v3385_v60, -inf }
0x19de   :  { %3389 = vmax.xlane.f32.xlu0 %v3388_v4 }
0x19e3   :  { %v1874_v33 = vpop.xlane.xlu1 %1873 }
0x19e4   :  { %4151 = vlog2.f32 %v1874_v33 }
0x19e7   :  { %v2635_v23 = vpop.xlane.xlu1 %2634 }
0x19e8   :  { %4153 = vlog2.f32 %v2635_v23 }
0x19ee   :  { %v4152_v8 = vpop.eup %4151 }
0x19ef   :  { %v1876_v57 = vmul.f32 0.6931472, %v4152_v8 }
0x19f1   :  { %v1877_v32 = vadd.f32 %v1876_v57, %v1868_v36 }
0x19f2   :  { %v4154_v25 = vpop.eup %4153 }
0x19f3   :  { %v1878_v18 = vsub.f32 %v1863_v44, %v1877_v32  ;;  %v2637_v63 = vmul.f32 0.6931472, %v4154_v25 }
0x19f4   :  { %1124 = vrot.lane.b32.xlu0 %v5542_v28, %s4333_s15 }
0x19f5   :  { %1880 = vst.msk [vmem:[#allocation12 + $0x20] sm:$0xff] %vm845_vm13, %v1878_v18  ;;  %v2638_v58 = vadd.f32 %v2637_v63, %v2629_v17 }
0x19f7   :  { %v2639_v30 = vsub.f32 %v5429_v42, %v2638_v58 }
0x19f8   :  { %2646 = vrot.lane.b32.xlu0 %v5257_v27, %s4333_s15 }
0x19f9   :  { %2641 = vst.msk [vmem:[#allocation12 + $0x40] sm:$0xff] %vm845_vm13, %v2639_v30 }
0x19fc   :  { %3407 = vrot.lane.b32.xlu0 %v5420_v5, %s4333_s15 }
0x1a6b   :  { %v3390_v56 = vpop.xlane.xlu0 %3389 }
0x1a6c   :  { %v3391_v22 = vsub.f32 %v3385_v60, %v3390_v56 }
0x1a6e   :  { %v3392_v24 = vmul.f32 1.442695, %v3391_v22 }
0x1a6f   :  { %v1125_v62 = vpop.permute.xlu0 %1124 }
0x1a70   :  { %4155 = vpow2.f32 %v3392_v24  ;;  %1128 = vst.msk [vmem:[#allocation12 + $0x10] sm:$0xff] %vm328_vm2, %v1125_v62 }
0x1a73   :  { %v2647_v49 = vpop.permute.xlu0 %2646 }
0x1a74   :  { %2650 = vst.msk [vmem:[#allocation12 + $0x50] sm:$0xff] %vm328_vm2, %v2647_v49 }
0x1a77   :  { %v3408_v21 = vpop.permute.xlu0 %3407 }
0x1a78   :  { %3411 = vst.msk [vmem:[#allocation12 + $0x70] sm:$0xff] %vm328_vm2, %v3408_v21 }
0x1a7a   :  { %v4156_v51 = vpop.eup %4155 }
0x1a7b   :  { %v3394_v27 = vsel %vm845_vm13, %v4156_v51, 0.0 }
0x1a7c   :  { %3395 = vadd.xlane.f32.xlu1 %v3394_v27 }
0x1a8d   :  { %1885 = vrot.lane.b32.xlu1 %v5092_v26, %s4333_s15 }
0x1b09   :  { %v3396_v19 = vpop.xlane.xlu1 %3395 }
0x1b0a   :  { %4157 = vlog2.f32 %v3396_v19 }
0x1b0d   :  { %v1886_v10 = vpop.permute.xlu1 %1885 }
0x1b0e   :  { %1889 = vst.msk [vmem:[#allocation12 + $0x30] sm:$0xff] %vm328_vm2, %v1886_v10 }
0x1b14   :  { %v4158_v0 = vpop.eup %4157 }
0x1b15   :  { %v3398_v47 = vmul.f32 0.6931472, %v4158_v0 }
0x1b17   :  { %v3399_v6 = vadd.f32 %v3398_v47, %v3390_v56 }
0x1b19   :  { %v3400_v12 = vsub.f32 %v3385_v60, %v3399_v6 }
0x1b1b   :  { %3402 = vst.msk [vmem:[#allocation12 + $0x60] sm:$0xff] %vm845_vm13, %v3400_v12 }
0x1b1c   :  { %4300 = shalt.err (!%p4297_p2)
}
0x1b1d   :  { %s4301_s30 = scalar_lea.hbm %s5489_s16, 2048 }
0x1b1e   :  { %p4302_p3 = scmp.ne.s32.totalorder %s5489_s16, %s4301_s30  ;;  %p4305_p4 = scmp.lt.u32.totalorder %s4301_s30, %s5489_s16 }
0x1b20   :  { %p4307_p5 = pnand %p4305_p4, %p4302_p3 }
0x1b22   :  { %4310 = shalt.err (!%p4307_p5)
}
0x1b23   :  { %3425 = dma.vmem_to_hbm [thread:$0]  %s3420_s9, 2048, %s5489_s16, [#allocation5], %s4323_s3, %s4323_s3, %s4324_s17  }
0x1b24   :  { %4317 = dma.done.wait [#allocation5], 2048  }
0x1b25   :  { %4318 = vsyncadd [#allocation5], 4294965248 }
0x1b26   :  { %3429 = vsyncpa [#allocation4], 1 }
0x1b27   :  { %3430 = vsyncpa [#allocation7], 1 }
0x1b28   :  { %3431 = vsyncpa [#allocation10], 1 }
0x1b29   :  { %3432 = vsyncpa [#allocation5], 1 }

</bundles_post_ra>
